<compile_context>
chip_gen: v6e
topology: v6e:2x2x1
jax: 0.10.0
libtpu: 0.0.40
codegen_flags: <defaults>
</compile_context>

<pallas_src>
import math

import jax
import jax.numpy as jnp
from jax.experimental import pallas as pl
from jax.experimental.pallas import tpu as pltpu

# ---- config (mirrors the `args` namespace used by DummyTransformer) --------
TOKEN_DIM = 8          # args.token_dim  (== per-entity feature size e)
EMB = 32               # args.emb
HEADS = 2
DEPTH = 2
ACTION_SPACE = 6       # args.action_space_size
MAX_AGENTS_LEN = 8     # args.max_agents_len
ENEMY_FEATURE = 8      # args.enemy_feature (== token_dim for this obs layout)
TASK_ALLY = 4
TASK_ENEMY = 3
FF_HIDDEN = 2 * EMB
LN_EPS = 1e-5          # nn.LayerNorm default
OUT_LANES = 128        # lane-dense output slab width
QKV_LANES = 128        # fused QKV weight padded from 3*EMB=96 to 128 lanes

SEQ = MAX_AGENTS_LEN + 1   # entity tokens + appended hidden token = 9
B_TILE = 8                 # samples per grid step -> 72 rows (multiple of 8 sublanes)
TILE_ROWS = B_TILE * SEQ   # 72


# ---------------------------------------------------------------------------
# Single fused kernel: embedding -> DEPTH blocks -> fused top/q_basic linear
# Runs once per batch tile of B_TILE samples (TILE_ROWS rows).
# ---------------------------------------------------------------------------
def _fused_forward_kernel(x_ref, bias_ref, embw_ref, topproj_ref, obias_ref,
                          wqkv_ref, wo_ref, w1_ref, w2_ref, bvec_ref, o_ref):
    f32 = jnp.float32
    E, FF, hd = EMB, FF_HIDDEN, EMB // HEADS

    def layer_norm(z, g, b):
        mu = jnp.mean(z, axis=-1, keepdims=True)
        var = jnp.mean(jnp.square(z - mu), axis=-1, keepdims=True)
        return (z - mu) * jax.lax.rsqrt(var + LN_EPS) * g + b   # rsqrt -> EUP

    # tile-local block-diagonal batch mask (0 within sample, -1e30 across samples)
    attn_bias = bias_ref[...]                                    # (TILE_ROWS, TILE_ROWS)

    # Embedding + hidden-token splice in ONE matmul:
    # x rows are [features(8), 1, hidden(32)] and embw = [W_emb; b_emb; I_EMB].
    x = jnp.dot(x_ref[...], embw_ref[...], preferred_element_type=f32)

    for d in range(DEPTH):               # static unroll (DEPTH = 2)
        vec = bvec_ref[d]                # (8, 128): bqkv | bo | bf1 | bf2 | g1 | be1 | g2 | be2
        w_o = wo_ref[d]                  # (E, E)

        # fused QKV projection (softmax scale pre-folded into the Q columns/bias)
        qkv = jnp.dot(x, wqkv_ref[d], preferred_element_type=f32) + vec[0:1, :]

        att = None
        for h in range(HEADS):           # static unroll (HEADS = 2)
            qh = qkv[:, h * hd:(h + 1) * hd]
            kh = qkv[:, E + h * hd:E + (h + 1) * hd]
            vh = qkv[:, 2 * E + h * hd:2 * E + (h + 1) * hd]
            s = jnp.einsum("nd,md->nm", qh, kh,
                           preferred_element_type=f32) + attn_bias
            m = jnp.max(s, axis=-1, keepdims=True)
            p = jnp.exp(s - m)
            p = p * pl.reciprocal(jnp.sum(p, axis=-1, keepdims=True), approx=True)
            ho = jnp.dot(p, vh, preferred_element_type=f32)          # (rows, hd)
            # fold the per-head lane concat straight into the output projection
            contrib = jnp.dot(ho, w_o[h * hd:(h + 1) * hd, :],
                              preferred_element_type=f32)
            att = contrib if att is None else att + contrib
        att = att + vec[1:2, 0:E]        # output-projection bias, added once

        y = layer_norm(att + x, vec[4:5, 0:E], vec[5:6, 0:E])        # post-LN 1
        ff = jnp.dot(y, w1_ref[d], preferred_element_type=f32) + vec[2:3, 0:FF]
        ff = jnp.maximum(ff, 0.0)                                    # ReLU
        ff = jnp.dot(ff, w2_ref[d], preferred_element_type=f32) + vec[3:4, 0:E]
        x = layer_norm(ff + y, vec[6:7, 0:E], vec[7:8, 0:E])         # post-LN 2

    # fused "top linear + q_basic" projection to a lane-dense 128-wide slab:
    # [ transformer output (32) | q_basic logits (6) | zero pad ]
    o_ref[...] = (jnp.dot(x, topproj_ref[...], preferred_element_type=f32)
                  + obias_ref[...]).astype(o_ref.dtype)


# ---------------------------------------------------------------------------
# Parameter init (deterministic, PyTorch-Linear-style uniform), packed layout
# ---------------------------------------------------------------------------
def _init_linear(key, fan_in, fan_out):
    kw, kb = jax.random.split(key)
    bound = 1.0 / math.sqrt(fan_in)
    w = jax.random.uniform(kw, (fan_in, fan_out), jnp.float32, -bound, bound)
    b = jax.random.uniform(kb, (1, fan_out), jnp.float32, -bound, bound)
    return w, b


def init_params(key):
    keys = jax.random.split(key, 3 + DEPTH)
    emb_w, emb_b = _init_linear(keys[0], TOKEN_DIM, EMB)
    top_w, top_b = _init_linear(keys[1], EMB, EMB)
    qb_w, qb_b = _init_linear(keys[2], EMB, ACTION_SPACE)

    scale = 1.0 / math.sqrt(EMB // HEADS)

    def pad_row(vals, width=QKV_LANES):
        r = jnp.zeros((1, width), jnp.float32)
        return r.at[:, :vals.shape[1]].set(vals)

    wqkv, wo, w1, w2, bvec = [], [], [], [], []
    for d in range(DEPTH):
        sub = jax.random.split(keys[3 + d], 6)
        wq, bq = _init_linear(sub[0], EMB, EMB)
        wk, bk = _init_linear(sub[1], EMB, EMB)
        wv, bv = _init_linear(sub[2], EMB, EMB)
        wo_d, bo = _init_linear(sub[3], EMB, EMB)
        w1_d, bf1 = _init_linear(sub[4], EMB, FF_HIDDEN)
        w2_d, bf2 = _init_linear(sub[5], FF_HIDDEN, EMB)

        # fused QKV weight (E, 128): softmax scale folded into Q, padded to 128 lanes
        wqkv_d = jnp.zeros((EMB, QKV_LANES), jnp.float32)
        wqkv_d = wqkv_d.at[:, 0:EMB].set(wq * scale)
        wqkv_d = wqkv_d.at[:, EMB:2 * EMB].set(wk)
        wqkv_d = wqkv_d.at[:, 2 * EMB:3 * EMB].set(wv)
        wqkv.append(wqkv_d)
        wo.append(wo_d)
        w1.append(w1_d)
        w2.append(w2_d)

        ones = jnp.ones((1, EMB), jnp.float32)
        zeros = jnp.zeros((1, EMB), jnp.float32)
        bvec.append(jnp.concatenate(
            [pad_row(jnp.concatenate([bq * scale, bk, bv], axis=1)),  # 0: fused qkv bias
             pad_row(bo), pad_row(bf1), pad_row(bf2),                 # 1-3
             pad_row(ones), pad_row(zeros),                           # 4-5: LN1 gamma/beta
             pad_row(ones), pad_row(zeros)],                          # 6-7: LN2 gamma/beta
            axis=0))                                                  # (8, 128)

    # embedding weight augmented with its bias row AND an identity block so the
    # hidden state passes straight through the same matmul.
    emb_w_full = jnp.concatenate(
        [emb_w, emb_b, jnp.eye(EMB, dtype=jnp.float32)], axis=0)     # (8+1+32, 32)

    # fused final projection: (x @ top_w + top_b) -> [out | out @ qb_w + qb_b | 0]
    proj = jnp.zeros((EMB, OUT_LANES), jnp.float32)
    proj = proj.at[:, :EMB].set(jnp.eye(EMB, dtype=jnp.float32))
    proj = proj.at[:, EMB:EMB + ACTION_SPACE].set(qb_w)
    top_proj = top_w @ proj                                           # (EMB, 128)
    out_bias = jnp.zeros((1, OUT_LANES), jnp.float32)
    out_bias = out_bias.at[:, :EMB].set(top_b)
    out_bias = out_bias.at[:, EMB:EMB + ACTION_SPACE].set(top_b @ qb_w + qb_b)

    # TODO(synk): on v6e/v7x store the MXU weights as bf16 (keep f32 accumulation);
    # kept f32 here so the same script is also optimal on v5e (no bf16 VPU/EUP).
    return dict(emb_w_full=emb_w_full, top_proj=top_proj, out_bias=out_bias,
                wqkv=jnp.stack(wqkv), wo=jnp.stack(wo),
                w1=jnp.stack(w1), w2=jnp.stack(w2), bvec=jnp.stack(bvec))


# ---------------------------------------------------------------------------
# Forward pass (layout plumbing in plain JAX, all compute in one Pallas kernel)
# ---------------------------------------------------------------------------
def _sc2_pack(inputs, task_enemy_num, task_ally_num):
    """Re-packs (b, t, e) sc2 obs into (b, MAX_AGENTS_LEN, e) UPDeT layout."""
    b, t, e = inputs.shape
    flat = inputs.reshape(b, t * e)
    f = TOKEN_DIM
    new = jnp.zeros((b, MAX_AGENTS_LEN * e), dtype=inputs.dtype)
    new = new.at[:, :f].set(flat[:, :f])
    new = new.at[:, f:f + (task_ally_num - 1) * f].set(
        flat[:, f + task_enemy_num * ENEMY_FEATURE: t * e])
    half = int(MAX_AGENTS_LEN * f / 2)
    new = new.at[:, half:half + task_enemy_num * ENEMY_FEATURE].set(
        flat[:, f:f + task_enemy_num * ENEMY_FEATURE])
    return new.reshape(b, MAX_AGENTS_LEN, e)


def dummy_transformer_forward(inputs, hidden_state, params,
                              task_enemy_num=None, task_ally_num=None,
                              env="sc2"):
    b, t, e = inputs.shape
    if env == "sc2":
        x_pad = _sc2_pack(inputs, task_enemy_num, task_ally_num)
    elif env == "simple_spread":
        x_pad = jnp.zeros((b, MAX_AGENTS_LEN, e), inputs.dtype).at[:, :t, :].set(inputs)
    else:
        raise ValueError(env)

    # pad batch to a whole number of tiles (padded samples are finite and sliced off)
    b_pad = ((b + B_TILE - 1) // B_TILE) * B_TILE
    in_w = e + 1 + EMB   # [features | 1 (bias lane) | hidden-state slot]

    x_ext = jnp.zeros((b_pad, SEQ, in_w), jnp.float32)
    x_ext = x_ext.at[:b, :MAX_AGENTS_LEN, :e].set(x_pad.astype(jnp.float32))
    x_ext = x_ext.at[:b, :MAX_AGENTS_LEN, e].set(1.0)
    x_ext = x_ext.at[:b, MAX_AGENTS_LEN, e + 1:].set(
        hidden_state.reshape(b, EMB).astype(jnp.float32))
    x_ext = x_ext.reshape(b_pad * SEQ, in_w)

    # tile-local block-diagonal attention bias (constant; DMA'd once, VMEM-resident).
    # Every row (including padded samples) attends to its own 9 rows -> no 0/0 softmax.
    sample_id = jnp.arange(TILE_ROWS, dtype=jnp.int32) // SEQ
    attn_bias = jnp.where(sample_id[:, None] == sample_id[None, :],
                          0.0, -1e30).astype(jnp.float32)            # (72, 72)

    n_steps = b_pad // B_TILE

    def resident(arr):   # whole array, same block every step -> stays in VMEM
        nd = arr.ndim
        return pl.BlockSpec(arr.shape, lambda i, _n=nd: (0,) * _n)

    slab = pl.pallas_call(
        _fused_forward_kernel,
        out_shape=jax.ShapeDtypeStruct((b_pad * SEQ, OUT_LANES), jnp.float32),
        grid=(n_steps,),
        in_specs=[pl.BlockSpec((TILE_ROWS, in_w), lambda i: (i, 0)),
                  resident(attn_bias),
                  resident(params["emb_w_full"]),
                  resident(params["top_proj"]),
                  resident(params["out_bias"]),
                  resident(params["wqkv"]),
                  resident(params["wo"]),
                  resident(params["w1"]),
                  resident(params["w2"]),
                  resident(params["bvec"])],
        out_specs=pl.BlockSpec((TILE_ROWS, OUT_LANES), lambda i: (i, 0)),
        compiler_params=pltpu.CompilerParams(
            dimension_semantics=("parallel",),          # shard tiles across v7x's 2 TCs
            vmem_limit_bytes=16 * 1024 * 1024),         # per-step footprint ~1.5 MiB
    )(x_ext, attn_bias, params["emb_w_full"], params["top_proj"],
      params["out_bias"], params["wqkv"], params["wo"], params["w1"],
      params["w2"], params["bvec"])

    slab = slab[:b * SEQ].reshape(b, SEQ, OUT_LANES)
    outputs = slab[:, :, :EMB]                      # transformer outputs (b, M+1, emb)
    q_all = slab[:, :, EMB:EMB + ACTION_SPACE]      # q_basic applied to every token
    q_basic_actions = q_all[:, 0, :]                # (b, A)
    h = outputs[:, -1:, :]                          # (b, 1, emb)

    if env == "sc2":
        half = MAX_AGENTS_LEN // 2
        q_enemies = jnp.mean(q_all[:, half:half + task_enemy_num, :], axis=2)
        q = jnp.concatenate([q_basic_actions, q_enemies], axis=1)     # (b, A + n_enemy)
        return q, h
    return q_basic_actions, h


# ---------------------------------------------------------------------------
if __name__ == "__main__":
    key = jax.random.PRNGKey(0)
    k_in, k_p = jax.random.split(key)

    b = 2
    t = TASK_ALLY + TASK_ENEMY        # 7 entity tokens (self + allies + enemies)
    e = TOKEN_DIM                     # 8 features per entity

    inputs = jax.random.normal(k_in, (b, t, e), dtype=jnp.float32)
    hidden_state = jnp.zeros((b, 1, EMB), dtype=jnp.float32)          # init_hidden()
    params = init_params(k_p)

    fwd = jax.jit(dummy_transformer_forward,
                  static_argnames=("task_enemy_num", "task_ally_num", "env"))
    q, h = fwd(inputs, hidden_state, params,
               task_enemy_num=TASK_ENEMY, task_ally_num=TASK_ALLY, env="sc2")
    jax.block_until_ready((q, h))

    assert q.shape == (b, ACTION_SPACE + TASK_ENEMY), q.shape
    assert h.shape == (b, 1, EMB), h.shape
    assert bool(jnp.all(jnp.isfinite(q))) and bool(jnp.all(jnp.isfinite(h)))
    print("KERNEL_OK")
</pallas_src>

<mosaic_0001>
module attributes {stable_mosaic.version = 11 : i64} {
  func.func @_fused_forward_kernel(%arg0: i32, %arg1: memref<72x41xf32, #tpu.memory_space<vmem>>, %arg2: memref<72x72xf32, #tpu.memory_space<vmem>>, %arg3: memref<41x32xf32, #tpu.memory_space<vmem>>, %arg4: memref<32x128xf32, #tpu.memory_space<vmem>>, %arg5: memref<1x128xf32, #tpu.memory_space<vmem>>, %arg6: memref<2x32x128xf32, #tpu.memory_space<vmem>>, %arg7: memref<2x32x32xf32, #tpu.memory_space<vmem>>, %arg8: memref<2x32x64xf32, #tpu.memory_space<vmem>>, %arg9: memref<2x64x32xf32, #tpu.memory_space<vmem>>, %arg10: memref<2x8x128xf32, #tpu.memory_space<vmem>>, %arg11: memref<72x128xf32, #tpu.memory_space<vmem>>) attributes {dimension_semantics = [#tpu.dimension_semantics<parallel>], iteration_bounds = array<i64: 1>, scalar_prefetch = 0 : i64, scratch_operands = 0 : i64, tpu.core_type = #tpu.core_type<tc>, window_params = [{transform_indices = @transform_0, window_bounds = array<i64: 72, 41>}, {pipeline_mode = #tpu.pipeline_mode<synchronous>, transform_indices = @transform_1, window_bounds = array<i64: 72, 72>}, {pipeline_mode = #tpu.pipeline_mode<synchronous>, transform_indices = @transform_2, window_bounds = array<i64: 41, 32>}, {pipeline_mode = #tpu.pipeline_mode<synchronous>, transform_indices = @transform_3, window_bounds = array<i64: 32, 128>}, {pipeline_mode = #tpu.pipeline_mode<synchronous>, transform_indices = @transform_4, window_bounds = array<i64: 1, 128>}, {pipeline_mode = #tpu.pipeline_mode<synchronous>, transform_indices = @transform_5, window_bounds = array<i64: 2, 32, 128>}, {pipeline_mode = #tpu.pipeline_mode<synchronous>, transform_indices = @transform_6, window_bounds = array<i64: 2, 32, 32>}, {pipeline_mode = #tpu.pipeline_mode<synchronous>, transform_indices = @transform_7, window_bounds = array<i64: 2, 32, 64>}, {pipeline_mode = #tpu.pipeline_mode<synchronous>, transform_indices = @transform_8, window_bounds = array<i64: 2, 64, 32>}, {pipeline_mode = #tpu.pipeline_mode<synchronous>, transform_indices = @transform_9, window_bounds = array<i64: 2, 8, 128>}, {transform_indices = @transform_10, window_bounds = array<i64: 72, 128>}]} {
    %c0 = arith.constant 0 : index
    %c0_0 = arith.constant 0 : index
    %0 = vector.load %arg2[%c0, %c0_0] : memref<72x72xf32, #tpu.memory_space<vmem>>, vector<72x72xf32>
    %c0_1 = arith.constant 0 : index
    %c0_2 = arith.constant 0 : index
    %1 = vector.load %arg1[%c0_1, %c0_2] : memref<72x41xf32, #tpu.memory_space<vmem>>, vector<72x41xf32>
    %c0_3 = arith.constant 0 : index
    %c0_4 = arith.constant 0 : index
    %2 = vector.load %arg3[%c0_3, %c0_4] : memref<41x32xf32, #tpu.memory_space<vmem>>, vector<41x32xf32>
    %cst = arith.constant dense<0.000000e+00> : vector<72x32xf32>
    %3 = tpu.matmul %1, %2, %cst {dimension_numbers = #tpu.dot_dimension_numbers<[1], [0], [0], [1], [0, 0, 1, 1], [], []>} : vector<72x41xf32>, vector<41x32xf32>, vector<72x32xf32> -> vector<72x32xf32>
    %c0_5 = arith.constant 0 : index
    %c0_6 = arith.constant 0 : index
    %c0_7 = arith.constant 0 : index
    %4 = vector.load %arg10[%c0_5, %c0_6, %c0_7] : memref<2x8x128xf32, #tpu.memory_space<vmem>>, vector<1x8x128xf32>
    %5 = vector.shape_cast %4 : vector<1x8x128xf32> to vector<8x128xf32>
    %c0_8 = arith.constant 0 : index
    %c0_9 = arith.constant 0 : index
    %c0_10 = arith.constant 0 : index
    %6 = vector.load %arg7[%c0_8, %c0_9, %c0_10] : memref<2x32x32xf32, #tpu.memory_space<vmem>>, vector<1x32x32xf32>
    %7 = vector.shape_cast %6 : vector<1x32x32xf32> to vector<32x32xf32>
    %c0_11 = arith.constant 0 : index
    %c0_12 = arith.constant 0 : index
    %c0_13 = arith.constant 0 : index
    %8 = vector.load %arg6[%c0_11, %c0_12, %c0_13] : memref<2x32x128xf32, #tpu.memory_space<vmem>>, vector<1x32x128xf32>
    %9 = vector.shape_cast %8 : vector<1x32x128xf32> to vector<32x128xf32>
    %cst_14 = arith.constant dense<0.000000e+00> : vector<72x128xf32>
    %10 = tpu.matmul %3, %9, %cst_14 {dimension_numbers = #tpu.dot_dimension_numbers<[1], [0], [0], [1], [0, 0, 1, 1], [], []>} : vector<72x32xf32>, vector<32x128xf32>, vector<72x128xf32> -> vector<72x128xf32>
    %11 = vector.extract_strided_slice %5 {offsets = [0, 0], sizes = [1, 128], strides = [1, 1]} : vector<8x128xf32> to vector<1x128xf32>
    %12 = vector.broadcast %11 : vector<1x128xf32> to vector<72x128xf32>
    %13 = arith.addf %10, %12 : vector<72x128xf32>
    %14 = vector.extract_strided_slice %13 {offsets = [0, 0], sizes = [72, 16], strides = [1, 1]} : vector<72x128xf32> to vector<72x16xf32>
    %15 = vector.extract_strided_slice %13 {offsets = [0, 32], sizes = [72, 16], strides = [1, 1]} : vector<72x128xf32> to vector<72x16xf32>
    %16 = vector.extract_strided_slice %13 {offsets = [0, 64], sizes = [72, 16], strides = [1, 1]} : vector<72x128xf32> to vector<72x16xf32>
    "tpu.trace_start"() <{level = 10 : i32, message = "nd,md->nm"}> : () -> ()
    %cst_15 = arith.constant dense<0.000000e+00> : vector<72x72xf32>
    %17 = tpu.matmul %14, %15, %cst_15 {dimension_numbers = #tpu.dot_dimension_numbers<[1], [1], [0], [0], [0, 0, 1, 0], [], []>} : vector<72x16xf32>, vector<72x16xf32>, vector<72x72xf32> -> vector<72x72xf32>
    "tpu.trace_stop"() : () -> ()
    %18 = arith.addf %17, %0 : vector<72x72xf32>
    %cst_16 = arith.constant dense<0xFF800000> : vector<72xf32>
    %19 = vector.multi_reduction <maximumf>, %18, %cst_16 [1] : vector<72x72xf32> to vector<72xf32>
    %20 = vector.shape_cast %19 : vector<72xf32> to vector<72x1xf32>
    %21 = vector.broadcast %20 : vector<72x1xf32> to vector<72x72xf32>
    %22 = arith.subf %18, %21 : vector<72x72xf32>
    %23 = math.exp %22 : vector<72x72xf32>
    %cst_17 = arith.constant dense<0.000000e+00> : vector<72xf32>
    %24 = vector.multi_reduction <add>, %23, %cst_17 [1] : vector<72x72xf32> to vector<72xf32>
    %25 = vector.shape_cast %24 : vector<72xf32> to vector<72x1xf32>
    %26 = tpu.reciprocal %25 {approx = true} : vector<72x1xf32> -> vector<72x1xf32>
    %27 = vector.broadcast %26 : vector<72x1xf32> to vector<72x72xf32>
    %28 = arith.mulf %23, %27 : vector<72x72xf32>
    %cst_18 = arith.constant dense<0.000000e+00> : vector<72x16xf32>
    %29 = tpu.matmul %28, %16, %cst_18 {dimension_numbers = #tpu.dot_dimension_numbers<[1], [0], [0], [1], [0, 0, 1, 1], [], []>} : vector<72x72xf32>, vector<72x16xf32>, vector<72x16xf32> -> vector<72x16xf32>
    %30 = vector.extract_strided_slice %7 {offsets = [0, 0], sizes = [16, 32], strides = [1, 1]} : vector<32x32xf32> to vector<16x32xf32>
    %cst_19 = arith.constant dense<0.000000e+00> : vector<72x32xf32>
    %31 = tpu.matmul %29, %30, %cst_19 {dimension_numbers = #tpu.dot_dimension_numbers<[1], [0], [0], [1], [0, 0, 1, 1], [], []>} : vector<72x16xf32>, vector<16x32xf32>, vector<72x32xf32> -> vector<72x32xf32>
    %32 = vector.extract_strided_slice %13 {offsets = [0, 16], sizes = [72, 16], strides = [1, 1]} : vector<72x128xf32> to vector<72x16xf32>
    %33 = vector.extract_strided_slice %13 {offsets = [0, 48], sizes = [72, 16], strides = [1, 1]} : vector<72x128xf32> to vector<72x16xf32>
    %34 = vector.extract_strided_slice %13 {offsets = [0, 80], sizes = [72, 16], strides = [1, 1]} : vector<72x128xf32> to vector<72x16xf32>
    "tpu.trace_start"() <{level = 10 : i32, message = "nd,md->nm"}> : () -> ()
    %cst_20 = arith.constant dense<0.000000e+00> : vector<72x72xf32>
    %35 = tpu.matmul %32, %33, %cst_20 {dimension_numbers = #tpu.dot_dimension_numbers<[1], [1], [0], [0], [0, 0, 1, 0], [], []>} : vector<72x16xf32>, vector<72x16xf32>, vector<72x72xf32> -> vector<72x72xf32>
    "tpu.trace_stop"() : () -> ()
    %36 = arith.addf %35, %0 : vector<72x72xf32>
    %cst_21 = arith.constant dense<0xFF800000> : vector<72xf32>
    %37 = vector.multi_reduction <maximumf>, %36, %cst_21 [1] : vector<72x72xf32> to vector<72xf32>
    %38 = vector.shape_cast %37 : vector<72xf32> to vector<72x1xf32>
    %39 = vector.broadcast %38 : vector<72x1xf32> to vector<72x72xf32>
    %40 = arith.subf %36, %39 : vector<72x72xf32>
    %41 = math.exp %40 : vector<72x72xf32>
    %cst_22 = arith.constant dense<0.000000e+00> : vector<72xf32>
    %42 = vector.multi_reduction <add>, %41, %cst_22 [1] : vector<72x72xf32> to vector<72xf32>
    %43 = vector.shape_cast %42 : vector<72xf32> to vector<72x1xf32>
    %44 = tpu.reciprocal %43 {approx = true} : vector<72x1xf32> -> vector<72x1xf32>
    %45 = vector.broadcast %44 : vector<72x1xf32> to vector<72x72xf32>
    %46 = arith.mulf %41, %45 : vector<72x72xf32>
    %cst_23 = arith.constant dense<0.000000e+00> : vector<72x16xf32>
    %47 = tpu.matmul %46, %34, %cst_23 {dimension_numbers = #tpu.dot_dimension_numbers<[1], [0], [0], [1], [0, 0, 1, 1], [], []>} : vector<72x72xf32>, vector<72x16xf32>, vector<72x16xf32> -> vector<72x16xf32>
    %48 = vector.extract_strided_slice %7 {offsets = [16, 0], sizes = [16, 32], strides = [1, 1]} : vector<32x32xf32> to vector<16x32xf32>
    %cst_24 = arith.constant dense<0.000000e+00> : vector<72x32xf32>
    %49 = tpu.matmul %47, %48, %cst_24 {dimension_numbers = #tpu.dot_dimension_numbers<[1], [0], [0], [1], [0, 0, 1, 1], [], []>} : vector<72x16xf32>, vector<16x32xf32>, vector<72x32xf32> -> vector<72x32xf32>
    %50 = arith.addf %31, %49 : vector<72x32xf32>
    %51 = vector.extract_strided_slice %5 {offsets = [1, 0], sizes = [1, 32], strides = [1, 1]} : vector<8x128xf32> to vector<1x32xf32>
    %52 = vector.broadcast %51 : vector<1x32xf32> to vector<72x32xf32>
    %53 = arith.addf %50, %52 : vector<72x32xf32>
    %54 = arith.addf %53, %3 : vector<72x32xf32>
    %55 = vector.extract_strided_slice %5 {offsets = [4, 0], sizes = [1, 32], strides = [1, 1]} : vector<8x128xf32> to vector<1x32xf32>
    %56 = vector.extract_strided_slice %5 {offsets = [5, 0], sizes = [1, 32], strides = [1, 1]} : vector<8x128xf32> to vector<1x32xf32>
    %cst_25 = arith.constant dense<0.000000e+00> : vector<72xf32>
    %57 = vector.multi_reduction <add>, %54, %cst_25 [1] : vector<72x32xf32> to vector<72xf32>
    %58 = vector.shape_cast %57 : vector<72xf32> to vector<72x1xf32>
    %cst_26 = arith.constant 3.200000e+01 : f32
    %59 = vector.broadcast %cst_26 : f32 to vector<72x1xf32>
    %60 = arith.divf %58, %59 : vector<72x1xf32>
    %61 = vector.broadcast %60 : vector<72x1xf32> to vector<72x32xf32>
    %62 = arith.subf %54, %61 : vector<72x32xf32>
    %63 = arith.mulf %62, %62 : vector<72x32xf32>
    %cst_27 = arith.constant dense<0.000000e+00> : vector<72xf32>
    %64 = vector.multi_reduction <add>, %63, %cst_27 [1] : vector<72x32xf32> to vector<72xf32>
    %65 = vector.shape_cast %64 : vector<72xf32> to vector<72x1xf32>
    %cst_28 = arith.constant 3.200000e+01 : f32
    %66 = vector.broadcast %cst_28 : f32 to vector<72x1xf32>
    %67 = arith.divf %65, %66 : vector<72x1xf32>
    %68 = vector.broadcast %60 : vector<72x1xf32> to vector<72x32xf32>
    %69 = arith.subf %54, %68 : vector<72x32xf32>
    %cst_29 = arith.constant 9.99999974E-6 : f32
    %70 = vector.broadcast %cst_29 : f32 to vector<72x1xf32>
    %71 = arith.addf %67, %70 : vector<72x1xf32>
    %72 = math.rsqrt %71 : vector<72x1xf32>
    %73 = vector.broadcast %72 : vector<72x1xf32> to vector<72x32xf32>
    %74 = arith.mulf %69, %73 : vector<72x32xf32>
    %75 = vector.broadcast %55 : vector<1x32xf32> to vector<72x32xf32>
    %76 = arith.mulf %74, %75 : vector<72x32xf32>
    %77 = vector.broadcast %56 : vector<1x32xf32> to vector<72x32xf32>
    %78 = arith.addf %76, %77 : vector<72x32xf32>
    %c0_30 = arith.constant 0 : index
    %c0_31 = arith.constant 0 : index
    %c0_32 = arith.constant 0 : index
    %79 = vector.load %arg8[%c0_30, %c0_31, %c0_32] : memref<2x32x64xf32, #tpu.memory_space<vmem>>, vector<1x32x64xf32>
    %80 = vector.shape_cast %79 : vector<1x32x64xf32> to vector<32x64xf32>
    %cst_33 = arith.constant dense<0.000000e+00> : vector<72x64xf32>
    %81 = tpu.matmul %78, %80, %cst_33 {dimension_numbers = #tpu.dot_dimension_numbers<[1], [0], [0], [1], [0, 0, 1, 1], [], []>} : vector<72x32xf32>, vector<32x64xf32>, vector<72x64xf32> -> vector<72x64xf32>
    %82 = vector.extract_strided_slice %5 {offsets = [2, 0], sizes = [1, 64], strides = [1, 1]} : vector<8x128xf32> to vector<1x64xf32>
    %83 = vector.broadcast %82 : vector<1x64xf32> to vector<72x64xf32>
    %84 = arith.addf %81, %83 : vector<72x64xf32>
    %cst_34 = arith.constant 0.000000e+00 : f32
    %85 = vector.broadcast %cst_34 : f32 to vector<72x64xf32>
    %86 = arith.maximumf %84, %85 : vector<72x64xf32>
    %c0_35 = arith.constant 0 : index
    %c0_36 = arith.constant 0 : index
    %c0_37 = arith.constant 0 : index
    %87 = vector.load %arg9[%c0_35, %c0_36, %c0_37] : memref<2x64x32xf32, #tpu.memory_space<vmem>>, vector<1x64x32xf32>
    %88 = vector.shape_cast %87 : vector<1x64x32xf32> to vector<64x32xf32>
    %cst_38 = arith.constant dense<0.000000e+00> : vector<72x32xf32>
    %89 = tpu.matmul %86, %88, %cst_38 {dimension_numbers = #tpu.dot_dimension_numbers<[1], [0], [0], [1], [0, 0, 1, 1], [], []>} : vector<72x64xf32>, vector<64x32xf32>, vector<72x32xf32> -> vector<72x32xf32>
    %90 = vector.extract_strided_slice %5 {offsets = [3, 0], sizes = [1, 32], strides = [1, 1]} : vector<8x128xf32> to vector<1x32xf32>
    %91 = vector.broadcast %90 : vector<1x32xf32> to vector<72x32xf32>
    %92 = arith.addf %89, %91 : vector<72x32xf32>
    %93 = arith.addf %92, %78 : vector<72x32xf32>
    %94 = vector.extract_strided_slice %5 {offsets = [6, 0], sizes = [1, 32], strides = [1, 1]} : vector<8x128xf32> to vector<1x32xf32>
    %95 = vector.extract_strided_slice %5 {offsets = [7, 0], sizes = [1, 32], strides = [1, 1]} : vector<8x128xf32> to vector<1x32xf32>
    %cst_39 = arith.constant dense<0.000000e+00> : vector<72xf32>
    %96 = vector.multi_reduction <add>, %93, %cst_39 [1] : vector<72x32xf32> to vector<72xf32>
    %97 = vector.shape_cast %96 : vector<72xf32> to vector<72x1xf32>
    %cst_40 = arith.constant 3.200000e+01 : f32
    %98 = vector.broadcast %cst_40 : f32 to vector<72x1xf32>
    %99 = arith.divf %97, %98 : vector<72x1xf32>
    %100 = vector.broadcast %99 : vector<72x1xf32> to vector<72x32xf32>
    %101 = arith.subf %93, %100 : vector<72x32xf32>
    %102 = arith.mulf %101, %101 : vector<72x32xf32>
    %cst_41 = arith.constant dense<0.000000e+00> : vector<72xf32>
    %103 = vector.multi_reduction <add>, %102, %cst_41 [1] : vector<72x32xf32> to vector<72xf32>
    %104 = vector.shape_cast %103 : vector<72xf32> to vector<72x1xf32>
    %cst_42 = arith.constant 3.200000e+01 : f32
    %105 = vector.broadcast %cst_42 : f32 to vector<72x1xf32>
    %106 = arith.divf %104, %105 : vector<72x1xf32>
    %107 = vector.broadcast %99 : vector<72x1xf32> to vector<72x32xf32>
    %108 = arith.subf %93, %107 : vector<72x32xf32>
    %cst_43 = arith.constant 9.99999974E-6 : f32
    %109 = vector.broadcast %cst_43 : f32 to vector<72x1xf32>
    %110 = arith.addf %106, %109 : vector<72x1xf32>
    %111 = math.rsqrt %110 : vector<72x1xf32>
    %112 = vector.broadcast %111 : vector<72x1xf32> to vector<72x32xf32>
    %113 = arith.mulf %108, %112 : vector<72x32xf32>
    %114 = vector.broadcast %94 : vector<1x32xf32> to vector<72x32xf32>
    %115 = arith.mulf %113, %114 : vector<72x32xf32>
    %116 = vector.broadcast %95 : vector<1x32xf32> to vector<72x32xf32>
    %117 = arith.addf %115, %116 : vector<72x32xf32>
    %c1 = arith.constant 1 : index
    %c0_44 = arith.constant 0 : index
    %c0_45 = arith.constant 0 : index
    %118 = vector.load %arg10[%c1, %c0_44, %c0_45] : memref<2x8x128xf32, #tpu.memory_space<vmem>>, vector<1x8x128xf32>
    %119 = vector.shape_cast %118 : vector<1x8x128xf32> to vector<8x128xf32>
    %c1_46 = arith.constant 1 : index
    %c0_47 = arith.constant 0 : index
    %c0_48 = arith.constant 0 : index
    %120 = vector.load %arg7[%c1_46, %c0_47, %c0_48] : memref<2x32x32xf32, #tpu.memory_space<vmem>>, vector<1x32x32xf32>
    %121 = vector.shape_cast %120 : vector<1x32x32xf32> to vector<32x32xf32>
    %c1_49 = arith.constant 1 : index
    %c0_50 = arith.constant 0 : index
    %c0_51 = arith.constant 0 : index
    %122 = vector.load %arg6[%c1_49, %c0_50, %c0_51] : memref<2x32x128xf32, #tpu.memory_space<vmem>>, vector<1x32x128xf32>
    %123 = vector.shape_cast %122 : vector<1x32x128xf32> to vector<32x128xf32>
    %cst_52 = arith.constant dense<0.000000e+00> : vector<72x128xf32>
    %124 = tpu.matmul %117, %123, %cst_52 {dimension_numbers = #tpu.dot_dimension_numbers<[1], [0], [0], [1], [0, 0, 1, 1], [], []>} : vector<72x32xf32>, vector<32x128xf32>, vector<72x128xf32> -> vector<72x128xf32>
    %125 = vector.extract_strided_slice %119 {offsets = [0, 0], sizes = [1, 128], strides = [1, 1]} : vector<8x128xf32> to vector<1x128xf32>
    %126 = vector.broadcast %125 : vector<1x128xf32> to vector<72x128xf32>
    %127 = arith.addf %124, %126 : vector<72x128xf32>
    %128 = vector.extract_strided_slice %127 {offsets = [0, 0], sizes = [72, 16], strides = [1, 1]} : vector<72x128xf32> to vector<72x16xf32>
    %129 = vector.extract_strided_slice %127 {offsets = [0, 32], sizes = [72, 16], strides = [1, 1]} : vector<72x128xf32> to vector<72x16xf32>
    %130 = vector.extract_strided_slice %127 {offsets = [0, 64], sizes = [72, 16], strides = [1, 1]} : vector<72x128xf32> to vector<72x16xf32>
    "tpu.trace_start"() <{level = 10 : i32, message = "nd,md->nm"}> : () -> ()
    %cst_53 = arith.constant dense<0.000000e+00> : vector<72x72xf32>
    %131 = tpu.matmul %128, %129, %cst_53 {dimension_numbers = #tpu.dot_dimension_numbers<[1], [1], [0], [0], [0, 0, 1, 0], [], []>} : vector<72x16xf32>, vector<72x16xf32>, vector<72x72xf32> -> vector<72x72xf32>
    "tpu.trace_stop"() : () -> ()
    %132 = arith.addf %131, %0 : vector<72x72xf32>
    %cst_54 = arith.constant dense<0xFF800000> : vector<72xf32>
    %133 = vector.multi_reduction <maximumf>, %132, %cst_54 [1] : vector<72x72xf32> to vector<72xf32>
    %134 = vector.shape_cast %133 : vector<72xf32> to vector<72x1xf32>
    %135 = vector.broadcast %134 : vector<72x1xf32> to vector<72x72xf32>
    %136 = arith.subf %132, %135 : vector<72x72xf32>
    %137 = math.exp %136 : vector<72x72xf32>
    %cst_55 = arith.constant dense<0.000000e+00> : vector<72xf32>
    %138 = vector.multi_reduction <add>, %137, %cst_55 [1] : vector<72x72xf32> to vector<72xf32>
    %139 = vector.shape_cast %138 : vector<72xf32> to vector<72x1xf32>
    %140 = tpu.reciprocal %139 {approx = true} : vector<72x1xf32> -> vector<72x1xf32>
    %141 = vector.broadcast %140 : vector<72x1xf32> to vector<72x72xf32>
    %142 = arith.mulf %137, %141 : vector<72x72xf32>
    %cst_56 = arith.constant dense<0.000000e+00> : vector<72x16xf32>
    %143 = tpu.matmul %142, %130, %cst_56 {dimension_numbers = #tpu.dot_dimension_numbers<[1], [0], [0], [1], [0, 0, 1, 1], [], []>} : vector<72x72xf32>, vector<72x16xf32>, vector<72x16xf32> -> vector<72x16xf32>
    %144 = vector.extract_strided_slice %121 {offsets = [0, 0], sizes = [16, 32], strides = [1, 1]} : vector<32x32xf32> to vector<16x32xf32>
    %cst_57 = arith.constant dense<0.000000e+00> : vector<72x32xf32>
    %145 = tpu.matmul %143, %144, %cst_57 {dimension_numbers = #tpu.dot_dimension_numbers<[1], [0], [0], [1], [0, 0, 1, 1], [], []>} : vector<72x16xf32>, vector<16x32xf32>, vector<72x32xf32> -> vector<72x32xf32>
    %146 = vector.extract_strided_slice %127 {offsets = [0, 16], sizes = [72, 16], strides = [1, 1]} : vector<72x128xf32> to vector<72x16xf32>
    %147 = vector.extract_strided_slice %127 {offsets = [0, 48], sizes = [72, 16], strides = [1, 1]} : vector<72x128xf32> to vector<72x16xf32>
    %148 = vector.extract_strided_slice %127 {offsets = [0, 80], sizes = [72, 16], strides = [1, 1]} : vector<72x128xf32> to vector<72x16xf32>
    "tpu.trace_start"() <{level = 10 : i32, message = "nd,md->nm"}> : () -> ()
    %cst_58 = arith.constant dense<0.000000e+00> : vector<72x72xf32>
    %149 = tpu.matmul %146, %147, %cst_58 {dimension_numbers = #tpu.dot_dimension_numbers<[1], [1], [0], [0], [0, 0, 1, 0], [], []>} : vector<72x16xf32>, vector<72x16xf32>, vector<72x72xf32> -> vector<72x72xf32>
    "tpu.trace_stop"() : () -> ()
    %150 = arith.addf %149, %0 : vector<72x72xf32>
    %cst_59 = arith.constant dense<0xFF800000> : vector<72xf32>
    %151 = vector.multi_reduction <maximumf>, %150, %cst_59 [1] : vector<72x72xf32> to vector<72xf32>
    %152 = vector.shape_cast %151 : vector<72xf32> to vector<72x1xf32>
    %153 = vector.broadcast %152 : vector<72x1xf32> to vector<72x72xf32>
    %154 = arith.subf %150, %153 : vector<72x72xf32>
    %155 = math.exp %154 : vector<72x72xf32>
    %cst_60 = arith.constant dense<0.000000e+00> : vector<72xf32>
    %156 = vector.multi_reduction <add>, %155, %cst_60 [1] : vector<72x72xf32> to vector<72xf32>
    %157 = vector.shape_cast %156 : vector<72xf32> to vector<72x1xf32>
    %158 = tpu.reciprocal %157 {approx = true} : vector<72x1xf32> -> vector<72x1xf32>
    %159 = vector.broadcast %158 : vector<72x1xf32> to vector<72x72xf32>
    %160 = arith.mulf %155, %159 : vector<72x72xf32>
    %cst_61 = arith.constant dense<0.000000e+00> : vector<72x16xf32>
    %161 = tpu.matmul %160, %148, %cst_61 {dimension_numbers = #tpu.dot_dimension_numbers<[1], [0], [0], [1], [0, 0, 1, 1], [], []>} : vector<72x72xf32>, vector<72x16xf32>, vector<72x16xf32> -> vector<72x16xf32>
    %162 = vector.extract_strided_slice %121 {offsets = [16, 0], sizes = [16, 32], strides = [1, 1]} : vector<32x32xf32> to vector<16x32xf32>
    %cst_62 = arith.constant dense<0.000000e+00> : vector<72x32xf32>
    %163 = tpu.matmul %161, %162, %cst_62 {dimension_numbers = #tpu.dot_dimension_numbers<[1], [0], [0], [1], [0, 0, 1, 1], [], []>} : vector<72x16xf32>, vector<16x32xf32>, vector<72x32xf32> -> vector<72x32xf32>
    %164 = arith.addf %145, %163 : vector<72x32xf32>
    %165 = vector.extract_strided_slice %119 {offsets = [1, 0], sizes = [1, 32], strides = [1, 1]} : vector<8x128xf32> to vector<1x32xf32>
    %166 = vector.broadcast %165 : vector<1x32xf32> to vector<72x32xf32>
    %167 = arith.addf %164, %166 : vector<72x32xf32>
    %168 = arith.addf %167, %117 : vector<72x32xf32>
    %169 = vector.extract_strided_slice %119 {offsets = [4, 0], sizes = [1, 32], strides = [1, 1]} : vector<8x128xf32> to vector<1x32xf32>
    %170 = vector.extract_strided_slice %119 {offsets = [5, 0], sizes = [1, 32], strides = [1, 1]} : vector<8x128xf32> to vector<1x32xf32>
    %cst_63 = arith.constant dense<0.000000e+00> : vector<72xf32>
    %171 = vector.multi_reduction <add>, %168, %cst_63 [1] : vector<72x32xf32> to vector<72xf32>
    %172 = vector.shape_cast %171 : vector<72xf32> to vector<72x1xf32>
    %cst_64 = arith.constant 3.200000e+01 : f32
    %173 = vector.broadcast %cst_64 : f32 to vector<72x1xf32>
    %174 = arith.divf %172, %173 : vector<72x1xf32>
    %175 = vector.broadcast %174 : vector<72x1xf32> to vector<72x32xf32>
    %176 = arith.subf %168, %175 : vector<72x32xf32>
    %177 = arith.mulf %176, %176 : vector<72x32xf32>
    %cst_65 = arith.constant dense<0.000000e+00> : vector<72xf32>
    %178 = vector.multi_reduction <add>, %177, %cst_65 [1] : vector<72x32xf32> to vector<72xf32>
    %179 = vector.shape_cast %178 : vector<72xf32> to vector<72x1xf32>
    %cst_66 = arith.constant 3.200000e+01 : f32
    %180 = vector.broadcast %cst_66 : f32 to vector<72x1xf32>
    %181 = arith.divf %179, %180 : vector<72x1xf32>
    %182 = vector.broadcast %174 : vector<72x1xf32> to vector<72x32xf32>
    %183 = arith.subf %168, %182 : vector<72x32xf32>
    %cst_67 = arith.constant 9.99999974E-6 : f32
    %184 = vector.broadcast %cst_67 : f32 to vector<72x1xf32>
    %185 = arith.addf %181, %184 : vector<72x1xf32>
    %186 = math.rsqrt %185 : vector<72x1xf32>
    %187 = vector.broadcast %186 : vector<72x1xf32> to vector<72x32xf32>
    %188 = arith.mulf %183, %187 : vector<72x32xf32>
    %189 = vector.broadcast %169 : vector<1x32xf32> to vector<72x32xf32>
    %190 = arith.mulf %188, %189 : vector<72x32xf32>
    %191 = vector.broadcast %170 : vector<1x32xf32> to vector<72x32xf32>
    %192 = arith.addf %190, %191 : vector<72x32xf32>
    %c1_68 = arith.constant 1 : index
    %c0_69 = arith.constant 0 : index
    %c0_70 = arith.constant 0 : index
    %193 = vector.load %arg8[%c1_68, %c0_69, %c0_70] : memref<2x32x64xf32, #tpu.memory_space<vmem>>, vector<1x32x64xf32>
    %194 = vector.shape_cast %193 : vector<1x32x64xf32> to vector<32x64xf32>
    %cst_71 = arith.constant dense<0.000000e+00> : vector<72x64xf32>
    %195 = tpu.matmul %192, %194, %cst_71 {dimension_numbers = #tpu.dot_dimension_numbers<[1], [0], [0], [1], [0, 0, 1, 1], [], []>} : vector<72x32xf32>, vector<32x64xf32>, vector<72x64xf32> -> vector<72x64xf32>
    %196 = vector.extract_strided_slice %119 {offsets = [2, 0], sizes = [1, 64], strides = [1, 1]} : vector<8x128xf32> to vector<1x64xf32>
    %197 = vector.broadcast %196 : vector<1x64xf32> to vector<72x64xf32>
    %198 = arith.addf %195, %197 : vector<72x64xf32>
    %cst_72 = arith.constant 0.000000e+00 : f32
    %199 = vector.broadcast %cst_72 : f32 to vector<72x64xf32>
    %200 = arith.maximumf %198, %199 : vector<72x64xf32>
    %c1_73 = arith.constant 1 : index
    %c0_74 = arith.constant 0 : index
    %c0_75 = arith.constant 0 : index
    %201 = vector.load %arg9[%c1_73, %c0_74, %c0_75] : memref<2x64x32xf32, #tpu.memory_space<vmem>>, vector<1x64x32xf32>
    %202 = vector.shape_cast %201 : vector<1x64x32xf32> to vector<64x32xf32>
    %cst_76 = arith.constant dense<0.000000e+00> : vector<72x32xf32>
    %203 = tpu.matmul %200, %202, %cst_76 {dimension_numbers = #tpu.dot_dimension_numbers<[1], [0], [0], [1], [0, 0, 1, 1], [], []>} : vector<72x64xf32>, vector<64x32xf32>, vector<72x32xf32> -> vector<72x32xf32>
    %204 = vector.extract_strided_slice %119 {offsets = [3, 0], sizes = [1, 32], strides = [1, 1]} : vector<8x128xf32> to vector<1x32xf32>
    %205 = vector.broadcast %204 : vector<1x32xf32> to vector<72x32xf32>
    %206 = arith.addf %203, %205 : vector<72x32xf32>
    %207 = arith.addf %206, %192 : vector<72x32xf32>
    %208 = vector.extract_strided_slice %119 {offsets = [6, 0], sizes = [1, 32], strides = [1, 1]} : vector<8x128xf32> to vector<1x32xf32>
    %209 = vector.extract_strided_slice %119 {offsets = [7, 0], sizes = [1, 32], strides = [1, 1]} : vector<8x128xf32> to vector<1x32xf32>
    %cst_77 = arith.constant dense<0.000000e+00> : vector<72xf32>
    %210 = vector.multi_reduction <add>, %207, %cst_77 [1] : vector<72x32xf32> to vector<72xf32>
    %211 = vector.shape_cast %210 : vector<72xf32> to vector<72x1xf32>
    %cst_78 = arith.constant 3.200000e+01 : f32
    %212 = vector.broadcast %cst_78 : f32 to vector<72x1xf32>
    %213 = arith.divf %211, %212 : vector<72x1xf32>
    %214 = vector.broadcast %213 : vector<72x1xf32> to vector<72x32xf32>
    %215 = arith.subf %207, %214 : vector<72x32xf32>
    %216 = arith.mulf %215, %215 : vector<72x32xf32>
    %cst_79 = arith.constant dense<0.000000e+00> : vector<72xf32>
    %217 = vector.multi_reduction <add>, %216, %cst_79 [1] : vector<72x32xf32> to vector<72xf32>
    %218 = vector.shape_cast %217 : vector<72xf32> to vector<72x1xf32>
    %cst_80 = arith.constant 3.200000e+01 : f32
    %219 = vector.broadcast %cst_80 : f32 to vector<72x1xf32>
    %220 = arith.divf %218, %219 : vector<72x1xf32>
    %221 = vector.broadcast %213 : vector<72x1xf32> to vector<72x32xf32>
    %222 = arith.subf %207, %221 : vector<72x32xf32>
    %cst_81 = arith.constant 9.99999974E-6 : f32
    %223 = vector.broadcast %cst_81 : f32 to vector<72x1xf32>
    %224 = arith.addf %220, %223 : vector<72x1xf32>
    %225 = math.rsqrt %224 : vector<72x1xf32>
    %226 = vector.broadcast %225 : vector<72x1xf32> to vector<72x32xf32>
    %227 = arith.mulf %222, %226 : vector<72x32xf32>
    %228 = vector.broadcast %208 : vector<1x32xf32> to vector<72x32xf32>
    %229 = arith.mulf %227, %228 : vector<72x32xf32>
    %230 = vector.broadcast %209 : vector<1x32xf32> to vector<72x32xf32>
    %231 = arith.addf %229, %230 : vector<72x32xf32>
    %c0_82 = arith.constant 0 : index
    %c0_83 = arith.constant 0 : index
    %232 = vector.load %arg4[%c0_82, %c0_83] : memref<32x128xf32, #tpu.memory_space<vmem>>, vector<32x128xf32>
    %cst_84 = arith.constant dense<0.000000e+00> : vector<72x128xf32>
    %233 = tpu.matmul %231, %232, %cst_84 {dimension_numbers = #tpu.dot_dimension_numbers<[1], [0], [0], [1], [0, 0, 1, 1], [], []>} : vector<72x32xf32>, vector<32x128xf32>, vector<72x128xf32> -> vector<72x128xf32>
    %c0_85 = arith.constant 0 : index
    %c0_86 = arith.constant 0 : index
    %234 = vector.load %arg5[%c0_85, %c0_86] : memref<1x128xf32, #tpu.memory_space<vmem>>, vector<1x128xf32>
    %235 = vector.broadcast %234 : vector<1x128xf32> to vector<72x128xf32>
    %236 = arith.addf %233, %235 : vector<72x128xf32>
    %c0_87 = arith.constant 0 : index
    %c0_88 = arith.constant 0 : index
    %237 = vector.load %arg11[%c0_87, %c0_88] : memref<72x128xf32, #tpu.memory_space<vmem>>, vector<72x128xf32>
    tpu.vector_store %arg11[%c0_87, %c0_88], %236 {strides = array<i32>} : memref<72x128xf32, #tpu.memory_space<vmem>>, vector<72x128xf32>,
    return
  }
  func.func @transform_0(%arg0: i32) -> (i32, i32) {
    %c0_i32 = arith.constant 0 : i32
    %c0_i32_0 = arith.constant 0 : i32
    return %arg0, %c0_i32 : i32, i32
  }
  func.func @transform_1(%arg0: i32) -> (i32, i32) {
    %c0_i32 = arith.constant 0 : i32
    %c0_i32_0 = arith.constant 0 : i32
    %c0_i32_1 = arith.constant 0 : i32
    return %c0_i32, %c0_i32_0 : i32, i32
  }
  func.func @transform_2(%arg0: i32) -> (i32, i32) {
    %c0_i32 = arith.constant 0 : i32
    %c0_i32_0 = arith.constant 0 : i32
    %c0_i32_1 = arith.constant 0 : i32
    return %c0_i32, %c0_i32_0 : i32, i32
  }
  func.func @transform_3(%arg0: i32) -> (i32, i32) {
    %c0_i32 = arith.constant 0 : i32
    %c0_i32_0 = arith.constant 0 : i32
    %c0_i32_1 = arith.constant 0 : i32
    return %c0_i32, %c0_i32_0 : i32, i32
  }
  func.func @transform_4(%arg0: i32) -> (i32, i32) {
    %c0_i32 = arith.constant 0 : i32
    %c0_i32_0 = arith.constant 0 : i32
    %c0_i32_1 = arith.constant 0 : i32
    return %c0_i32, %c0_i32_0 : i32, i32
  }
  func.func @transform_5(%arg0: i32) -> (i32, i32, i32) {
    %c0_i32 = arith.constant 0 : i32
    %c0_i32_0 = arith.constant 0 : i32
    %c0_i32_1 = arith.constant 0 : i32
    %c0_i32_2 = arith.constant 0 : i32
    return %c0_i32, %c0_i32_0, %c0_i32_1 : i32, i32, i32
  }
  func.func @transform_6(%arg0: i32) -> (i32, i32, i32) {
    %c0_i32 = arith.constant 0 : i32
    %c0_i32_0 = arith.constant 0 : i32
    %c0_i32_1 = arith.constant 0 : i32
    %c0_i32_2 = arith.constant 0 : i32
    return %c0_i32, %c0_i32_0, %c0_i32_1 : i32, i32, i32
  }
  func.func @transform_7(%arg0: i32) -> (i32, i32, i32) {
    %c0_i32 = arith.constant 0 : i32
    %c0_i32_0 = arith.constant 0 : i32
    %c0_i32_1 = arith.constant 0 : i32
    %c0_i32_2 = arith.constant 0 : i32
    return %c0_i32, %c0_i32_0, %c0_i32_1 : i32, i32, i32
  }
  func.func @transform_8(%arg0: i32) -> (i32, i32, i32) {
    %c0_i32 = arith.constant 0 : i32
    %c0_i32_0 = arith.constant 0 : i32
    %c0_i32_1 = arith.constant 0 : i32
    %c0_i32_2 = arith.constant 0 : i32
    return %c0_i32, %c0_i32_0, %c0_i32_1 : i32, i32, i32
  }
  func.func @transform_9(%arg0: i32) -> (i32, i32, i32) {
    %c0_i32 = arith.constant 0 : i32
    %c0_i32_0 = arith.constant 0 : i32
    %c0_i32_1 = arith.constant 0 : i32
    %c0_i32_2 = arith.constant 0 : i32
    return %c0_i32, %c0_i32_0, %c0_i32_1 : i32, i32, i32
  }
  func.func @transform_10(%arg0: i32) -> (i32, i32) {
    %c0_i32 = arith.constant 0 : i32
    %c0_i32_0 = arith.constant 0 : i32
    return %arg0, %c0_i32 : i32, i32
  }
}

</mosaic_0001>

<bundles_post_ra>
// kernel: dummy_transformer_forward.1
= control target key start
LH: loop header
LB: loop body
LE: loop exit
PB: predicated region body
PF: predicated region fallthrough
CT: control target
= control target key end

     0   :  { %vm87_vm0 = vcmask 1040384   ;;  %v5781_v0 = vmov 0.0   ;;  %vm5782_vm1 = vmmov 0   ;;  %vm59_vm2 = vcmask 334848   ;;  %s5783_s11 = smov 96   ;;  %s5784_s12 = smov 80   ;;  %s8051_s2 = inlined_call_operand.vmem [shape: f32[41,32], index: 2, kind: input, shape index: {}]   ;;  %s8052_s5 = inlined_call_operand.vmem [shape: f32[2,32,128], index: 5, kind: input, shape index: {}]   ;;  %s8053_s0 = inlined_call_operand.vmem [shape: f32[72,41], index: 0, kind: input, shape index: {}]   ;;  %s8054_s9 = inlined_call_operand.vmem [shape: f32[2,8,128], index: 9, kind: input, shape index: {}]   ;;  %s8055_s1 = inlined_call_operand.vmem [shape: f32[72,72], index: 1, kind: input, shape index: {}]   ;;  %s8056_s6 = inlined_call_operand.vmem [shape: f32[2,32,32], index: 6, kind: input, shape index: {}]   ;;  %s8057_s7 = inlined_call_operand.vmem [shape: f32[2,32,64], index: 7, kind: input, shape index: {}]   ;;  %s8058_s8 = inlined_call_operand.vmem [shape: f32[2,64,32], index: 8, kind: input, shape index: {}]   ;;  %s8059_s3 = inlined_call_operand.vmem [shape: f32[32,128], index: 3, kind: input, shape index: {}]   ;;  %s8060_s4 = inlined_call_operand.vmem [shape: f32[1,128], index: 4, kind: input, shape index: {}]   ;;  %s8061_s10 = inlined_call_operand.vmem [shape: f32[72,128], index: 10, kind: output, shape index: {}]  }
   0x1   :  { %4763 = vmatprep.subr.mxu0 %v5781_v0  ;;  %v58_v1 = vld [vmem:[%s8051_s2 + $0x28] sm:$0x1]  ;;  %v57_v2 = vld [vmem:[%s8051_s2 + $0x20] sm:$0xff]  ;;  %4775 = vmatprep.mubr.msk.f32.mxu0 %vm5782_vm1, %v5781_v0  ;;  %v56_v3 = vld [vmem:[%s8051_s2 + $0x18] sm:$0xff]  ;;  %vm214_vm3 = vcmask 261120   ;;  %v210_v44 = vlaneseq  ;;  %s5786_s13 = smov 64  }
   0x2   :  { %4764 = vmatpush3.msk.msra.mxu0 %vm87_vm0, %v58_v1  ;;  %4802 = vmatprep.subr.mxu1 %v5781_v0  ;;  %v55_v4 = vld [vmem:[%s8051_s2 + $0x10] sm:$0xff]  ;;  %v209_v5 = vld [vmem:[%s8052_s5 + $0x18] sm:$0xff]  ;;  %v54_v7 = vld [vmem:[%s8051_s2 + $0x8] sm:$0xff]  ;;  %s5787_s14 = smov 48   ;;  %vm379_vm4 = vcmask 130048   ;;  %vm526_vm5 = vcmask 588800  }
   0x3   :  { %4765 = vmatprep.subr.mxu0 %v5781_v0  ;;  %4810 = vmatprep.mubr.msk.f32.mxu1 %vm5782_vm1, %v5781_v0  ;;  %v208_v6 = vld [vmem:[%s8052_s5 + $0x10] sm:$0xff]  ;;  %v207_v8 = vld [vmem:[%s8052_s5 + $0x8] sm:$0xff]  ;;  %v53_v9 = vld [vmem:[%s8051_s2] sm:$0xff]  ;;  %v5997_v47 = vshrl.u32 %v210_v44, 7  ;;  %s5785_s2 = smov 112   ;;  %vm1841_vm6 = vcmask 523264  }
   0x4   :  { %4766 = vmatpush3.msra.mxu0 %v57_v2  ;;  %4803 = vmatpush3.msra.mxu1 %v209_v5  ;;  %v44_v10 = vld [vmem:[%s8053_s0] sm:$0xff]  ;;  %v45_v11 = vld [vmem:[%s8053_s0 + $0x8] sm:$0xff]  ;;  %v46_v12 = vld [vmem:[%s8053_s0 + $0x10] sm:$0xff] }
   0x5   :  { %4767 = vmatprep.subr.mxu0 %v5781_v0  ;;  %4804 = vmatprep.subr.mxu1 %v5781_v0  ;;  %v47_v13 = vld [vmem:[%s8053_s0 + $0x18] sm:$0xff]  ;;  %v48_v14 = vld [vmem:[%s8053_s0 + $0x20] sm:$0xff]  ;;  %v49_v15 = vld [vmem:[%s8053_s0 + $0x28] sm:$0xff]  ;;  %v212_v50 = vsub.s32 0, %v5997_v47 }
   0x6   :  { %4768 = vmatpush3.msra.mxu0 %v56_v3  ;;  %4805 = vmatpush3.msra.mxu1 %v208_v6  ;;  %v50_v16 = vld [vmem:[%s8053_s0 + $0x30] sm:$0xff]  ;;  %v51_v17 = vld [vmem:[%s8053_s0 + $0x38] sm:$0xff]  ;;  %v52_v18 = vld [vmem:[%s8053_s0 + $0x40] sm:$0xff] }
   0x7   :  { %4769 = vmatprep.subr.mxu0 %v5781_v0  ;;  %4806 = vmatprep.subr.mxu1 %v5781_v0  ;;  %v206_v19 = vld [vmem:[%s8052_s5] sm:$0xff] }
   0x8   :  { %4770 = vmatpush3.msra.mxu0 %v55_v4  ;;  %4807 = vmatpush3.msra.mxu1 %v207_v8  ;;  %v201_v51 = vld [vmem:[%s8054_s9] sm:$0xff] }
   0x9   :  { %4771 = vmatprep.subr.mxu0 %v5781_v0  ;;  %4808 = vmatprep.subr.mxu1 %v5781_v0  ;;  %v213_v54 = vrot.slane %v201_v51, %v212_v50 }
   0xa   :  { %4772 = vmatpush3.msra.mxu0 %v54_v7  ;;  %4809 = vmatpush3.msra.mxu1 %v206_v19 }
   0xb   :  { %4773 = vmatprep.subr.mxu0 %v5781_v0  ;;  %4837 = vmatprep.subr.mxu1 %v5781_v0 }
   0xc   :  { %4774 = vmatpush3.msra.mxu0 %v53_v9 }
   0xd   :  { %4776 = vmatmul.mubr.msk.f32.vlgmr.msra.gmra.mxu0 %vm59_vm2, %v44_v10  ;;  %4882 = vmatprep.subr.mxu0 %v5781_v0 }
   0xe   :  { %4778 = vmatprep.mubr.msk.f32.mxu0 %vm5782_vm1, %v5781_v0 }
  0x11   :  { %4779 = vmatmul.mubr.msk.f32.gmra.mxu0 %vm59_vm2, %v45_v11 }
  0x12   :  { %4781 = vmatprep.mubr.msk.f32.mxu0 %vm5782_vm1, %v5781_v0 }
  0x15   :  { %4782 = vmatmul.mubr.msk.f32.gmra.mxu0 %vm59_vm2, %v46_v12 }
  0x16   :  { %4784 = vmatprep.mubr.msk.f32.mxu0 %vm5782_vm1, %v5781_v0 }
  0x19   :  { %4785 = vmatmul.mubr.msk.f32.gmra.mxu0 %vm59_vm2, %v47_v13 }
  0x1a   :  { %4787 = vmatprep.mubr.msk.f32.mxu0 %vm5782_vm1, %v5781_v0 }
  0x1d   :  { %4788 = vmatmul.mubr.msk.f32.gmra.mxu0 %vm59_vm2, %v48_v14 }
  0x1e   :  { %4790 = vmatprep.mubr.msk.f32.mxu0 %vm5782_vm1, %v5781_v0 }
  0x21   :  { %4791 = vmatmul.mubr.msk.f32.gmra.mxu0 %vm59_vm2, %v49_v15 }
  0x22   :  { %4793 = vmatprep.mubr.msk.f32.mxu0 %vm5782_vm1, %v5781_v0 }
  0x25   :  { %4794 = vmatmul.mubr.msk.f32.gmra.mxu0 %vm59_vm2, %v50_v16 }
  0x26   :  { %4796 = vmatprep.mubr.msk.f32.mxu0 %vm5782_vm1, %v5781_v0 }
  0x29   :  { %4797 = vmatmul.mubr.msk.f32.gmra.mxu0 %vm59_vm2, %v51_v17 }
  0x2a   :  { %4799 = vmatprep.mubr.msk.f32.mxu0 %vm5782_vm1, %v5781_v0 }
  0x2d   :  { %4800 = vmatmul.mubr.msk.f32.gmra.mxu0 %vm59_vm2, %v52_v18 }
  0x2e   :  { %4900 = vmatprep.mubr.msk.f32.mxu0 %vm5782_vm1, %v5781_v0 }
  0xcd   :  { %v5943_v20 = vpop.f32.mrf.mxu0 }
  0xce   :  { %4811 = vmatmul.mubr.msk.f32.vlgmr.msra.gmra.mxu1 %vm214_vm3, %v5943_v20 }
  0xcf   :  { %v4777_v21 = vpop.f32.mrf.mxu0  ;;  %4813 = vmatprep.mubr.msk.f32.mxu1 %vm5782_vm1, %v5781_v0 }
  0xd1   :  { %v5949_v22 = vpop.f32.mrf.mxu0 }
  0xd2   :  { %4814 = vmatmul.mubr.msk.f32.gmra.mxu1 %vm214_vm3, %v5949_v22 }
  0xd3   :  { %v4780_v23 = vpop.f32.mrf.mxu0  ;;  %4816 = vmatprep.mubr.msk.f32.mxu1 %vm5782_vm1, %v5781_v0 }
  0xd5   :  { %v5955_v24 = vpop.f32.mrf.mxu0 }
  0xd6   :  { %4817 = vmatmul.mubr.msk.f32.gmra.mxu1 %vm214_vm3, %v5955_v24 }
  0xd7   :  { %v4783_v25 = vpop.f32.mrf.mxu0  ;;  %4819 = vmatprep.mubr.msk.f32.mxu1 %vm5782_vm1, %v5781_v0 }
  0xd9   :  { %v5961_v26 = vpop.f32.mrf.mxu0 }
  0xda   :  { %4820 = vmatmul.mubr.msk.f32.gmra.mxu1 %vm214_vm3, %v5961_v26 }
  0xdb   :  { %v4786_v27 = vpop.f32.mrf.mxu0  ;;  %4822 = vmatprep.mubr.msk.f32.mxu1 %vm5782_vm1, %v5781_v0 }
  0xdd   :  { %v5967_v28 = vpop.f32.mrf.mxu0 }
  0xde   :  { %4823 = vmatmul.mubr.msk.f32.gmra.mxu1 %vm214_vm3, %v5967_v28 }
  0xdf   :  { %v4789_v29 = vpop.f32.mrf.mxu0  ;;  %4825 = vmatprep.mubr.msk.f32.mxu1 %vm5782_vm1, %v5781_v0 }
  0xe1   :  { %v5973_v30 = vpop.f32.mrf.mxu0 }
  0xe2   :  { %4826 = vmatmul.mubr.msk.f32.gmra.mxu1 %vm214_vm3, %v5973_v30 }
  0xe3   :  { %v4792_v31 = vpop.f32.mrf.mxu0  ;;  %4828 = vmatprep.mubr.msk.f32.mxu1 %vm5782_vm1, %v5781_v0 }
  0xe5   :  { %v5979_v32 = vpop.f32.mrf.mxu0 }
  0xe6   :  { %4829 = vmatmul.mubr.msk.f32.gmra.mxu1 %vm214_vm3, %v5979_v32 }
  0xe7   :  { %v4795_v33 = vpop.f32.mrf.mxu0  ;;  %4831 = vmatprep.mubr.msk.f32.mxu1 %vm5782_vm1, %v5781_v0 }
  0xe9   :  { %v5985_v34 = vpop.f32.mrf.mxu0 }
  0xea   :  { %4832 = vmatmul.mubr.msk.f32.gmra.mxu1 %vm214_vm3, %v5985_v34 }
  0xeb   :  { %v4798_v35 = vpop.f32.mrf.mxu0  ;;  %4834 = vmatprep.mubr.msk.f32.mxu1 %vm5782_vm1, %v5781_v0 }
  0xed   :  { %v5991_v36 = vpop.f32.mrf.mxu0 }
  0xee   :  { %4835 = vmatmul.mubr.msk.f32.gmra.mxu1 %vm214_vm3, %v5991_v36 }
  0xef   :  { %v4801_v37 = vpop.f32.mrf.mxu0  ;;  %4855 = vmatprep.mubr.msk.f32.mxu1 %vm5782_vm1, %v5781_v0 }
 0x18e   :  { %v308_v38 = vpop.f32.mrf.mxu1 }
 0x18f   :  { %v6041_v6 = vadd.f32 %v308_v38, %v213_v54 }
 0x190   :  { %v4812_v39 = vpop.f32.mrf.mxu1 }
 0x192   :  { %v313_v40 = vpop.f32.mrf.mxu1 }
 0x193   :  { %v6021_v2 = vadd.f32 %v313_v40, %v213_v54 }
 0x194   :  { %v4815_v41 = vpop.f32.mrf.mxu1 }
 0x196   :  { %v318_v42 = vpop.f32.mrf.mxu1 }
 0x197   :  { %v6035_v5 = vadd.f32 %v318_v42, %v213_v54 }
 0x198   :  { %v4818_v43 = vpop.f32.mrf.mxu1 }
 0x19a   :  { %v323_v45 = vpop.f32.mrf.mxu1 }
 0x19b   :  { %v6013_v62 = vadd.f32 %v323_v45, %v213_v54 }
 0x19c   :  { %v4821_v46 = vpop.f32.mrf.mxu1 }
 0x19e   :  { %v328_v48 = vpop.f32.mrf.mxu1 }
 0x19f   :  { %v6029_v4 = vadd.f32 %v328_v48, %v213_v54 }
 0x1a0   :  { %v4824_v49 = vpop.f32.mrf.mxu1 }
 0x1a2   :  { %v333_v52 = vpop.f32.mrf.mxu1 }
 0x1a3   :  { %v6009_v59 = vadd.f32 %v333_v52, %v213_v54 }
 0x1a4   :  { %v4827_v53 = vpop.f32.mrf.mxu1 }
 0x1a6   :  { %v338_v55 = vpop.f32.mrf.mxu1 }
 0x1a7   :  { %v6005_v56 = vadd.f32 %v338_v55, %v213_v54 }
 0x1a8   :  { %v4830_v57 = vpop.f32.mrf.mxu1 }
 0x1a9   :  { %373 = vrot.lane.b32.xlu1 %v6005_v56, %s5783_s11 }
 0x1aa   :  { %v343_v58 = vpop.f32.mrf.mxu1 }
 0x1ab   :  { %v6023_v3 = vadd.f32 %v343_v58, %v213_v54 }
 0x1ac   :  { %v4833_v60 = vpop.f32.mrf.mxu1 }
 0x1ad   :  { %371 = vrot.lane.b32.xlu1 %v6009_v59, %s5783_s11  ;;  %v36_v60 = vld [vmem:[%s8055_s1 + $0x8] sm:$0xff] }
 0x1ae   :  { %v348_v61 = vpop.f32.mrf.mxu1 }
 0x1af   :  { %v6015_v63 = vadd.f32 %v348_v61, %v213_v54  ;;  %v35_v54 = vld [vmem:[%s8055_s1] sm:$0xff] }
 0x1b0   :  { %v4836_v1 = vpop.f32.mrf.mxu1 }
 0x1b1   :  { %367 = vrot.lane.b32.xlu1 %v6013_v62, %s5783_s11  ;;  %377 = vrot.lane.b32.xlu0 %v6015_v63, %s5783_s11 }
 0x1b5   :  { %363 = vrot.lane.b32.xlu1 %v6021_v2, %s5783_s11  ;;  %375 = vrot.lane.b32.xlu0 %v6023_v3, %s5783_s11 }
 0x1b9   :  { %824 = vrot.lane.b32.xlu1 %v6015_v63, %s5784_s12  ;;  %369 = vrot.lane.b32.xlu0 %v6029_v4, %s5783_s11 }
 0x1bd   :  { %820 = vrot.lane.b32.xlu1 %v6005_v56, %s5784_s12  ;;  %365 = vrot.lane.b32.xlu0 %v6035_v5, %s5783_s11 }
 0x1c1   :  { %816 = vrot.lane.b32.xlu1 %v6029_v4, %s5784_s12  ;;  %361 = vrot.lane.b32.xlu0 %v6041_v6, %s5783_s11 }
 0x1c5   :  { %812 = vrot.lane.b32.xlu1 %v6035_v5, %s5784_s12  ;;  %822 = vrot.lane.b32.xlu0 %v6023_v3, %s5784_s12 }
 0x1c9   :  { %808 = vrot.lane.b32.xlu1 %v6041_v6, %s5784_s12  ;;  %818 = vrot.lane.b32.xlu0 %v6009_v59, %s5784_s12 }
 0x1cd   :  { %792 = vrot.lane.b32.xlu1 %v6021_v2, %s5785_s2  ;;  %814 = vrot.lane.b32.xlu0 %v6013_v62, %s5784_s12 }
 0x1d1   :  { %796 = vrot.lane.b32.xlu1 %v6013_v62, %s5785_s2  ;;  %810 = vrot.lane.b32.xlu0 %v6021_v2, %s5784_s12 }
 0x1d5   :  { %800 = vrot.lane.b32.xlu1 %v6009_v59, %s5785_s2  ;;  %790 = vrot.lane.b32.xlu0 %v6041_v6, %s5785_s2 }
 0x1d9   :  { %804 = vrot.lane.b32.xlu1 %v6023_v3, %s5785_s2  ;;  %794 = vrot.lane.b32.xlu0 %v6035_v5, %s5785_s2 }
 0x1dd   :  { %638 = vrot.lane.b32.xlu1 %v6005_v56, %s5786_s13  ;;  %798 = vrot.lane.b32.xlu0 %v6029_v4, %s5785_s2 }
 0x1e1   :  { %632 = vrot.lane.b32.xlu1 %v6013_v62, %s5786_s13  ;;  %802 = vrot.lane.b32.xlu0 %v6005_v56, %s5785_s2 }
 0x1e5   :  { %642 = vrot.lane.b32.xlu1 %v6015_v63, %s5786_s13  ;;  %806 = vrot.lane.b32.xlu0 %v6015_v63, %s5785_s2 }
 0x1e9   :  { %1087 = vrot.lane.b32.xlu1 %v6015_v63, %s5787_s14  ;;  %640 = vrot.lane.b32.xlu0 %v6023_v3, %s5786_s13 }
 0x1ed   :  { %636 = vrot.lane.b32.xlu0 %v6009_v59, %s5786_s13 }
 0x1f1   :  { %634 = vrot.lane.b32.xlu0 %v6029_v4, %s5786_s13 }
 0x1f5   :  { %630 = vrot.lane.b32.xlu0 %v6035_v5, %s5786_s13 }
 0x1f9   :  { %628 = vrot.lane.b32.xlu0 %v6021_v2, %s5786_s13 }
 0x1fd   :  { %626 = vrot.lane.b32.xlu0 %v6041_v6, %s5786_s13 }
 0x201   :  { %1085 = vrot.lane.b32.xlu0 %v6023_v3, %s5787_s14 }
 0x21b   :  { %v374_v7 = vpop.permute.xlu1 %373 }
 0x21f   :  { %v372_v8 = vpop.permute.xlu1 %371 }
 0x223   :  { %v368_v9 = vpop.permute.xlu1 %367  ;;  %v378_v10 = vpop.permute.xlu0 %377 }
 0x224   :  { %4838 = vmatpush3.xpose.msk.msra.mxu1 %vm379_vm4, %v378_v10 }
 0x225   :  { %4839 = vmatprep.subr.mxu1 %v5781_v0 }
 0x227   :  { %v364_v11 = vpop.permute.xlu1 %363  ;;  %v376_v12 = vpop.permute.xlu0 %375 }
 0x228   :  { %4840 = vmatpush3.xpose.msk.msra.mxu1 %vm379_vm4, %v376_v12  ;;  %v38_v12 = vld [vmem:[%s8055_s1 + $0x18] sm:$0xff] }
 0x229   :  { %4841 = vmatprep.subr.mxu1 %v5781_v0 }
 0x22b   :  { %v825_v13 = vpop.permute.xlu1 %824  ;;  %v370_v14 = vpop.permute.xlu0 %369 }
 0x22c   :  { %4842 = vmatpush3.xpose.msk.msra.mxu1 %vm379_vm4, %v374_v7  ;;  %v37_v7 = vld [vmem:[%s8055_s1 + $0x10] sm:$0xff] }
 0x22d   :  { %4843 = vmatprep.subr.mxu1 %v5781_v0 }
 0x22f   :  { %v821_v15 = vpop.permute.xlu1 %820  ;;  %v366_v16 = vpop.permute.xlu0 %365 }
 0x230   :  { %4844 = vmatpush3.xpose.msk.msra.mxu1 %vm379_vm4, %v372_v8 }
 0x231   :  { %4845 = vmatprep.subr.mxu1 %v5781_v0 }
 0x233   :  { %v817_v17 = vpop.permute.xlu1 %816  ;;  %v362_v18 = vpop.permute.xlu0 %361 }
 0x234   :  { %4846 = vmatpush3.xpose.msk.msra.mxu1 %vm379_vm4, %v370_v14 }
 0x235   :  { %4847 = vmatprep.subr.mxu1 %v5781_v0 }
 0x237   :  { %v813_v19 = vpop.permute.xlu1 %812  ;;  %v823_v21 = vpop.permute.xlu0 %822 }
 0x238   :  { %4848 = vmatpush3.xpose.msk.msra.mxu1 %vm379_vm4, %v368_v9 }
 0x239   :  { %4849 = vmatprep.subr.mxu1 %v5781_v0 }
 0x23b   :  { %v6111_v23 = vpop.permute.xlu1 %808  ;;  %v819_v25 = vpop.permute.xlu0 %818 }
 0x23c   :  { %4850 = vmatpush3.xpose.msk.msra.mxu1 %vm379_vm4, %v366_v16 }
 0x23d   :  { %4851 = vmatprep.subr.mxu1 %v5781_v0 }
 0x23f   :  { %v6115_v27 = vpop.permute.xlu1 %792  ;;  %v815_v29 = vpop.permute.xlu0 %814 }
 0x240   :  { %4852 = vmatpush3.xpose.msk.msra.mxu1 %vm379_vm4, %v364_v11 }
 0x241   :  { %4853 = vmatprep.subr.mxu1 %v5781_v0 }
 0x243   :  { %v6119_v31 = vpop.permute.xlu1 %796  ;;  %v811_v33 = vpop.permute.xlu0 %810 }
 0x244   :  { %4854 = vmatpush3.xpose.msk.msra.mxu1 %vm379_vm4, %v362_v18 }
 0x245   :  { %4927 = vmatprep.subr.mxu1 %v5781_v0 }
 0x247   :  { %v6123_v35 = vpop.permute.xlu1 %800  ;;  %4856 = vmatmul.mubr.msk.f32.vlgmr.msra.gmra.mxu1 %vm379_vm4, %v6041_v6  ;;  %v791_v37 = vpop.permute.xlu0 %790 }
 0x248   :  { %4928 = vmatpush3.xpose.msk.msra.mxu1 %vm379_vm4, %v825_v13  ;;  %4858 = vmatprep.mubr.msk.f32.mxu1 %vm5782_vm1, %v5781_v0 }
 0x249   :  { %4929 = vmatprep.subr.mxu1 %v5781_v0 }
 0x24b   :  { %v6131_v38 = vpop.permute.xlu1 %804  ;;  %4859 = vmatmul.mubr.msk.f32.gmra.mxu1 %vm379_vm4, %v6021_v2  ;;  %v6135_v39 = vpop.permute.xlu0 %794 }
 0x24c   :  { %4930 = vmatpush3.xpose.msk.msra.mxu1 %vm379_vm4, %v823_v21  ;;  %4861 = vmatprep.mubr.msk.f32.mxu1 %vm5782_vm1, %v5781_v0 }
 0x24d   :  { %4931 = vmatprep.subr.mxu1 %v5781_v0 }
 0x24f   :  { %v639_v40 = vpop.permute.xlu1 %638  ;;  %4862 = vmatmul.mubr.msk.f32.gmra.mxu1 %vm379_vm4, %v6035_v5  ;;  %v6143_v41 = vpop.permute.xlu0 %798 }
 0x250   :  { %4932 = vmatpush3.xpose.msk.msra.mxu1 %vm379_vm4, %v821_v15  ;;  %4864 = vmatprep.mubr.msk.f32.mxu1 %vm5782_vm1, %v5781_v0 }
 0x251   :  { %4933 = vmatprep.subr.mxu1 %v5781_v0 }
 0x253   :  { %v633_v42 = vpop.permute.xlu1 %632  ;;  %4865 = vmatmul.mubr.msk.f32.gmra.mxu1 %vm379_vm4, %v6013_v62  ;;  %v803_v43 = vpop.permute.xlu0 %802 }
 0x254   :  { %4934 = vmatpush3.xpose.msk.msra.mxu1 %vm379_vm4, %v819_v25  ;;  %4867 = vmatprep.mubr.msk.f32.mxu1 %vm5782_vm1, %v5781_v0  ;;  %v40_v25 = vld [vmem:[%s8055_s1 + $0x28] sm:$0xff] }
 0x255   :  { %4935 = vmatprep.subr.mxu1 %v5781_v0 }
 0x257   :  { %v643_v44 = vpop.permute.xlu1 %642  ;;  %4868 = vmatmul.mubr.msk.f32.gmra.mxu1 %vm379_vm4, %v6029_v4  ;;  %v807_v45 = vpop.permute.xlu0 %806 }
 0x258   :  { %4883 = vmatpush3.msra.mxu0 %v643_v44  ;;  %4936 = vmatpush3.xpose.msk.msra.mxu1 %vm379_vm4, %v817_v17  ;;  %v39_v17 = vld [vmem:[%s8055_s1 + $0x20] sm:$0xff] }
 0x259   :  { %4870 = vmatprep.mubr.msk.f32.mxu1 %vm5782_vm1, %v5781_v0  ;;  %4884 = vmatprep.subr.mxu0 %v5781_v0 }
 0x25a   :  { %4937 = vmatprep.subr.mxu1 %v5781_v0 }
 0x25b   :  { %4871 = vmatmul.mubr.msk.f32.gmra.mxu1 %vm379_vm4, %v6009_v59  ;;  %v641_v46 = vpop.permute.xlu0 %640 }
 0x25c   :  { %4885 = vmatpush3.msra.mxu0 %v641_v46  ;;  %4938 = vmatpush3.xpose.msk.msra.mxu1 %vm379_vm4, %v815_v29  ;;  %v43_v46 = vld [vmem:[%s8055_s1 + $0x40] sm:$0xff] }
 0x25d   :  { %4886 = vmatprep.subr.mxu0 %v5781_v0  ;;  %4873 = vmatprep.mubr.msk.f32.mxu1 %vm5782_vm1, %v5781_v0 }
 0x25e   :  { %4887 = vmatpush3.msra.mxu0 %v639_v40  ;;  %4939 = vmatprep.subr.mxu1 %v5781_v0 }
 0x25f   :  { %4874 = vmatmul.mubr.msk.f32.gmra.mxu1 %vm379_vm4, %v6005_v56  ;;  %4888 = vmatprep.subr.mxu0 %v5781_v0  ;;  %v637_v48 = vpop.permute.xlu0 %636 }
 0x260   :  { %4889 = vmatpush3.msra.mxu0 %v637_v48  ;;  %4940 = vmatpush3.xpose.msk.msra.mxu1 %vm379_vm4, %v813_v19 }
 0x261   :  { %4876 = vmatprep.mubr.msk.f32.mxu1 %vm5782_vm1, %v5781_v0  ;;  %4890 = vmatprep.subr.mxu0 %v5781_v0 }
 0x262   :  { %4941 = vmatprep.subr.mxu1 %v5781_v0 }
 0x263   :  { %4877 = vmatmul.mubr.msk.f32.gmra.mxu1 %vm379_vm4, %v6023_v3  ;;  %v635_v49 = vpop.permute.xlu0 %634 }
 0x264   :  { %4891 = vmatpush3.msra.mxu0 %v635_v49  ;;  %4942 = vmatpush3.xpose.msk.msra.mxu1 %vm379_vm4, %v811_v33 }
 0x265   :  { %4892 = vmatprep.subr.mxu0 %v5781_v0  ;;  %4879 = vmatprep.mubr.msk.f32.mxu1 %vm5782_vm1, %v5781_v0 }
 0x266   :  { %4893 = vmatpush3.msra.mxu0 %v633_v42  ;;  %4943 = vmatprep.subr.mxu1 %v5781_v0 }
 0x267   :  { %4880 = vmatmul.mubr.msk.f32.gmra.mxu1 %vm379_vm4, %v6015_v63  ;;  %4894 = vmatprep.subr.mxu0 %v5781_v0  ;;  %v631_v51 = vpop.permute.xlu0 %630 }
 0x268   :  { %4895 = vmatpush3.msra.mxu0 %v631_v51  ;;  %4944 = vmatpush3.xpose.msk.msra.mxu1 %vm379_vm4, %v6111_v23 }
 0x269   :  { %4945 = vmatprep.mubr.msk.f32.mxu1 %vm5782_vm1, %v5781_v0  ;;  %4896 = vmatprep.subr.mxu0 %v5781_v0 }
 0x26a   :  { %5017 = vmatprep.subr.mxu1 %v5781_v0 }
 0x26b   :  { %4946 = vmatmul.mubr.msk.f32.vlgmr.msra.gmra.mxu1 %vm379_vm4, %v791_v37  ;;  %v629_v52 = vpop.permute.xlu0 %628 }
 0x26c   :  { %4897 = vmatpush3.msra.mxu0 %v629_v52  ;;  %4948 = vmatprep.mubr.msk.f32.mxu1 %vm5782_vm1, %v5781_v0 }
 0x26d   :  { %4898 = vmatprep.subr.mxu0 %v5781_v0 }
 0x26f   :  { %4949 = vmatmul.mubr.msk.f32.gmra.mxu1 %vm379_vm4, %v6115_v27  ;;  %v627_v53 = vpop.permute.xlu0 %626 }
 0x270   :  { %4899 = vmatpush3.msra.mxu0 %v627_v53  ;;  %4951 = vmatprep.mubr.msk.f32.mxu1 %vm5782_vm1, %v5781_v0 }
 0x271   :  { %4972 = vmatprep.subr.mxu0 %v5781_v0 }
 0x273   :  { %4952 = vmatmul.mubr.msk.f32.gmra.mxu1 %vm379_vm4, %v6135_v39 }
 0x274   :  { %4954 = vmatprep.mubr.msk.f32.mxu1 %vm5782_vm1, %v5781_v0 }
 0x277   :  { %4955 = vmatmul.mubr.msk.f32.gmra.mxu1 %vm379_vm4, %v6119_v31 }
 0x278   :  { %4957 = vmatprep.mubr.msk.f32.mxu1 %vm5782_vm1, %v5781_v0 }
 0x27b   :  { %4958 = vmatmul.mubr.msk.f32.gmra.mxu1 %vm379_vm4, %v6143_v41  ;;  %v42_v41 = vld [vmem:[%s8055_s1 + $0x38] sm:$0xff] }
 0x27c   :  { %4960 = vmatprep.mubr.msk.f32.mxu1 %vm5782_vm1, %v5781_v0 }
 0x27f   :  { %4961 = vmatmul.mubr.msk.f32.gmra.mxu1 %vm379_vm4, %v6123_v35  ;;  %v41_v35 = vld [vmem:[%s8055_s1 + $0x30] sm:$0xff] }
 0x280   :  { %4963 = vmatprep.mubr.msk.f32.mxu1 %vm5782_vm1, %v5781_v0 }
 0x283   :  { %4964 = vmatmul.mubr.msk.f32.gmra.mxu1 %vm379_vm4, %v803_v43 }
 0x284   :  { %4966 = vmatprep.mubr.msk.f32.mxu1 %vm5782_vm1, %v5781_v0 }
 0x287   :  { %4967 = vmatmul.mubr.msk.f32.gmra.mxu1 %vm379_vm4, %v6131_v38 }
 0x288   :  { %4969 = vmatprep.mubr.msk.f32.mxu1 %vm5782_vm1, %v5781_v0 }
 0x28b   :  { %4970 = vmatmul.mubr.msk.f32.gmra.mxu1 %vm379_vm4, %v807_v45 }
 0x28c   :  { %5021 = vmatprep.mubr.msk.f32.mxu1 %vm5782_vm1, %v5781_v0 }
 0x307   :  { %v482_v55 = vpop.f32.mrf.mxu1 }
 0x308   :  { %v6231_v57 = vadd.f32 %v482_v55, %v35_v54 }
 0x309   :  { %v4857_v58 = vpop.f32.mrf.mxu1 }
 0x30a   :  { %v527_v61 = vsel %vm526_vm5, %v6231_v57, -inf }
 0x30b   :  { %528 = vmax.xlane.f32.xlu1 %v527_v61  ;;  %v487_v63 = vpop.f32.mrf.mxu1 }
 0x30c   :  { %v6238_v1 = vadd.f32 %v487_v63, %v36_v60 }
 0x30d   :  { %v4860_v3 = vpop.f32.mrf.mxu1 }
 0x30e   :  { %v530_v8 = vsel %vm526_vm5, %v6238_v1, -inf }
 0x30f   :  { %531 = vmax.xlane.f32.xlu0 %v530_v8  ;;  %v492_v9 = vpop.f32.mrf.mxu1 }
 0x310   :  { %v6245_v10 = vadd.f32 %v492_v9, %v37_v7 }
 0x311   :  { %v4863_v11 = vpop.f32.mrf.mxu1 }
 0x312   :  { %v533_v13 = vsel %vm526_vm5, %v6245_v10, -inf }
 0x313   :  { %534 = vmax.xlane.f32.xlu0 %v533_v13  ;;  %v497_v14 = vpop.f32.mrf.mxu1 }
 0x314   :  { %v6252_v15 = vadd.f32 %v497_v14, %v38_v12 }
 0x315   :  { %v4866_v16 = vpop.f32.mrf.mxu1 }
 0x316   :  { %v536_v18 = vsel %vm526_vm5, %v6252_v15, -inf }
 0x317   :  { %537 = vmax.xlane.f32.xlu1 %v536_v18  ;;  %v502_v19 = vpop.f32.mrf.mxu1 }
 0x318   :  { %v6259_v21 = vadd.f32 %v502_v19, %v39_v17 }
 0x319   :  { %v4869_v23 = vpop.f32.mrf.mxu1 }
 0x31a   :  { %v539_v27 = vsel %vm526_vm5, %v6259_v21, -inf }
 0x31b   :  { %540 = vmax.xlane.f32.xlu0 %v539_v27  ;;  %v507_v29 = vpop.f32.mrf.mxu1 }
 0x31c   :  { %v6266_v31 = vadd.f32 %v507_v29, %v40_v25 }
 0x31d   :  { %v4872_v33 = vpop.f32.mrf.mxu1 }
 0x31e   :  { %v542_v37 = vsel %vm526_vm5, %v6266_v31, -inf }
 0x31f   :  { %543 = vmax.xlane.f32.xlu1 %v542_v37  ;;  %v512_v38 = vpop.f32.mrf.mxu1 }
 0x320   :  { %v6273_v39 = vadd.f32 %v512_v38, %v41_v35 }
 0x321   :  { %v4875_v40 = vpop.f32.mrf.mxu1 }
 0x322   :  { %v545_v42 = vsel %vm526_vm5, %v6273_v39, -inf }
 0x323   :  { %546 = vmax.xlane.f32.xlu0 %v545_v42  ;;  %v517_v43 = vpop.f32.mrf.mxu1 }
 0x324   :  { %v6280_v44 = vadd.f32 %v517_v43, %v42_v41 }
 0x325   :  { %v4878_v45 = vpop.f32.mrf.mxu1 }
 0x326   :  { %v548_v48 = vsel %vm526_vm5, %v6280_v44, -inf }
 0x327   :  { %549 = vmax.xlane.f32.xlu1 %v548_v48  ;;  %v522_v49 = vpop.f32.mrf.mxu1 }
 0x328   :  { %v6287_v51 = vadd.f32 %v522_v49, %v43_v46 }
 0x329   :  { %v4881_v52 = vpop.f32.mrf.mxu1 }
 0x32a   :  { %v551_v53 = vsel %vm526_vm5, %v6287_v51, -inf }
 0x32b   :  { %552 = vmax.xlane.f32.xlu0 %v551_v53  ;;  %v928_v55 = vpop.f32.mrf.mxu1 }
 0x32c   :  { %v6291_v58 = vadd.f32 %v928_v55, %v35_v54 }
 0x32d   :  { %v4947_v61 = vpop.f32.mrf.mxu1 }
 0x32e   :  { %v972_v63 = vsel %vm526_vm5, %v6291_v58, -inf }
 0x32f   :  { %973 = vmax.xlane.f32.xlu1 %v972_v63  ;;  %v933_v3 = vpop.f32.mrf.mxu1 }
 0x330   :  { %v6295_v8 = vadd.f32 %v933_v3, %v36_v60 }
 0x331   :  { %v4950_v9 = vpop.f32.mrf.mxu1 }
 0x332   :  { %v975_v11 = vsel %vm526_vm5, %v6295_v8, -inf }
 0x333   :  { %976 = vmax.xlane.f32.xlu0 %v975_v11  ;;  %v938_v13 = vpop.f32.mrf.mxu1 }
 0x334   :  { %v6299_v14 = vadd.f32 %v938_v13, %v37_v7 }
 0x335   :  { %v4953_v16 = vpop.f32.mrf.mxu1 }
 0x336   :  { %v978_v54 = vsel %vm526_vm5, %v6299_v14, -inf }
 0x337   :  { %979 = vmax.xlane.f32.xlu1 %v978_v54  ;;  %v943_v18 = vpop.f32.mrf.mxu1 }
 0x338   :  { %v6303_v19 = vadd.f32 %v943_v18, %v38_v12 }
 0x339   :  { %v4956_v23 = vpop.f32.mrf.mxu1 }
 0x33a   :  { %v981_v60 = vsel %vm526_vm5, %v6303_v19, -inf }
 0x33b   :  { %982 = vmax.xlane.f32.xlu0 %v981_v60  ;;  %v948_v27 = vpop.f32.mrf.mxu1 }
 0x33c   :  { %v6307_v29 = vadd.f32 %v948_v27, %v39_v17 }
 0x33d   :  { %v4959_v33 = vpop.f32.mrf.mxu1 }
 0x33e   :  { %v984_v7 = vsel %vm526_vm5, %v6307_v29, -inf }
 0x33f   :  { %985 = vmax.xlane.f32.xlu1 %v984_v7  ;;  %v953_v37 = vpop.f32.mrf.mxu1 }
 0x340   :  { %v6317_v17 = vadd.f32 %v953_v37, %v40_v25  ;;  %v6333_v25 = vpop.permute.xlu1 %1087 }
 0x341   :  { %v4962_v38 = vpop.f32.mrf.mxu1 }
 0x342   :  { %v987_v55 = vsel %vm526_vm5, %v6317_v17, -inf }
 0x343   :  { %v958_v40 = vpop.f32.mrf.mxu1 }
 0x344   :  { %v6319_v49 = vadd.f32 %v958_v40, %v41_v35  ;;  %v6335_v35 = vpop.permute.xlu0 %1085 }
 0x345   :  { %v4965_v42 = vpop.f32.mrf.mxu1 }
 0x347   :  { %v963_v43 = vpop.f32.mrf.mxu1 }
 0x348   :  { %v6321_v52 = vadd.f32 %v963_v43, %v42_v41 }
 0x349   :  { %v4968_v12 = vpop.f32.mrf.mxu1 }
 0x34b   :  { %v968_v45 = vpop.f32.mrf.mxu1 }
 0x34c   :  { %v6323_v53 = vadd.f32 %v968_v45, %v43_v46 }
 0x34d   :  { %v4971_v48 = vpop.f32.mrf.mxu1 }
 0x350   :  { %1083 = vrot.lane.b32.xlu1 %v6005_v56, %s5787_s14  ;;  %v990_v56 = vsel %vm526_vm5, %v6319_v49, -inf }
 0x351   :  { %1081 = vrot.lane.b32.xlu0 %v6009_v59, %s5787_s14  ;;  %v993_v59 = vsel %vm526_vm5, %v6321_v52, -inf }
 0x355   :  { %1079 = vrot.lane.b32.xlu0 %v6029_v4, %s5787_s14  ;;  %v996_v4 = vsel %vm526_vm5, %v6323_v53, -inf }
 0x374   :  { %988 = vmax.xlane.f32.xlu0 %v987_v55  ;;  %991 = vmax.xlane.f32.xlu1 %v990_v56 }
 0x378   :  { %994 = vmax.xlane.f32.xlu0 %v993_v59  ;;  %997 = vmax.xlane.f32.xlu1 %v996_v4 }
 0x394   :  { %v529_v41 = vpop.xlane.xlu1 %528 }
 0x395   :  { %v554_v46 = vsub.f32 %v6231_v57, %v529_v41 }
 0x397   :  { %v563_v61 = vmul.f32 1.442695, %v554_v46 }
 0x398   :  { %v532_v63 = vpop.xlane.xlu0 %531 }
 0x399   :  { %5554 = vpow2.f32 %v563_v61  ;;  %v555_v3 = vsub.f32 %v6238_v1, %v532_v63 }
 0x39b   :  { %v565_v9 = vmul.f32 1.442695, %v555_v3 }
 0x39c   :  { %v535_v11 = vpop.xlane.xlu0 %534 }
 0x39d   :  { %5556 = vpow2.f32 %v565_v9  ;;  %v556_v13 = vsub.f32 %v6245_v10, %v535_v11 }
 0x39f   :  { %v567_v16 = vmul.f32 1.442695, %v556_v13 }
 0x3a0   :  { %v538_v54 = vpop.xlane.xlu1 %537 }
 0x3a1   :  { %5558 = vpow2.f32 %v567_v16  ;;  %v557_v18 = vsub.f32 %v6252_v15, %v538_v54 }
 0x3a3   :  { %v569_v23 = vmul.f32 1.442695, %v557_v18 }
 0x3a4   :  { %v541_v60 = vpop.xlane.xlu0 %540 }
 0x3a5   :  { %5560 = vpow2.f32 %v569_v23  ;;  %v558_v57 = vsub.f32 %v6259_v21, %v541_v60 }
 0x3a6   :  { %v6342_v27 = vpop.eup %5554 }
 0x3a7   :  { %v571_v33 = vmul.f32 1.442695, %v558_v57  ;;  %v581_v1 = vsel %vm526_vm5, %v6342_v27, 0.0 }
 0x3a8   :  { %v544_v7 = vpop.xlane.xlu1 %543  ;;  %582 = vadd.xlane.f32.xlu0 %v581_v1 }
 0x3a9   :  { %5562 = vpow2.f32 %v571_v33  ;;  %v559_v10 = vsub.f32 %v6266_v31, %v544_v7 }
 0x3aa   :  { %v6347_v37 = vpop.eup %5556 }
 0x3ab   :  { %v573_v38 = vmul.f32 1.442695, %v559_v10  ;;  %v584_v15 = vsel %vm526_vm5, %v6347_v37, 0.0 }
 0x3ac   :  { %v547_v40 = vpop.xlane.xlu0 %546  ;;  %585 = vadd.xlane.f32.xlu1 %v584_v15 }
 0x3ad   :  { %5564 = vpow2.f32 %v573_v38  ;;  %v560_v21 = vsub.f32 %v6273_v39, %v547_v40 }
 0x3ae   :  { %v6352_v42 = vpop.eup %5558 }
 0x3af   :  { %v575_v43 = vmul.f32 1.442695, %v560_v21  ;;  %v587_v12 = vsel %vm526_vm5, %v6352_v42, 0.0 }
 0x3b0   :  { %v550_v45 = vpop.xlane.xlu1 %549  ;;  %588 = vadd.xlane.f32.xlu0 %v587_v12 }
 0x3b1   :  { %5566 = vpow2.f32 %v575_v43  ;;  %v561_v31 = vsub.f32 %v6280_v44, %v550_v45 }
 0x3b2   :  { %v6357_v48 = vpop.eup %5560 }
 0x3b3   :  { %v577_v55 = vmul.f32 1.442695, %v561_v31  ;;  %v590_v56 = vsel %vm526_vm5, %v6357_v48, 0.0 }
 0x3b4   :  { %v553_v59 = vpop.xlane.xlu0 %552  ;;  %591 = vadd.xlane.f32.xlu0 %v590_v56 }
 0x3b5   :  { %5568 = vpow2.f32 %v577_v55  ;;  %v562_v39 = vsub.f32 %v6287_v51, %v553_v59 }
 0x3b6   :  { %v6362_v4 = vpop.eup %5562 }
 0x3b7   :  { %v579_v41 = vmul.f32 1.442695, %v562_v39  ;;  %v593_v46 = vsel %vm526_vm5, %v6362_v4, 0.0 }
 0x3b8   :  { %v974_v61 = vpop.xlane.xlu1 %973  ;;  %594 = vadd.xlane.f32.xlu1 %v593_v46 }
 0x3b9   :  { %5570 = vpow2.f32 %v579_v41  ;;  %v999_v44 = vsub.f32 %v6291_v58, %v974_v61 }
 0x3ba   :  { %v6367_v63 = vpop.eup %5564 }
 0x3bb   :  { %v1008_v3 = vmul.f32 1.442695, %v999_v44  ;;  %v596_v9 = vsel %vm526_vm5, %v6367_v63, 0.0 }
 0x3bc   :  { %v977_v11 = vpop.xlane.xlu0 %976  ;;  %597 = vadd.xlane.f32.xlu0 %v596_v9 }
 0x3bd   :  { %5572 = vpow2.f32 %v1008_v3  ;;  %v1000_v51 = vsub.f32 %v6295_v8, %v977_v11 }
 0x3be   :  { %v6372_v13 = vpop.eup %5566 }
 0x3bf   :  { %v1010_v16 = vmul.f32 1.442695, %v1000_v51  ;;  %v599_v54 = vsel %vm526_vm5, %v6372_v13, 0.0 }
 0x3c0   :  { %v980_v18 = vpop.xlane.xlu1 %979  ;;  %600 = vadd.xlane.f32.xlu1 %v599_v54 }
 0x3c1   :  { %5574 = vpow2.f32 %v1010_v16  ;;  %v1001_v58 = vsub.f32 %v6299_v14, %v980_v18 }
 0x3c2   :  { %v6377_v23 = vpop.eup %5568 }
 0x3c3   :  { %v1012_v60 = vmul.f32 1.442695, %v1001_v58  ;;  %v602_v57 = vsel %vm526_vm5, %v6377_v23, 0.0 }
 0x3c4   :  { %v983_v33 = vpop.xlane.xlu0 %982  ;;  %603 = vadd.xlane.f32.xlu0 %v602_v57 }
 0x3c5   :  { %5576 = vpow2.f32 %v1012_v60  ;;  %v1002_v8 = vsub.f32 %v6303_v19, %v983_v33 }
 0x3c6   :  { %v6382_v1 = vpop.eup %5570 }
 0x3c7   :  { %v1014_v7 = vmul.f32 1.442695, %v1002_v8  ;;  %v605_v10 = vsel %vm526_vm5, %v6382_v1, 0.0 }
 0x3c8   :  { %v986_v38 = vpop.xlane.xlu1 %985  ;;  %606 = vadd.xlane.f32.xlu1 %v605_v10  ;;  %v1082_v59 = vpop.permute.xlu0 %1081 }
 0x3c9   :  { %5578 = vpow2.f32 %v1014_v7  ;;  %v1003_v14 = vsub.f32 %v6307_v29, %v986_v38 }
 0x3ca   :  { %v6387_v15 = vpop.eup %5572 }
 0x3cb   :  { %v1016_v40 = vmul.f32 1.442695, %v1003_v14  ;;  %v1026_v21 = vsel %vm526_vm5, %v6387_v15, 0.0 }
 0x3cc   :  { %1027 = vadd.xlane.f32.xlu1 %v1026_v21  ;;  %v6411_v39 = vpop.permute.xlu0 %1079  ;;  %v1084_v41 = vpop.permute.xlu1 %1083 }
 0x3cd   :  { %5580 = vpow2.f32 %v1016_v40 }
 0x3ce   :  { %v6391_v19 = vpop.eup %5574 }
 0x3cf   :  { %v1029_v43 = vsel %vm526_vm5, %v6391_v19, 0.0 }
 0x3d0   :  { %1030 = vadd.xlane.f32.xlu1 %v1029_v43 }
 0x3d2   :  { %v6395_v12 = vpop.eup %5576 }
 0x3d3   :  { %v1032_v45 = vsel %vm526_vm5, %v6395_v12, 0.0 }
 0x3d4   :  { %1033 = vadd.xlane.f32.xlu1 %v1032_v45 }
 0x3d6   :  { %v6399_v29 = vpop.eup %5578 }
 0x3d7   :  { %v1035_v31 = vsel %vm526_vm5, %v6399_v29, 0.0 }
 0x3d8   :  { %1036 = vadd.xlane.f32.xlu0 %v1035_v31 }
 0x3da   :  { %v6403_v55 = vpop.eup %5580 }
 0x3db   :  { %v1038_v56 = vsel %vm526_vm5, %v6403_v55, 0.0 }
 0x3dc   :  { %1039 = vadd.xlane.f32.xlu1 %v1038_v56 }
 0x3ed   :  { %1077 = vrot.lane.b32.xlu1 %v6013_v62, %s5787_s14 }
 0x3ee   :  { %1075 = vrot.lane.b32.xlu0 %v6035_v5, %s5787_s14 }
 0x3fd   :  { %v989_v46 = vpop.xlane.xlu0 %988  ;;  %v992_v61 = vpop.xlane.xlu1 %991 }
 0x3fe   :  { %v1004_v44 = vsub.f32 %v6317_v17, %v989_v46  ;;  %v1005_v3 = vsub.f32 %v6319_v49, %v992_v61 }
 0x400   :  { %v1018_v9 = vmul.f32 1.442695, %v1004_v44  ;;  %v1020_v11 = vmul.f32 1.442695, %v1005_v3 }
 0x401   :  { %v998_v51 = vpop.xlane.xlu1 %997  ;;  %v995_v58 = vpop.xlane.xlu0 %994 }
 0x402   :  { %5582 = vpow2.f32 %v1018_v9  ;;  %v1007_v16 = vsub.f32 %v6323_v53, %v998_v51  ;;  %v1006_v60 = vsub.f32 %v6321_v52, %v995_v58  ;;  %v203_v58 = vld [vmem:[%s8056_s6 + $0x8] sm:$0xff] }
 0x403   :  { %5584 = vpow2.f32 %v1020_v11 }
 0x404   :  { %v1024_v62 = vmul.f32 1.442695, %v1007_v16  ;;  %v1022_v33 = vmul.f32 1.442695, %v1006_v60 }
 0x406   :  { %5586 = vpow2.f32 %v1024_v62 }
 0x40f   :  { %v6416_v5 = vpop.eup %5582 }
 0x410   :  { %v6418_v54 = vpop.eup %5584  ;;  %v1041_v18 = vsel %vm526_vm5, %v6416_v5, 0.0 }
 0x411   :  { %1042 = vadd.xlane.f32.xlu0 %v1041_v18  ;;  %v1044_v17 = vsel %vm526_vm5, %v6418_v54, 0.0 }
 0x412   :  { %1045 = vadd.xlane.f32.xlu1 %v1044_v17 }
 0x413   :  { %v6424_v49 = vpop.eup %5586 }
 0x414   :  { %v1050_v53 = vsel %vm526_vm5, %v6424_v49, 0.0 }
 0x416   :  { %1051 = vadd.xlane.f32.xlu1 %v1050_v53 }
 0x427   :  { %1073 = vrot.lane.b32.xlu0 %v6021_v2, %s5787_s14 }
 0x42b   :  { %1071 = vrot.lane.b32.xlu0 %v6041_v6, %s5787_s14 }
 0x431   :  { %v583_v57 = vpop.xlane.xlu0 %582 }
 0x432   :  { %5588 = vrcp.f32 %v583_v57  ;;  %v202_v57 = vld [vmem:[%s8056_s6] sm:$0xff] }
 0x435   :  { %v586_v8 = vpop.xlane.xlu1 %585 }
 0x436   :  { %5590 = vrcp.f32 %v586_v8 }
 0x437   :  { %5592 = vpow2.f32 %v1022_v33 }
 0x439   :  { %v589_v7 = vpop.xlane.xlu0 %588 }
 0x43a   :  { %5594 = vrcp.f32 %v589_v7 }
 0x43d   :  { %v592_v10 = vpop.xlane.xlu0 %591 }
 0x43e   :  { %5596 = vrcp.f32 %v592_v10 }
 0x43f   :  { %v5589_v38 = vpop.eup %5588 }
 0x440   :  { %v617_v14 = vmul.f32 %v5589_v38, %v6342_v27 }
 0x441   :  { %v595_v2 = vpop.xlane.xlu1 %594 }
 0x442   :  { %5598 = vrcp.f32 %v595_v2  ;;  %4901 = vmatmul.mubr.msk.f32.vlgmr.msra.gmra.mxu0 %vm526_vm5, %v617_v14 }
 0x443   :  { %v5591_v6 = vpop.eup %5590  ;;  %4973 = vmatpush3.msra.mxu0 %v6333_v25  ;;  %4903 = vmatprep.mubr.msk.f32.mxu0 %vm5782_vm1, %v5781_v0 }
 0x444   :  { %4974 = vmatprep.subr.mxu0 %v5781_v0  ;;  %v618_v52 = vmul.f32 %v5591_v6, %v6347_v37  ;;  %v6441_v21 = vpop.eup %5592 }
 0x445   :  { %4975 = vmatpush3.msra.mxu0 %v6335_v35  ;;  %v598_v40 = vpop.xlane.xlu0 %597  ;;  %v1047_v35 = vsel %vm526_vm5, %v6441_v21, 0.0 }
 0x446   :  { %4976 = vmatprep.subr.mxu0 %v5781_v0  ;;  %5600 = vrcp.f32 %v598_v40  ;;  %4904 = vmatmul.mubr.msk.f32.gmra.mxu0 %vm526_vm5, %v618_v52 }
 0x447   :  { %v5595_v27 = vpop.eup %5594  ;;  %4977 = vmatpush3.msra.mxu0 %v1084_v41  ;;  %4906 = vmatprep.mubr.msk.f32.mxu0 %vm5782_vm1, %v5781_v0 }
 0x448   :  { %4978 = vmatprep.subr.mxu0 %v5781_v0  ;;  %v619_v25 = vmul.f32 %v5595_v27, %v6352_v42 }
 0x449   :  { %4979 = vmatpush3.msra.mxu0 %v1082_v59  ;;  %v601_v37 = vpop.xlane.xlu1 %600 }
 0x44a   :  { %4980 = vmatprep.subr.mxu0 %v5781_v0  ;;  %5602 = vrcp.f32 %v601_v37  ;;  %1048 = vadd.xlane.f32.xlu0 %v1047_v35  ;;  %v204_v37 = vld [vmem:[%s8056_s6 + $0x10] sm:$0xff] }
 0x44b   :  { %v5597_v43 = vpop.eup %5596  ;;  %4907 = vmatmul.mubr.msk.f32.gmra.mxu0 %vm526_vm5, %v619_v25 }
 0x44c   :  { %4981 = vmatpush3.msra.mxu0 %v6411_v39  ;;  %4909 = vmatprep.mubr.msk.f32.mxu0 %vm5782_vm1, %v5781_v0  ;;  %v620_v45 = vmul.f32 %v5597_v43, %v6357_v48 }
 0x44d   :  { %v604_v42 = vpop.xlane.xlu0 %603  ;;  %4982 = vmatprep.subr.mxu0 %v5781_v0 }
 0x44e   :  { %5604 = vrcp.f32 %v604_v42 }
 0x44f   :  { %v5599_v31 = vpop.eup %5598  ;;  %4910 = vmatmul.mubr.msk.f32.gmra.mxu0 %vm526_vm5, %v620_v45 }
 0x450   :  { %4912 = vmatprep.mubr.msk.f32.mxu0 %vm5782_vm1, %v5781_v0  ;;  %v621_v56 = vmul.f32 %v5599_v31, %v6362_v4 }
 0x451   :  { %v607_v59 = vpop.xlane.xlu1 %606 }
 0x452   :  { %5606 = vrcp.f32 %v607_v59 }
 0x453   :  { %v5601_v39 = vpop.eup %5600  ;;  %4913 = vmatmul.mubr.msk.f32.gmra.mxu0 %vm526_vm5, %v621_v56 }
 0x454   :  { %4915 = vmatprep.mubr.msk.f32.mxu0 %vm5782_vm1, %v5781_v0  ;;  %v622_v48 = vmul.f32 %v5601_v39, %v6367_v63 }
 0x455   :  { %v1028_v41 = vpop.xlane.xlu1 %1027 }
 0x456   :  { %5608 = vrcp.f32 %v1028_v41 }
 0x457   :  { %v5603_v46 = vpop.eup %5602  ;;  %4916 = vmatmul.mubr.msk.f32.gmra.mxu0 %vm526_vm5, %v622_v48 }
 0x458   :  { %4918 = vmatprep.mubr.msk.f32.mxu0 %vm5782_vm1, %v5781_v0  ;;  %v623_v61 = vmul.f32 %v5603_v46, %v6372_v13 }
 0x459   :  { %v1031_v44 = vpop.xlane.xlu1 %1030 }
 0x45a   :  { %5610 = vrcp.f32 %v1031_v44 }
 0x45b   :  { %v5605_v4 = vpop.eup %5604  ;;  %4919 = vmatmul.mubr.msk.f32.gmra.mxu0 %vm526_vm5, %v623_v61 }
 0x45c   :  { %4921 = vmatprep.mubr.msk.f32.mxu0 %vm5782_vm1, %v5781_v0  ;;  %v624_v3 = vmul.f32 %v5605_v4, %v6377_v23 }
 0x45d   :  { %v1034_v11 = vpop.xlane.xlu1 %1033 }
 0x45e   :  { %5612 = vrcp.f32 %v1034_v11 }
 0x45f   :  { %v5607_v9 = vpop.eup %5606  ;;  %4922 = vmatmul.mubr.msk.f32.gmra.mxu0 %vm526_vm5, %v624_v3 }
 0x460   :  { %4924 = vmatprep.mubr.msk.f32.mxu0 %vm5782_vm1, %v5781_v0  ;;  %v625_v63 = vmul.f32 %v5607_v9, %v6382_v1 }
 0x461   :  { %v1037_v13 = vpop.xlane.xlu0 %1036 }
 0x462   :  { %5614 = vrcp.f32 %v1037_v13 }
 0x463   :  { %4925 = vmatmul.mubr.msk.f32.gmra.mxu0 %vm526_vm5, %v625_v63  ;;  %v5609_v18 = vpop.eup %5608 }
 0x464   :  { %4990 = vmatprep.mubr.msk.f32.mxu0 %vm5782_vm1, %v5781_v0  ;;  %v1062_v17 = vmul.f32 %v5609_v18, %v6387_v15  ;;  %v205_v15 = vld [vmem:[%s8056_s6 + $0x18] sm:$0xff] }
 0x465   :  { %v1040_v51 = vpop.xlane.xlu1 %1039  ;;  %v1076_v62 = vpop.permute.xlu0 %1075  ;;  %5018 = vmatpush3.msra.mxu1 %v205_v15 }
 0x466   :  { %5616 = vrcp.f32 %v1040_v51  ;;  %5019 = vmatprep.subr.mxu1 %v5781_v0 }
 0x467   :  { %v5611_v60 = vpop.eup %5610  ;;  %5020 = vmatpush3.msra.mxu1 %v204_v37 }
 0x468   :  { %v1063_v33 = vmul.f32 %v5611_v60, %v6391_v19  ;;  %5079 = vmatprep.subr.mxu1 %v5781_v0 }
 0x469   :  { %v1078_v16 = vpop.permute.xlu1 %1077 }
 0x46a   :  { %4983 = vmatpush3.msra.mxu0 %v1078_v16 }
 0x46b   :  { %4984 = vmatprep.subr.mxu0 %v5781_v0  ;;  %v5613_v8 = vpop.eup %5612 }
 0x46c   :  { %4985 = vmatpush3.msra.mxu0 %v1076_v62  ;;  %v1064_v10 = vmul.f32 %v5613_v8, %v6395_v12 }
 0x46d   :  { %4986 = vmatprep.subr.mxu0 %v5781_v0 }
 0x46f   :  { %v5615_v38 = vpop.eup %5614 }
 0x470   :  { %v1065_v19 = vmul.f32 %v5615_v38, %v6399_v29 }
 0x473   :  { %v5617_v14 = vpop.eup %5616 }
 0x474   :  { %v1066_v2 = vmul.f32 %v5617_v14, %v6403_v55 }
 0x49a   :  { %v1043_v23 = vpop.xlane.xlu0 %1042 }
 0x49b   :  { %5618 = vrcp.f32 %v1043_v23  ;;  %v1046_v7 = vpop.xlane.xlu1 %1045 }
 0x49c   :  { %5620 = vrcp.f32 %v1046_v7 }
 0x49e   :  { %v1074_v1 = vpop.permute.xlu0 %1073 }
 0x49f   :  { %4987 = vmatpush3.msra.mxu0 %v1074_v1  ;;  %v1052_v55 = vpop.xlane.xlu1 %1051 }
 0x4a0   :  { %4988 = vmatprep.subr.mxu0 %v5781_v0 }
 0x4a2   :  { %v1072_v53 = vpop.permute.xlu0 %1071 }
 0x4a3   :  { %4989 = vmatpush3.msra.mxu0 %v1072_v53 }
 0x4a4   :  { %4991 = vmatmul.mubr.msk.f32.vlgmr.msra.gmra.mxu0 %vm526_vm5, %v1062_v17  ;;  %5048 = vmatprep.subr.mxu0 %v5781_v0 }
 0x4a5   :  { %4993 = vmatprep.mubr.msk.f32.mxu0 %vm5782_vm1, %v5781_v0  ;;  %5049 = vmatpush3.msra.mxu0 %v203_v58 }
 0x4a6   :  { %5050 = vmatprep.subr.mxu0 %v5781_v0 }
 0x4a7   :  { %5051 = vmatpush3.msra.mxu0 %v202_v57 }
 0x4a8   :  { %4994 = vmatmul.mubr.msk.f32.gmra.mxu0 %vm526_vm5, %v1063_v33  ;;  %5114 = vmatprep.subr.mxu0 %v5781_v0  ;;  %v5619_v6 = vpop.eup %5618 }
 0x4a9   :  { %4996 = vmatprep.mubr.msk.f32.mxu0 %vm5782_vm1, %v5781_v0  ;;  %v1067_v12 = vmul.f32 %v5619_v6, %v6416_v5  ;;  %v5621_v52 = vpop.eup %5620 }
 0x4aa   :  { %v1068_v29 = vmul.f32 %v5621_v52, %v6418_v54 }
 0x4ac   :  { %4997 = vmatmul.mubr.msk.f32.gmra.mxu0 %vm526_vm5, %v1064_v10 }
 0x4ad   :  { %4999 = vmatprep.mubr.msk.f32.mxu0 %vm5782_vm1, %v5781_v0 }
 0x4b0   :  { %5000 = vmatmul.mubr.msk.f32.gmra.mxu0 %vm526_vm5, %v1065_v19 }
 0x4b1   :  { %5002 = vmatprep.mubr.msk.f32.mxu0 %vm5782_vm1, %v5781_v0 }
 0x4b4   :  { %5003 = vmatmul.mubr.msk.f32.gmra.mxu0 %vm526_vm5, %v1066_v2 }
 0x4b5   :  { %5005 = vmatprep.mubr.msk.f32.mxu0 %vm5782_vm1, %v5781_v0 }
 0x4b8   :  { %5006 = vmatmul.mubr.msk.f32.gmra.mxu0 %vm526_vm5, %v1067_v12 }
 0x4b9   :  { %5008 = vmatprep.mubr.msk.f32.mxu0 %vm5782_vm1, %v5781_v0 }
 0x4bc   :  { %5009 = vmatmul.mubr.msk.f32.gmra.mxu0 %vm526_vm5, %v1068_v29 }
 0x4bd   :  { %5011 = vmatprep.mubr.msk.f32.mxu0 %vm5782_vm1, %v5781_v0 }
 0x4d3   :  { %v1049_v40 = vpop.xlane.xlu0 %1048 }
 0x4d4   :  { %5622 = vrcp.f32 %v1049_v40 }
 0x4d5   :  { %5624 = vrcp.f32 %v1052_v55 }
 0x4e1   :  { %v5623_v27 = vpop.eup %5622 }
 0x4e2   :  { %v1069_v5 = vmul.f32 %v5623_v27, %v6441_v21  ;;  %v5625_v25 = vpop.eup %5624 }
 0x4e3   :  { %v1070_v54 = vmul.f32 %v5625_v25, %v6424_v49 }
 0x4e4   :  { %5012 = vmatmul.mubr.msk.f32.gmra.mxu0 %vm526_vm5, %v1069_v5 }
 0x4e5   :  { %5014 = vmatprep.mubr.msk.f32.mxu0 %vm5782_vm1, %v5781_v0 }
 0x4e8   :  { %5015 = vmatmul.mubr.msk.f32.gmra.mxu0 %vm526_vm5, %v1070_v54 }
 0x4e9   :  { %5052 = vmatprep.mubr.msk.f32.mxu0 %vm5782_vm1, %v5781_v0 }
 0x502   :  { %v746_v21 = vpop.f32.mrf.mxu0 }
 0x503   :  { %5053 = vmatmul.mubr.msk.f32.vlgmr.msra.gmra.mxu0 %vm379_vm4, %v746_v21 }
 0x504   :  { %v4902_v35 = vpop.f32.mrf.mxu0  ;;  %5055 = vmatprep.mubr.msk.f32.mxu0 %vm5782_vm1, %v5781_v0 }
 0x506   :  { %v751_v43 = vpop.f32.mrf.mxu0 }
 0x507   :  { %5056 = vmatmul.mubr.msk.f32.gmra.mxu0 %vm379_vm4, %v751_v43  ;;  %v1511_v43 = vsub.s32 1, %v5997_v47 }
 0x508   :  { %v4905_v45 = vpop.f32.mrf.mxu0  ;;  %5058 = vmatprep.mubr.msk.f32.mxu0 %vm5782_vm1, %v5781_v0 }
 0x509   :  { %v6595_v45 = vld [vmem:[%s8054_s9] sm:$0xff] }
 0x50b   :  { %v756_v49 = vpop.f32.mrf.mxu0 }
 0x50c   :  { %5059 = vmatmul.mubr.msk.f32.gmra.mxu0 %vm379_vm4, %v756_v49  ;;  %v1512_v49 = vrot.slane %v6595_v45, %v1511_v43 }
 0x50d   :  { %v4908_v42 = vpop.f32.mrf.mxu0  ;;  %5061 = vmatprep.mubr.msk.f32.mxu0 %vm5782_vm1, %v5781_v0 }
 0x50f   :  { %v761_v31 = vpop.f32.mrf.mxu0 }
 0x510   :  { %5062 = vmatmul.mubr.msk.f32.gmra.mxu0 %vm379_vm4, %v761_v31 }
 0x511   :  { %v4911_v56 = vpop.f32.mrf.mxu0  ;;  %5064 = vmatprep.mubr.msk.f32.mxu0 %vm5782_vm1, %v5781_v0 }
 0x513   :  { %v766_v59 = vpop.f32.mrf.mxu0 }
 0x514   :  { %5065 = vmatmul.mubr.msk.f32.gmra.mxu0 %vm379_vm4, %v766_v59 }
 0x515   :  { %v4914_v39 = vpop.f32.mrf.mxu0  ;;  %5067 = vmatprep.mubr.msk.f32.mxu0 %vm5782_vm1, %v5781_v0 }
 0x517   :  { %v771_v48 = vpop.f32.mrf.mxu0 }
 0x518   :  { %5068 = vmatmul.mubr.msk.f32.gmra.mxu0 %vm379_vm4, %v771_v48 }
 0x519   :  { %v4917_v41 = vpop.f32.mrf.mxu0  ;;  %5070 = vmatprep.mubr.msk.f32.mxu0 %vm5782_vm1, %v5781_v0 }
 0x51b   :  { %v776_v46 = vpop.f32.mrf.mxu0 }
 0x51c   :  { %5071 = vmatmul.mubr.msk.f32.gmra.mxu0 %vm379_vm4, %v776_v46 }
 0x51d   :  { %v4920_v61 = vpop.f32.mrf.mxu0  ;;  %5073 = vmatprep.mubr.msk.f32.mxu0 %vm5782_vm1, %v5781_v0 }
 0x51f   :  { %v781_v4 = vpop.f32.mrf.mxu0 }
 0x520   :  { %5074 = vmatmul.mubr.msk.f32.gmra.mxu0 %vm379_vm4, %v781_v4 }
 0x521   :  { %v4923_v44 = vpop.f32.mrf.mxu0  ;;  %5076 = vmatprep.mubr.msk.f32.mxu0 %vm5782_vm1, %v5781_v0 }
 0x523   :  { %v786_v3 = vpop.f32.mrf.mxu0 }
 0x524   :  { %5077 = vmatmul.mubr.msk.f32.gmra.mxu0 %vm379_vm4, %v786_v3 }
 0x525   :  { %v4926_v9 = vpop.f32.mrf.mxu0  ;;  %5130 = vmatprep.mubr.msk.f32.mxu0 %vm5782_vm1, %v5781_v0 }
 0x564   :  { %v1191_v63 = vpop.f32.mrf.mxu0 }
 0x565   :  { %5022 = vmatmul.mubr.msk.f32.vlgmr.msra.gmra.mxu1 %vm379_vm4, %v1191_v63 }
 0x566   :  { %v4992_v11 = vpop.f32.mrf.mxu0  ;;  %5024 = vmatprep.mubr.msk.f32.mxu1 %vm5782_vm1, %v5781_v0 }
 0x568   :  { %v1196_v13 = vpop.f32.mrf.mxu0 }
 0x569   :  { %5025 = vmatmul.mubr.msk.f32.gmra.mxu1 %vm379_vm4, %v1196_v13 }
 0x56a   :  { %v4995_v51 = vpop.f32.mrf.mxu0  ;;  %5027 = vmatprep.mubr.msk.f32.mxu1 %vm5782_vm1, %v5781_v0 }
 0x56c   :  { %v1201_v16 = vpop.f32.mrf.mxu0 }
 0x56d   :  { %5028 = vmatmul.mubr.msk.f32.gmra.mxu1 %vm379_vm4, %v1201_v16 }
 0x56e   :  { %v4998_v62 = vpop.f32.mrf.mxu0  ;;  %5030 = vmatprep.mubr.msk.f32.mxu1 %vm5782_vm1, %v5781_v0 }
 0x570   :  { %v1206_v23 = vpop.f32.mrf.mxu0 }
 0x571   :  { %5031 = vmatmul.mubr.msk.f32.gmra.mxu1 %vm379_vm4, %v1206_v23 }
 0x572   :  { %v5001_v1 = vpop.f32.mrf.mxu0  ;;  %5033 = vmatprep.mubr.msk.f32.mxu1 %vm5782_vm1, %v5781_v0 }
 0x574   :  { %v1211_v18 = vpop.f32.mrf.mxu0 }
 0x575   :  { %5034 = vmatmul.mubr.msk.f32.gmra.mxu1 %vm379_vm4, %v1211_v18 }
 0x576   :  { %v5004_v17 = vpop.f32.mrf.mxu0  ;;  %5036 = vmatprep.mubr.msk.f32.mxu1 %vm5782_vm1, %v5781_v0 }
 0x578   :  { %v1216_v53 = vpop.f32.mrf.mxu0 }
 0x579   :  { %5037 = vmatmul.mubr.msk.f32.gmra.mxu1 %vm379_vm4, %v1216_v53 }
 0x57a   :  { %v5007_v58 = vpop.f32.mrf.mxu0  ;;  %5039 = vmatprep.mubr.msk.f32.mxu1 %vm5782_vm1, %v5781_v0 }
 0x57c   :  { %v1221_v60 = vpop.f32.mrf.mxu0 }
 0x57d   :  { %5040 = vmatmul.mubr.msk.f32.gmra.mxu1 %vm379_vm4, %v1221_v60 }
 0x57e   :  { %v5010_v57 = vpop.f32.mrf.mxu0  ;;  %5042 = vmatprep.mubr.msk.f32.mxu1 %vm5782_vm1, %v5781_v0 }
 0x5a4   :  { %v1226_v15 = vpop.f32.mrf.mxu0 }
 0x5a5   :  { %5043 = vmatmul.mubr.msk.f32.gmra.mxu1 %vm379_vm4, %v1226_v15 }
 0x5a6   :  { %v5013_v33 = vpop.f32.mrf.mxu0  ;;  %5045 = vmatprep.mubr.msk.f32.mxu1 %vm5782_vm1, %v5781_v0 }
 0x5a8   :  { %v1231_v8 = vpop.f32.mrf.mxu0 }
 0x5a9   :  { %5046 = vmatmul.mubr.msk.f32.gmra.mxu1 %vm379_vm4, %v1231_v8 }
 0x5aa   :  { %v5016_v7 = vpop.f32.mrf.mxu0  ;;  %5087 = vmatprep.mubr.msk.f32.mxu1 %vm5782_vm1, %v5781_v0 }
 0x5c3   :  { %v1465_v10 = vpop.f32.mrf.mxu0 }
 0x5c5   :  { %v5054_v38 = vpop.f32.mrf.mxu0 }
 0x5c7   :  { %v1470_v19 = vpop.f32.mrf.mxu0 }
 0x5c9   :  { %v5057_v14 = vpop.f32.mrf.mxu0 }
 0x5cc   :  { %v1475_v2 = vpop.f32.mrf.mxu0 }
 0x5ce   :  { %v5060_v6 = vpop.f32.mrf.mxu0 }
 0x5d0   :  { %v1480_v12 = vpop.f32.mrf.mxu0 }
 0x5d2   :  { %v5063_v52 = vpop.f32.mrf.mxu0 }
 0x5d4   :  { %v1485_v29 = vpop.f32.mrf.mxu0 }
 0x5d6   :  { %v5066_v55 = vpop.f32.mrf.mxu0 }
 0x5d8   :  { %v1490_v40 = vpop.f32.mrf.mxu0 }
 0x5da   :  { %v5069_v27 = vpop.f32.mrf.mxu0 }
 0x5dc   :  { %v1495_v5 = vpop.f32.mrf.mxu0 }
 0x5de   :  { %v5072_v25 = vpop.f32.mrf.mxu0 }
 0x5e0   :  { %v1500_v37 = vpop.f32.mrf.mxu0 }
 0x5e2   :  { %v5075_v54 = vpop.f32.mrf.mxu0 }
 0x5e4   :  { %v1505_v21 = vpop.f32.mrf.mxu0 }
 0x5e6   :  { %v5078_v35 = vpop.f32.mrf.mxu0 }
 0x625   :  { %v1328_v42 = vpop.f32.mrf.mxu1 }
 0x626   :  { %v1466_v31 = vadd.f32 %v1465_v10, %v1328_v42 }
 0x627   :  { %v5023_v56 = vpop.f32.mrf.mxu1 }
 0x628   :  { %v1513_v59 = vadd.f32 %v1512_v49, %v1466_v31 }
 0x629   :  { %v1333_v39 = vpop.f32.mrf.mxu1 }
 0x62a   :  { %v1471_v48 = vadd.f32 %v1470_v19, %v1333_v39  ;;  %v1522_v41 = vadd.f32 %v1513_v59, %v5943_v20 }
 0x62b   :  { %v5026_v46 = vpop.f32.mrf.mxu1 }
 0x62c   :  { %v1514_v61 = vadd.f32 %v1512_v49, %v1471_v48  ;;  %v1531_v4 = vsel %vm214_vm3, %v1522_v41, 0.0 }
 0x62d   :  { %v1338_v44 = vpop.f32.mrf.mxu1  ;;  %1532 = vadd.xlane.f32.xlu1 %v1531_v4 }
 0x62e   :  { %v1476_v3 = vadd.f32 %v1475_v2, %v1338_v44  ;;  %v1523_v9 = vadd.f32 %v1514_v61, %v5949_v22 }
 0x62f   :  { %v5029_v63 = vpop.f32.mrf.mxu1 }
 0x630   :  { %v1515_v11 = vadd.f32 %v1512_v49, %v1476_v3  ;;  %v1534_v13 = vsel %vm214_vm3, %v1523_v9, 0.0 }
 0x631   :  { %v1343_v51 = vpop.f32.mrf.mxu1  ;;  %1535 = vadd.xlane.f32.xlu1 %v1534_v13 }
 0x632   :  { %v1481_v16 = vadd.f32 %v1480_v12, %v1343_v51  ;;  %v1524_v62 = vadd.f32 %v1515_v11, %v5955_v24 }
 0x633   :  { %v5032_v23 = vpop.f32.mrf.mxu1 }
 0x634   :  { %v1516_v20 = vadd.f32 %v1512_v49, %v1481_v16  ;;  %v1537_v1 = vsel %vm214_vm3, %v1524_v62, 0.0 }
 0x635   :  { %v1348_v18 = vpop.f32.mrf.mxu1  ;;  %1538 = vadd.xlane.f32.xlu1 %v1537_v1 }
 0x636   :  { %v1486_v17 = vadd.f32 %v1485_v29, %v1348_v18  ;;  %v1525_v53 = vadd.f32 %v1516_v20, %v5961_v26 }
 0x637   :  { %v5035_v58 = vpop.f32.mrf.mxu1 }
 0x638   :  { %v1517_v22 = vadd.f32 %v1512_v49, %v1486_v17  ;;  %v1540_v60 = vsel %vm214_vm3, %v1525_v53, 0.0 }
 0x639   :  { %v1353_v57 = vpop.f32.mrf.mxu1  ;;  %1541 = vadd.xlane.f32.xlu1 %v1540_v60 }
 0x63a   :  { %v1491_v15 = vadd.f32 %v1490_v40, %v1353_v57  ;;  %v1526_v33 = vadd.f32 %v1517_v22, %v5967_v28 }
 0x63b   :  { %v5038_v8 = vpop.f32.mrf.mxu1 }
 0x63c   :  { %v1518_v24 = vadd.f32 %v1512_v49, %v1491_v15  ;;  %v1543_v7 = vsel %vm214_vm3, %v1526_v33, 0.0  ;;  %v1677_v8 = vld [vmem:[%s8057_s7 + $0x10] sm:$0xff] }
 0x63d   :  { %v1358_v10 = vpop.f32.mrf.mxu1  ;;  %1544 = vadd.xlane.f32.xlu0 %v1543_v7  ;;  %v1675_v7 = vld [vmem:[%s8057_s7] sm:$0xff] }
 0x63e   :  { %v1496_v38 = vadd.f32 %v1495_v5, %v1358_v10  ;;  %v1527_v19 = vadd.f32 %v1518_v24, %v5973_v30  ;;  %v1676_v24 = vld [vmem:[%s8057_s7 + $0x8] sm:$0xff] }
 0x63f   :  { %v5041_v14 = vpop.f32.mrf.mxu1 }
 0x640   :  { %v1519_v26 = vadd.f32 %v1512_v49, %v1496_v38  ;;  %v1546_v2 = vsel %vm214_vm3, %v1527_v19, 0.0 }
 0x641   :  { %1547 = vadd.xlane.f32.xlu1 %v1546_v2 }
 0x642   :  { %v1528_v6 = vadd.f32 %v1519_v26, %v5979_v32 }
 0x644   :  { %v1549_v12 = vsel %vm214_vm3, %v1528_v6, 0.0 }
 0x645   :  { %1550 = vadd.xlane.f32.xlu0 %v1549_v12 }
 0x665   :  { %v1363_v28 = vpop.f32.mrf.mxu1 }
 0x666   :  { %v1501_v52 = vadd.f32 %v1500_v37, %v1363_v28 }
 0x667   :  { %v5044_v29 = vpop.f32.mrf.mxu1 }
 0x668   :  { %v1520_v55 = vadd.f32 %v1512_v49, %v1501_v52  ;;  %v1836_v29 = vld [vmem:[%s8058_s8 + $0x38] sm:$0xff] }
 0x669   :  { %v1368_v40 = vpop.f32.mrf.mxu1  ;;  %5115 = vmatpush3.msra.mxu0 %v1836_v29 }
 0x66a   :  { %v1506_v27 = vadd.f32 %v1505_v21, %v1368_v40  ;;  %v6615_v5 = vadd.f32 %v1520_v55, %v5985_v34  ;;  %v1835_v55 = vld [vmem:[%s8058_s8 + $0x30] sm:$0xff]  ;;  %5116 = vmatprep.subr.mxu0 %v5781_v0  ;;  %v1834_v40 = vld [vmem:[%s8058_s8 + $0x28] sm:$0xff] }
 0x66b   :  { %v5047_v30 = vpop.f32.mrf.mxu1  ;;  %5117 = vmatpush3.msra.mxu0 %v1835_v55 }
 0x66c   :  { %v1521_v25 = vadd.f32 %v1512_v49, %v1506_v27  ;;  %v1552_v54 = vsel %vm214_vm3, %v6615_v5, 0.0  ;;  %5118 = vmatprep.subr.mxu0 %v5781_v0  ;;  %v1833_v27 = vld [vmem:[%s8058_s8 + $0x20] sm:$0xff] }
 0x66d   :  { %1553 = vadd.xlane.f32.xlu1 %v1552_v54  ;;  %5119 = vmatpush3.msra.mxu0 %v1834_v40 }
 0x66e   :  { %v6620_v32 = vadd.f32 %v1521_v25, %v5991_v36  ;;  %5120 = vmatprep.subr.mxu0 %v5781_v0 }
 0x66f   :  { %5121 = vmatpush3.msra.mxu0 %v1833_v27 }
 0x670   :  { %v1555_v35 = vsel %vm214_vm3, %v6620_v32, 0.0  ;;  %5122 = vmatprep.subr.mxu0 %v5781_v0 }
 0x671   :  { %1556 = vadd.xlane.f32.xlu0 %v1555_v35 }
 0x6b6   :  { %v1533_v37 = vpop.xlane.xlu1 %1532 }
 0x6b7   :  { %v1559_v42 = vmul.f32 0.03125, %v1533_v37 }
 0x6b9   :  { %v6624_v31 = vsub.f32 %v1522_v41, %v1559_v42 }
 0x6ba   :  { %v1536_v21 = vpop.xlane.xlu1 %1535 }
 0x6bb   :  { %v1560_v34 = vmul.f32 0.03125, %v1536_v21  ;;  %v1577_v49 = vmul.f32 %v6624_v31, %v6624_v31 }
 0x6bd   :  { %v6628_v56 = vsub.f32 %v1523_v9, %v1560_v34  ;;  %v1586_v59 = vsel %vm214_vm3, %v1577_v49, 0.0 }
 0x6be   :  { %v1539_v39 = vpop.xlane.xlu1 %1538  ;;  %1587 = vadd.xlane.f32.xlu1 %v1586_v59  ;;  %v1651_v59 = vsub.s32 4, %v5997_v47 }
 0x6bf   :  { %v1561_v36 = vmul.f32 0.03125, %v1539_v39  ;;  %v1578_v48 = vmul.f32 %v6628_v56, %v6628_v56 }
 0x6c1   :  { %v6633_v46 = vsub.f32 %v1524_v62, %v1561_v36  ;;  %v1589_v41 = vsel %vm214_vm3, %v1578_v48, 0.0  ;;  %v1664_v48 = vsub.s32 5, %v5997_v47 }
 0x6c2   :  { %v1542_v61 = vpop.xlane.xlu1 %1541  ;;  %1590 = vadd.xlane.f32.xlu0 %v1589_v41 }
 0x6c3   :  { %v1562_v4 = vmul.f32 0.03125, %v1542_v61  ;;  %v1579_v44 = vmul.f32 %v6633_v46, %v6633_v46  ;;  %v6712_v61 = vrot.slane %v6595_v45, %v1651_v59 }
 0x6c5   :  { %v6638_v3 = vsub.f32 %v1525_v53, %v1562_v4  ;;  %v1592_v9 = vsel %vm214_vm3, %v1579_v44, 0.0 }
 0x6c6   :  { %v1545_v63 = vpop.xlane.xlu0 %1544  ;;  %1593 = vadd.xlane.f32.xlu1 %v1592_v9 }
 0x6c7   :  { %v1563_v11 = vmul.f32 0.03125, %v1545_v63  ;;  %v1580_v13 = vmul.f32 %v6638_v3, %v6638_v3 }
 0x6c9   :  { %v6643_v51 = vsub.f32 %v1526_v33, %v1563_v11  ;;  %v1595_v16 = vsel %vm214_vm3, %v1580_v13, 0.0  ;;  %v1678_v33 = vld [vmem:[%s8057_s7 + $0x18] sm:$0xff]  ;;  %v6718_v11 = vrot.slane %v6595_v45, %v1664_v48 }
 0x6ca   :  { %v1548_v62 = vpop.xlane.xlu1 %1547  ;;  %1596 = vadd.xlane.f32.xlu0 %v1595_v16  ;;  %5080 = vmatpush3.msra.mxu1 %v1678_v33 }
 0x6cb   :  { %v1564_v23 = vmul.f32 0.03125, %v1548_v62  ;;  %v1581_v20 = vmul.f32 %v6643_v51, %v6643_v51  ;;  %5081 = vmatprep.subr.mxu1 %v5781_v0 }
 0x6cc   :  { %5082 = vmatpush3.msra.mxu1 %v1677_v8 }
 0x6cd   :  { %v6648_v1 = vsub.f32 %v1527_v19, %v1564_v23  ;;  %v1598_v18 = vsel %vm214_vm3, %v1581_v20, 0.0  ;;  %5083 = vmatprep.subr.mxu1 %v5781_v0 }
 0x6ce   :  { %v1551_v17 = vpop.xlane.xlu0 %1550  ;;  %1599 = vadd.xlane.f32.xlu1 %v1598_v18  ;;  %5084 = vmatpush3.msra.mxu1 %v1676_v24 }
 0x6cf   :  { %v1565_v53 = vmul.f32 0.03125, %v1551_v17  ;;  %v1582_v58 = vmul.f32 %v6648_v1, %v6648_v1  ;;  %5085 = vmatprep.subr.mxu1 %v5781_v0 }
 0x6d0   :  { %5086 = vmatpush3.msra.mxu1 %v1675_v7 }
 0x6d1   :  { %v6653_v22 = vsub.f32 %v1528_v6, %v1565_v53  ;;  %v1601_v60 = vsel %vm214_vm3, %v1582_v58, 0.0  ;;  %5157 = vmatprep.subr.mxu1 %v5781_v0 }
 0x6d2   :  { %1602 = vadd.xlane.f32.xlu0 %v1601_v60 }
 0x6d3   :  { %v1583_v57 = vmul.f32 %v6653_v22, %v6653_v22 }
 0x6d5   :  { %v1604_v15 = vsel %vm214_vm3, %v1583_v57, 0.0 }
 0x6d6   :  { %1605 = vadd.xlane.f32.xlu1 %v1604_v15 }
 0x6f6   :  { %v1554_v10 = vpop.xlane.xlu1 %1553 }
 0x6f7   :  { %v1566_v38 = vmul.f32 0.03125, %v1554_v10 }
 0x6f9   :  { %v6676_v19 = vsub.f32 %v6615_v5, %v1566_v38  ;;  %v1832_v5 = vld [vmem:[%s8058_s8 + $0x18] sm:$0xff] }
 0x6fa   :  { %v1557_v14 = vpop.xlane.xlu0 %1556  ;;  %5123 = vmatpush3.msra.mxu0 %v1832_v5 }
 0x6fb   :  { %v1567_v26 = vmul.f32 0.03125, %v1557_v14  ;;  %v1584_v2 = vmul.f32 %v6676_v19, %v6676_v19  ;;  %5124 = vmatprep.subr.mxu0 %v5781_v0 }
 0x6fd   :  { %v6681_v6 = vsub.f32 %v6620_v32, %v1567_v26  ;;  %v1607_v12 = vsel %vm214_vm3, %v1584_v2, 0.0 }
 0x6fe   :  { %1608 = vadd.xlane.f32.xlu0 %v1607_v12 }
 0x6ff   :  { %v1585_v28 = vmul.f32 %v6681_v6, %v6681_v6 }
 0x701   :  { %v1610_v52 = vsel %vm214_vm3, %v1585_v28, 0.0 }
 0x702   :  { %1611 = vadd.xlane.f32.xlu1 %v1610_v52 }
 0x747   :  { %v1588_v30 = vpop.xlane.xlu1 %1587 }
 0x748   :  { %v1613_v25 = vmul.f32 0.03125, %v1588_v30 }
 0x74a   :  { %v1622_v54 = vadd.f32 1e-05, %v1613_v25 }
 0x74b   :  { %v1591_v32 = vpop.xlane.xlu0 %1590 }
 0x74c   :  { %5626 = vrsqrt.f32 %v1622_v54  ;;  %v1614_v35 = vmul.f32 0.03125, %v1591_v32 }
 0x74e   :  { %v1623_v37 = vadd.f32 1e-05, %v1614_v35 }
 0x74f   :  { %v1594_v42 = vpop.xlane.xlu1 %1593 }
 0x750   :  { %5628 = vrsqrt.f32 %v1623_v37  ;;  %v1615_v21 = vmul.f32 0.03125, %v1594_v42 }
 0x752   :  { %v1624_v34 = vadd.f32 1e-05, %v1615_v21 }
 0x753   :  { %v1597_v49 = vpop.xlane.xlu0 %1596 }
 0x754   :  { %5630 = vrsqrt.f32 %v1624_v34  ;;  %v1616_v39 = vmul.f32 0.03125, %v1597_v49 }
 0x756   :  { %v1625_v36 = vadd.f32 1e-05, %v1616_v39  ;;  %v1829_v39 = vld [vmem:[%s8058_s8] sm:$0xff] }
 0x757   :  { %v1600_v41 = vpop.xlane.xlu1 %1599 }
 0x758   :  { %5632 = vrsqrt.f32 %v1625_v36  ;;  %v1617_v4 = vmul.f32 0.03125, %v1600_v41  ;;  %v1681_v36 = vsub.s32 2, %v5997_v47 }
 0x759   :  { %v5627_v44 = vpop.eup %5626 }
 0x75a   :  { %v1640_v9 = vmul.f32 %v5627_v44, %v6624_v31  ;;  %v1626_v63 = vadd.f32 1e-05, %v1617_v4  ;;  %v1682_v41 = vrot.slane %v6595_v45, %v1681_v36 }
 0x75b   :  { %v1603_v13 = vpop.xlane.xlu0 %1602 }
 0x75c   :  { %v1653_v16 = vmul.f32 %v6712_v61, %v1640_v9  ;;  %5634 = vrsqrt.f32 %v1626_v63  ;;  %v1618_v62 = vmul.f32 0.03125, %v1603_v13 }
 0x75d   :  { %v5629_v23 = vpop.eup %5628 }
 0x75e   :  { %v1627_v20 = vadd.f32 1e-05, %v1618_v62  ;;  %v6722_v18 = vadd.f32 %v6718_v11, %v1653_v16  ;;  %v1641_v17 = vmul.f32 %v5629_v23, %v6628_v56 }
 0x75f   :  { %v1606_v53 = vpop.xlane.xlu1 %1605 }
 0x760   :  { %5636 = vrsqrt.f32 %v1627_v20  ;;  %v1619_v31 = vmul.f32 0.03125, %v1606_v53  ;;  %5088 = vmatmul.mubr.msk.f32.vlgmr.msra.gmra.mxu1 %vm214_vm3, %v6722_v18  ;;  %v1654_v58 = vmul.f32 %v6712_v61, %v1641_v17 }
 0x761   :  { %v5631_v60 = vpop.eup %5630  ;;  %5090 = vmatprep.mubr.msk.f32.mxu1 %vm5782_vm1, %v5781_v0 }
 0x762   :  { %v1628_v57 = vadd.f32 1e-05, %v1619_v31  ;;  %v6731_v15 = vadd.f32 %v6718_v11, %v1654_v58  ;;  %v1642_v33 = vmul.f32 %v5631_v60, %v6633_v46 }
 0x764   :  { %5638 = vrsqrt.f32 %v1628_v57  ;;  %5091 = vmatmul.mubr.msk.f32.gmra.mxu1 %vm214_vm3, %v6731_v15  ;;  %v1655_v56 = vmul.f32 %v6712_v61, %v1642_v33 }
 0x765   :  { %v5633_v8 = vpop.eup %5632  ;;  %5093 = vmatprep.mubr.msk.f32.mxu1 %vm5782_vm1, %v5781_v0 }
 0x766   :  { %v6740_v24 = vadd.f32 %v6718_v11, %v1655_v56  ;;  %v1643_v7 = vmul.f32 %v5633_v8, %v6638_v3 }
 0x768   :  { %5094 = vmatmul.mubr.msk.f32.gmra.mxu1 %vm214_vm3, %v6740_v24  ;;  %v1656_v46 = vmul.f32 %v6712_v61, %v1643_v7 }
 0x769   :  { %v5635_v10 = vpop.eup %5634  ;;  %5096 = vmatprep.mubr.msk.f32.mxu1 %vm5782_vm1, %v5781_v0 }
 0x76a   :  { %v6749_v38 = vadd.f32 %v6718_v11, %v1656_v46  ;;  %v1644_v14 = vmul.f32 %v5635_v10, %v6643_v51 }
 0x76c   :  { %5097 = vmatmul.mubr.msk.f32.gmra.mxu1 %vm214_vm3, %v6749_v38  ;;  %v1657_v26 = vmul.f32 %v6712_v61, %v1644_v14 }
 0x76d   :  { %v5637_v3 = vpop.eup %5636  ;;  %5099 = vmatprep.mubr.msk.f32.mxu1 %vm5782_vm1, %v5781_v0 }
 0x76e   :  { %v6758_v2 = vadd.f32 %v6718_v11, %v1657_v26  ;;  %v1645_v12 = vmul.f32 %v5637_v3, %v6648_v1 }
 0x770   :  { %5100 = vmatmul.mubr.msk.f32.gmra.mxu1 %vm214_vm3, %v6758_v2  ;;  %v1658_v28 = vmul.f32 %v6712_v61, %v1645_v12 }
 0x771   :  { %v5639_v51 = vpop.eup %5638  ;;  %5102 = vmatprep.mubr.msk.f32.mxu1 %vm5782_vm1, %v5781_v0 }
 0x772   :  { %v6767_v52 = vadd.f32 %v6718_v11, %v1658_v28  ;;  %v1646_v29 = vmul.f32 %v5639_v51, %v6653_v22 }
 0x774   :  { %5103 = vmatmul.mubr.msk.f32.gmra.mxu1 %vm214_vm3, %v6767_v52  ;;  %v1659_v55 = vmul.f32 %v6712_v61, %v1646_v29 }
 0x775   :  { %5105 = vmatprep.mubr.msk.f32.mxu1 %vm5782_vm1, %v5781_v0 }
 0x776   :  { %v6776_v1 = vadd.f32 %v6718_v11, %v1659_v55 }
 0x778   :  { %5106 = vmatmul.mubr.msk.f32.gmra.mxu1 %vm214_vm3, %v6776_v1 }
 0x779   :  { %5108 = vmatprep.mubr.msk.f32.mxu1 %vm5782_vm1, %v5781_v0 }
 0x787   :  { %v1609_v40 = vpop.xlane.xlu0 %1608 }
 0x788   :  { %v1620_v27 = vmul.f32 0.03125, %v1609_v40 }
 0x78a   :  { %v1629_v22 = vadd.f32 1e-05, %v1620_v27 }
 0x78b   :  { %v1612_v5 = vpop.xlane.xlu1 %1611 }
 0x78c   :  { %5640 = vrsqrt.f32 %v1629_v22  ;;  %v1621_v30 = vmul.f32 0.03125, %v1612_v5 }
 0x78e   :  { %v1630_v25 = vadd.f32 1e-05, %v1621_v30 }
 0x790   :  { %5642 = vrsqrt.f32 %v1630_v25  ;;  %v1839_v25 = vsub.s32 3, %v5997_v47 }
 0x799   :  { %v5641_v54 = vpop.eup %5640 }
 0x79a   :  { %v1647_v32 = vmul.f32 %v5641_v54, %v6676_v19  ;;  %v1831_v19 = vld [vmem:[%s8058_s8 + $0x10] sm:$0xff]  ;;  %v1840_v54 = vrot.slane %v6595_v45, %v1839_v25 }
 0x79b   :  { %5125 = vmatpush3.msra.mxu0 %v1831_v19 }
 0x79c   :  { %v1660_v35 = vmul.f32 %v6712_v61, %v1647_v32  ;;  %5126 = vmatprep.subr.mxu0 %v5781_v0 }
 0x79d   :  { %v5643_v37 = vpop.eup %5642 }
 0x79e   :  { %v6785_v42 = vadd.f32 %v6718_v11, %v1660_v35  ;;  %v1648_v21 = vmul.f32 %v5643_v37, %v6681_v6  ;;  %v1830_v6 = vld [vmem:[%s8058_s8 + $0x8] sm:$0xff] }
 0x79f   :  { %5127 = vmatpush3.msra.mxu0 %v1830_v6 }
 0x7a0   :  { %5109 = vmatmul.mubr.msk.f32.gmra.mxu1 %vm214_vm3, %v6785_v42  ;;  %v1661_v34 = vmul.f32 %v6712_v61, %v1648_v21  ;;  %5128 = vmatprep.subr.mxu0 %v5781_v0 }
 0x7a1   :  { %5111 = vmatprep.mubr.msk.f32.mxu1 %vm5782_vm1, %v5781_v0  ;;  %5129 = vmatpush3.msra.mxu0 %v1829_v39 }
 0x7a2   :  { %v6797_v49 = vadd.f32 %v6718_v11, %v1661_v34  ;;  %5192 = vmatprep.subr.mxu0 %v5781_v0 }
 0x7a4   :  { %5112 = vmatmul.mubr.msk.f32.gmra.mxu1 %vm214_vm3, %v6797_v49 }
 0x7a5   :  { %5165 = vmatprep.mubr.msk.f32.mxu1 %vm5782_vm1, %v5781_v0 }
 0x820   :  { %v1776_v61 = vpop.f32.mrf.mxu1 }
 0x821   :  { %v1777_v4 = vadd.f32 %v1776_v61, %v1682_v41 }
 0x822   :  { %v5089_v44 = vpop.f32.mrf.mxu1 }
 0x823   :  { %v1820_v9 = vmax.f32 %v1777_v4, 0.0 }
 0x824   :  { %v1781_v63 = vpop.f32.mrf.mxu1 }
 0x825   :  { %v1782_v11 = vadd.f32 %v1781_v63, %v1682_v41  ;;  %5131 = vmatmul.mubr.msk.f32.vlgmr.msra.gmra.mxu0 %vm1841_vm6, %v1820_v9 }
 0x826   :  { %v5092_v13 = vpop.f32.mrf.mxu1  ;;  %5133 = vmatprep.mubr.msk.f32.mxu0 %vm5782_vm1, %v5781_v0 }
 0x827   :  { %v1821_v16 = vmax.f32 %v1782_v11, 0.0 }
 0x828   :  { %v1786_v62 = vpop.f32.mrf.mxu1 }
 0x829   :  { %v1787_v23 = vadd.f32 %v1786_v62, %v1682_v41  ;;  %5134 = vmatmul.mubr.msk.f32.gmra.mxu0 %vm1841_vm6, %v1821_v16 }
 0x82a   :  { %v5095_v20 = vpop.f32.mrf.mxu1  ;;  %5136 = vmatprep.mubr.msk.f32.mxu0 %vm5782_vm1, %v5781_v0 }
 0x82b   :  { %v1822_v17 = vmax.f32 %v1787_v23, 0.0 }
 0x82c   :  { %v1791_v53 = vpop.f32.mrf.mxu1 }
 0x82d   :  { %v1792_v31 = vadd.f32 %v1791_v53, %v1682_v41  ;;  %5137 = vmatmul.mubr.msk.f32.gmra.mxu0 %vm1841_vm6, %v1822_v17 }
 0x82e   :  { %v5098_v58 = vpop.f32.mrf.mxu1  ;;  %5139 = vmatprep.mubr.msk.f32.mxu0 %vm5782_vm1, %v5781_v0 }
 0x82f   :  { %v1823_v60 = vmax.f32 %v1792_v31, 0.0 }
 0x830   :  { %v1796_v57 = vpop.f32.mrf.mxu1 }
 0x831   :  { %v1797_v33 = vadd.f32 %v1796_v57, %v1682_v41  ;;  %5140 = vmatmul.mubr.msk.f32.gmra.mxu0 %vm1841_vm6, %v1823_v60 }
 0x832   :  { %v5101_v56 = vpop.f32.mrf.mxu1  ;;  %5142 = vmatprep.mubr.msk.f32.mxu0 %vm5782_vm1, %v5781_v0 }
 0x833   :  { %v1824_v8 = vmax.f32 %v1797_v33, 0.0 }
 0x834   :  { %v1801_v7 = vpop.f32.mrf.mxu1 }
 0x835   :  { %v1802_v46 = vadd.f32 %v1801_v7, %v1682_v41  ;;  %5143 = vmatmul.mubr.msk.f32.gmra.mxu0 %vm1841_vm6, %v1824_v8 }
 0x836   :  { %v5104_v10 = vpop.f32.mrf.mxu1  ;;  %5145 = vmatprep.mubr.msk.f32.mxu0 %vm5782_vm1, %v5781_v0 }
 0x837   :  { %v1825_v14 = vmax.f32 %v1802_v46, 0.0 }
 0x838   :  { %v1806_v26 = vpop.f32.mrf.mxu1 }
 0x839   :  { %v1807_v3 = vadd.f32 %v1806_v26, %v1682_v41  ;;  %5146 = vmatmul.mubr.msk.f32.gmra.mxu0 %vm1841_vm6, %v1825_v14 }
 0x83a   :  { %v5107_v12 = vpop.f32.mrf.mxu1  ;;  %5148 = vmatprep.mubr.msk.f32.mxu0 %vm5782_vm1, %v5781_v0 }
 0x83b   :  { %v1826_v28 = vmax.f32 %v1807_v3, 0.0 }
 0x83d   :  { %5149 = vmatmul.mubr.msk.f32.gmra.mxu0 %vm1841_vm6, %v1826_v28 }
 0x83e   :  { %5151 = vmatprep.mubr.msk.f32.mxu0 %vm5782_vm1, %v5781_v0 }
 0x860   :  { %v1811_v51 = vpop.f32.mrf.mxu1 }
 0x861   :  { %v1812_v29 = vadd.f32 %v1811_v51, %v1682_v41 }
 0x862   :  { %v5110_v55 = vpop.f32.mrf.mxu1 }
 0x863   :  { %v1827_v40 = vmax.f32 %v1812_v29, 0.0 }
 0x864   :  { %v1816_v27 = vpop.f32.mrf.mxu1 }
 0x865   :  { %v1817_v22 = vadd.f32 %v1816_v27, %v1682_v41  ;;  %5152 = vmatmul.mubr.msk.f32.gmra.mxu0 %vm1841_vm6, %v1827_v40 }
 0x866   :  { %v5113_v5 = vpop.f32.mrf.mxu1  ;;  %5154 = vmatprep.mubr.msk.f32.mxu0 %vm5782_vm1, %v5781_v0 }
 0x867   :  { %v1828_v30 = vmax.f32 %v1817_v22, 0.0 }
 0x869   :  { %5155 = vmatmul.mubr.msk.f32.gmra.mxu0 %vm1841_vm6, %v1828_v30 }
 0x86a   :  { %5210 = vmatprep.mubr.msk.f32.mxu0 %vm5782_vm1, %v5781_v0 }
 0x8e5   :  { %v1935_v32 = vpop.f32.mrf.mxu0 }
 0x8e6   :  { %v1936_v35 = vadd.f32 %v1935_v32, %v1840_v54 }
 0x8e7   :  { %v5132_v37 = vpop.f32.mrf.mxu0 }
 0x8e8   :  { %v1979_v21 = vadd.f32 %v1936_v35, %v6722_v18 }
 0x8e9   :  { %v1940_v34 = vpop.f32.mrf.mxu0 }
 0x8ea   :  { %v1941_v19 = vadd.f32 %v1940_v34, %v1840_v54  ;;  %v1988_v6 = vsel %vm214_vm3, %v1979_v21, 0.0 }
 0x8eb   :  { %1989 = vadd.xlane.f32.xlu0 %v1988_v6  ;;  %v5135_v39 = vpop.f32.mrf.mxu0 }
 0x8ec   :  { %v1980_v41 = vadd.f32 %v1941_v19, %v6731_v15 }
 0x8ed   :  { %v1945_v61 = vpop.f32.mrf.mxu0 }
 0x8ee   :  { %v1946_v4 = vadd.f32 %v1945_v61, %v1840_v54  ;;  %v1991_v44 = vsel %vm214_vm3, %v1980_v41, 0.0 }
 0x8ef   :  { %1992 = vadd.xlane.f32.xlu1 %v1991_v44  ;;  %v5138_v9 = vpop.f32.mrf.mxu0 }
 0x8f0   :  { %v1981_v63 = vadd.f32 %v1946_v4, %v6740_v24 }
 0x8f1   :  { %v1950_v11 = vpop.f32.mrf.mxu0 }
 0x8f2   :  { %v1951_v13 = vadd.f32 %v1950_v11, %v1840_v54  ;;  %v1994_v18 = vsel %vm214_vm3, %v1981_v63, 0.0 }
 0x8f3   :  { %1995 = vadd.xlane.f32.xlu0 %v1994_v18  ;;  %v5141_v16 = vpop.f32.mrf.mxu0 }
 0x8f4   :  { %v1982_v62 = vadd.f32 %v1951_v13, %v6749_v38 }
 0x8f5   :  { %v1955_v23 = vpop.f32.mrf.mxu0 }
 0x8f6   :  { %v1956_v20 = vadd.f32 %v1955_v23, %v1840_v54  ;;  %v1997_v15 = vsel %vm214_vm3, %v1982_v62, 0.0 }
 0x8f7   :  { %1998 = vadd.xlane.f32.xlu1 %v1997_v15  ;;  %v5144_v17 = vpop.f32.mrf.mxu0 }
 0x8f8   :  { %v1983_v53 = vadd.f32 %v1956_v20, %v6758_v2 }
 0x8f9   :  { %v1960_v31 = vpop.f32.mrf.mxu0 }
 0x8fa   :  { %v1961_v58 = vadd.f32 %v1960_v31, %v1840_v54  ;;  %v2000_v24 = vsel %vm214_vm3, %v1983_v53, 0.0 }
 0x8fb   :  { %2001 = vadd.xlane.f32.xlu0 %v2000_v24  ;;  %v5147_v60 = vpop.f32.mrf.mxu0  ;;  %v4338_v24 = vld [vmem:[%s8052_s5 + $0x30] sm:$0xff] }
 0x8fc   :  { %v1984_v57 = vadd.f32 %v1961_v58, %v6767_v52  ;;  %v4339_v58 = vld [vmem:[%s8052_s5 + $0x38] sm:$0xff]  ;;  %v4337_v60 = vld [vmem:[%s8052_s5 + $0x28] sm:$0xff] }
 0x8fd   :  { %v1965_v33 = vpop.f32.mrf.mxu0  ;;  %5158 = vmatpush3.msra.mxu1 %v4339_v58 }
 0x8fe   :  { %v1966_v56 = vadd.f32 %v1965_v33, %v1840_v54  ;;  %v2003_v38 = vsel %vm214_vm3, %v1984_v57, 0.0  ;;  %5159 = vmatprep.subr.mxu1 %v5781_v0 }
 0x8ff   :  { %2004 = vadd.xlane.f32.xlu1 %v2003_v38  ;;  %v5150_v8 = vpop.f32.mrf.mxu0  ;;  %5160 = vmatpush3.msra.mxu1 %v4338_v24 }
 0x900   :  { %v1985_v7 = vadd.f32 %v1966_v56, %v6776_v1  ;;  %5161 = vmatprep.subr.mxu1 %v5781_v0 }
 0x901   :  { %5162 = vmatpush3.msra.mxu1 %v4337_v60 }
 0x902   :  { %v2006_v46 = vsel %vm214_vm3, %v1985_v7, 0.0  ;;  %5163 = vmatprep.subr.mxu1 %v5781_v0 }
 0x903   :  { %2007 = vadd.xlane.f32.xlu0 %v2006_v46 }
 0x925   :  { %v1970_v2 = vpop.f32.mrf.mxu0 }
 0x926   :  { %v1971_v10 = vadd.f32 %v1970_v2, %v1840_v54 }
 0x927   :  { %v5153_v14 = vpop.f32.mrf.mxu0 }
 0x928   :  { %v6862_v26 = vadd.f32 %v1971_v10, %v6785_v42 }
 0x929   :  { %v1975_v3 = vpop.f32.mrf.mxu0 }
 0x92a   :  { %v1976_v12 = vadd.f32 %v1975_v3, %v1840_v54  ;;  %v2009_v52 = vsel %vm214_vm3, %v6862_v26, 0.0 }
 0x92b   :  { %2010 = vadd.xlane.f32.xlu1 %v2009_v52  ;;  %v5156_v28 = vpop.f32.mrf.mxu0 }
 0x92c   :  { %v6867_v51 = vadd.f32 %v1976_v12, %v6797_v49 }
 0x92e   :  { %v2012_v1 = vsel %vm214_vm3, %v6867_v51, 0.0 }
 0x92f   :  { %2013 = vadd.xlane.f32.xlu0 %v2012_v1 }
 0x974   :  { %v1990_v29 = vpop.xlane.xlu0 %1989 }
 0x975   :  { %v2015_v55 = vmul.f32 0.03125, %v1990_v29 }
 0x977   :  { %v6871_v40 = vsub.f32 %v1979_v21, %v2015_v55 }
 0x978   :  { %v1993_v42 = vpop.xlane.xlu1 %1992 }
 0x979   :  { %v2016_v27 = vmul.f32 0.03125, %v1993_v42  ;;  %v2033_v22 = vmul.f32 %v6871_v40, %v6871_v40 }
 0x97b   :  { %v6875_v5 = vsub.f32 %v1980_v41, %v2016_v27  ;;  %v2042_v30 = vsel %vm214_vm3, %v2033_v22, 0.0  ;;  %v2107_v22 = vsub.s32 6, %v5997_v47 }
 0x97c   :  { %v1996_v54 = vpop.xlane.xlu0 %1995  ;;  %2043 = vadd.xlane.f32.xlu1 %v2042_v30 }
 0x97d   :  { %v2017_v49 = vmul.f32 0.03125, %v1996_v54  ;;  %v2034_v32 = vmul.f32 %v6875_v5, %v6875_v5 }
 0x97f   :  { %v6880_v35 = vsub.f32 %v1981_v63, %v2017_v49  ;;  %v2045_v37 = vsel %vm214_vm3, %v2034_v32, 0.0  ;;  %v2120_v49 = vsub.s32 7, %v5997_v47 }
 0x980   :  { %v1999_v21 = vpop.xlane.xlu1 %1998  ;;  %2046 = vadd.xlane.f32.xlu0 %v2045_v37  ;;  %v6939_v37 = vrot.slane %v6595_v45, %v2107_v22 }
 0x981   :  { %v2018_v34 = vmul.f32 0.03125, %v1999_v21  ;;  %v2035_v19 = vmul.f32 %v6880_v35, %v6880_v35 }
 0x983   :  { %v6885_v6 = vsub.f32 %v1982_v62, %v2018_v34  ;;  %v2048_v39 = vsel %vm214_vm3, %v2035_v19, 0.0 }
 0x984   :  { %v2002_v41 = vpop.xlane.xlu0 %2001  ;;  %2049 = vadd.xlane.f32.xlu1 %v2048_v39 }
 0x985   :  { %v2019_v61 = vmul.f32 0.03125, %v2002_v41  ;;  %v2036_v4 = vmul.f32 %v6885_v6, %v6885_v6  ;;  %v6945_v41 = vrot.slane %v6595_v45, %v2120_v49 }
 0x987   :  { %v6890_v44 = vsub.f32 %v1983_v53, %v2019_v61  ;;  %v2051_v9 = vsel %vm214_vm3, %v2036_v4, 0.0 }
 0x988   :  { %v2005_v63 = vpop.xlane.xlu1 %2004  ;;  %2052 = vadd.xlane.f32.xlu0 %v2051_v9 }
 0x989   :  { %v2020_v11 = vmul.f32 0.03125, %v2005_v63  ;;  %v2037_v13 = vmul.f32 %v6890_v44, %v6890_v44 }
 0x98b   :  { %v6895_v18 = vsub.f32 %v1984_v57, %v2020_v11  ;;  %v2054_v16 = vsel %vm214_vm3, %v2037_v13, 0.0  ;;  %v4336_v57 = vld [vmem:[%s8052_s5 + $0x20] sm:$0xff] }
 0x98c   :  { %v2008_v62 = vpop.xlane.xlu0 %2007  ;;  %2055 = vadd.xlane.f32.xlu1 %v2054_v16  ;;  %5164 = vmatpush3.msra.mxu1 %v4336_v57 }
 0x98d   :  { %v2021_v23 = vmul.f32 0.03125, %v2008_v62  ;;  %v2038_v20 = vmul.f32 %v6895_v18, %v6895_v18  ;;  %5237 = vmatprep.subr.mxu1 %v5781_v0 }
 0x98f   :  { %v6900_v15 = vsub.f32 %v1985_v7, %v2021_v23  ;;  %v2057_v17 = vsel %vm214_vm3, %v2038_v20, 0.0 }
 0x990   :  { %2058 = vadd.xlane.f32.xlu0 %v2057_v17 }
 0x991   :  { %v2039_v53 = vmul.f32 %v6900_v15, %v6900_v15 }
 0x993   :  { %v2060_v31 = vsel %vm214_vm3, %v2039_v53, 0.0 }
 0x994   :  { %2061 = vadd.xlane.f32.xlu1 %v2060_v31 }
 0x9b4   :  { %v2011_v33 = vpop.xlane.xlu1 %2010 }
 0x9b5   :  { %v2022_v56 = vmul.f32 0.03125, %v2011_v33 }
 0x9b7   :  { %v6923_v38 = vsub.f32 %v6862_v26, %v2022_v56 }
 0x9b8   :  { %v2014_v8 = vpop.xlane.xlu0 %2013 }
 0x9b9   :  { %v2023_v7 = vmul.f32 0.03125, %v2014_v8  ;;  %v2040_v46 = vmul.f32 %v6923_v38, %v6923_v38 }
 0x9bb   :  { %v6928_v2 = vsub.f32 %v6867_v51, %v2023_v7  ;;  %v2063_v10 = vsel %vm214_vm3, %v2040_v46, 0.0 }
 0x9bc   :  { %2064 = vadd.xlane.f32.xlu0 %v2063_v10 }
 0x9bd   :  { %v2041_v14 = vmul.f32 %v6928_v2, %v6928_v2 }
 0x9bf   :  { %v2066_v3 = vsel %vm214_vm3, %v2041_v14, 0.0 }
 0x9c0   :  { %2067 = vadd.xlane.f32.xlu1 %v2066_v3 }
 0xa05   :  { %v2044_v12 = vpop.xlane.xlu1 %2043 }
 0xa06   :  { %v2069_v26 = vmul.f32 0.03125, %v2044_v12 }
 0xa08   :  { %v2078_v52 = vadd.f32 1e-05, %v2069_v26 }
 0xa09   :  { %v2047_v28 = vpop.xlane.xlu0 %2046 }
 0xa0a   :  { %5644 = vrsqrt.f32 %v2078_v52  ;;  %v2070_v1 = vmul.f32 0.03125, %v2047_v28 }
 0xa0c   :  { %v2079_v29 = vadd.f32 1e-05, %v2070_v1 }
 0xa0d   :  { %v2050_v55 = vpop.xlane.xlu1 %2049 }
 0xa0e   :  { %5646 = vrsqrt.f32 %v2079_v29  ;;  %v2071_v51 = vmul.f32 0.03125, %v2050_v55 }
 0xa10   :  { %v2080_v42 = vadd.f32 1e-05, %v2071_v51 }
 0xa11   :  { %v2053_v27 = vpop.xlane.xlu0 %2052 }
 0xa12   :  { %5648 = vrsqrt.f32 %v2080_v42  ;;  %v2072_v30 = vmul.f32 0.03125, %v2053_v27 }
 0xa14   :  { %v2081_v54 = vadd.f32 1e-05, %v2072_v30 }
 0xa15   :  { %v2056_v32 = vpop.xlane.xlu1 %2055 }
 0xa16   :  { %5650 = vrsqrt.f32 %v2081_v54  ;;  %v2073_v21 = vmul.f32 0.03125, %v2056_v32 }
 0xa17   :  { %v5645_v34 = vpop.eup %5644 }
 0xa18   :  { %v2096_v19 = vmul.f32 %v5645_v34, %v6871_v40  ;;  %v2082_v39 = vadd.f32 1e-05, %v2073_v21 }
 0xa19   :  { %v2059_v61 = vpop.xlane.xlu0 %2058 }
 0xa1a   :  { %v2109_v4 = vmul.f32 %v6939_v37, %v2096_v19  ;;  %5652 = vrsqrt.f32 %v2082_v39  ;;  %v2074_v9 = vmul.f32 0.03125, %v2059_v61 }
 0xa1b   :  { %v5647_v63 = vpop.eup %5646 }
 0xa1c   :  { %v2083_v11 = vadd.f32 1e-05, %v2074_v9  ;;  %v6949_v13 = vadd.f32 %v6945_v41, %v2109_v4  ;;  %v2097_v16 = vmul.f32 %v5647_v63, %v6875_v5 }
 0xa1d   :  { %v2062_v62 = vpop.xlane.xlu1 %2061 }
 0xa1e   :  { %5654 = vrsqrt.f32 %v2083_v11  ;;  %v2075_v40 = vmul.f32 0.03125, %v2062_v62  ;;  %5166 = vmatmul.mubr.msk.f32.vlgmr.msra.gmra.mxu1 %vm214_vm3, %v6949_v13  ;;  %v2110_v45 = vmul.f32 %v6939_v37, %v2097_v16  ;;  %v4331_v62 = vld [vmem:[%s8054_s9 + $0x8] sm:$0xff] }
 0xa1f   :  { %v5649_v23 = vpop.eup %5648  ;;  %5168 = vmatprep.mubr.msk.f32.mxu1 %vm5782_vm1, %v5781_v0 }
 0xa20   :  { %v2084_v20 = vadd.f32 1e-05, %v2075_v40  ;;  %v6958_v17 = vadd.f32 %v6945_v41, %v2110_v45  ;;  %v2098_v53 = vmul.f32 %v5649_v23, %v6880_v35  ;;  %v2146_v40 = vrot.slane %v4331_v62, %v212_v50 }
 0xa22   :  { %5656 = vrsqrt.f32 %v2084_v20  ;;  %5169 = vmatmul.mubr.msk.f32.gmra.mxu1 %vm214_vm3, %v6958_v17  ;;  %v2111_v5 = vmul.f32 %v6939_v37, %v2098_v53 }
 0xa23   :  { %v5651_v31 = vpop.eup %5650  ;;  %5171 = vmatprep.mubr.msk.f32.mxu1 %vm5782_vm1, %v5781_v0 }
 0xa24   :  { %v6967_v58 = vadd.f32 %v6945_v41, %v2111_v5  ;;  %v2099_v24 = vmul.f32 %v5651_v31, %v6885_v6 }
 0xa26   :  { %5172 = vmatmul.mubr.msk.f32.gmra.mxu1 %vm214_vm3, %v6967_v58  ;;  %v2112_v35 = vmul.f32 %v6939_v37, %v2099_v24 }
 0xa27   :  { %v5653_v60 = vpop.eup %5652  ;;  %5174 = vmatprep.mubr.msk.f32.mxu1 %vm5782_vm1, %v5781_v0 }
 0xa28   :  { %v6976_v57 = vadd.f32 %v6945_v41, %v2112_v35  ;;  %v2100_v33 = vmul.f32 %v5653_v60, %v6890_v44 }
 0xa2a   :  { %5175 = vmatmul.mubr.msk.f32.gmra.mxu1 %vm214_vm3, %v6976_v57  ;;  %v2113_v56 = vmul.f32 %v6939_v37, %v2100_v33 }
 0xa2b   :  { %v5655_v6 = vpop.eup %5654  ;;  %5177 = vmatprep.mubr.msk.f32.mxu1 %vm5782_vm1, %v5781_v0 }
 0xa2c   :  { %v6985_v8 = vadd.f32 %v6945_v41, %v2113_v56  ;;  %v2101_v7 = vmul.f32 %v5655_v6, %v6895_v18 }
 0xa2e   :  { %5178 = vmatmul.mubr.msk.f32.gmra.mxu1 %vm214_vm3, %v6985_v8  ;;  %v2114_v46 = vmul.f32 %v6939_v37, %v2101_v7 }
 0xa2f   :  { %v5657_v44 = vpop.eup %5656  ;;  %5180 = vmatprep.mubr.msk.f32.mxu1 %vm5782_vm1, %v5781_v0 }
 0xa30   :  { %v6994_v10 = vadd.f32 %v6945_v41, %v2114_v46  ;;  %v2102_v14 = vmul.f32 %v5657_v44, %v6900_v15 }
 0xa32   :  { %5181 = vmatmul.mubr.msk.f32.gmra.mxu1 %vm214_vm3, %v6994_v10  ;;  %v2115_v3 = vmul.f32 %v6939_v37, %v2102_v14 }
 0xa33   :  { %5183 = vmatprep.mubr.msk.f32.mxu1 %vm5782_vm1, %v5781_v0 }
 0xa34   :  { %v7003_v18 = vadd.f32 %v6945_v41, %v2115_v3 }
 0xa36   :  { %5184 = vmatmul.mubr.msk.f32.gmra.mxu1 %vm214_vm3, %v7003_v18 }
 0xa37   :  { %5186 = vmatprep.mubr.msk.f32.mxu1 %vm5782_vm1, %v5781_v0 }
 0xa45   :  { %v2065_v12 = vpop.xlane.xlu0 %2064 }
 0xa46   :  { %v2076_v26 = vmul.f32 0.03125, %v2065_v12 }
 0xa48   :  { %v2085_v15 = vadd.f32 1e-05, %v2076_v26 }
 0xa49   :  { %v2068_v52 = vpop.xlane.xlu1 %2067 }
 0xa4a   :  { %5658 = vrsqrt.f32 %v2085_v15  ;;  %v2077_v28 = vmul.f32 0.03125, %v2068_v52 }
 0xa4c   :  { %v2086_v1 = vadd.f32 1e-05, %v2077_v28 }
 0xa4e   :  { %5660 = vrsqrt.f32 %v2086_v1 }
 0xa57   :  { %v5659_v29 = vpop.eup %5658 }
 0xa58   :  { %v2103_v55 = vmul.f32 %v5659_v29, %v6923_v38 }
 0xa5a   :  { %v2116_v51 = vmul.f32 %v6939_v37, %v2103_v55 }
 0xa5b   :  { %v5661_v42 = vpop.eup %5660 }
 0xa5c   :  { %v7012_v27 = vadd.f32 %v6945_v41, %v2116_v51  ;;  %v2104_v30 = vmul.f32 %v5661_v42, %v6928_v2 }
 0xa5e   :  { %5187 = vmatmul.mubr.msk.f32.gmra.mxu1 %vm214_vm3, %v7012_v27  ;;  %v2117_v54 = vmul.f32 %v6939_v37, %v2104_v30 }
 0xa5f   :  { %5189 = vmatprep.mubr.msk.f32.mxu1 %vm5782_vm1, %v5781_v0 }
 0xa60   :  { %v7021_v32 = vadd.f32 %v6945_v41, %v2117_v54 }
 0xa62   :  { %5190 = vmatmul.mubr.msk.f32.gmra.mxu1 %vm214_vm3, %v7021_v32 }
 0xa63   :  { %5255 = vmatprep.mubr.msk.f32.mxu1 %vm5782_vm1, %v5781_v0 }
 0xade   :  { %v2240_v38 = vpop.f32.mrf.mxu1 }
 0xadf   :  { %v7060_v56 = vadd.f32 %v2240_v38, %v2146_v40 }
 0xae0   :  { %v5167_v21 = vpop.f32.mrf.mxu1 }
 0xae2   :  { %v2245_v2 = vpop.f32.mrf.mxu1 }
 0xae3   :  { %v7062_v6 = vadd.f32 %v2245_v2, %v2146_v40 }
 0xae4   :  { %v5170_v34 = vpop.f32.mrf.mxu1 }
 0xae6   :  { %v2250_v19 = vpop.f32.mrf.mxu1 }
 0xae7   :  { %v7052_v60 = vadd.f32 %v2250_v19, %v2146_v40 }
 0xae8   :  { %v5173_v39 = vpop.f32.mrf.mxu1 }
 0xaea   :  { %v2255_v61 = vpop.f32.mrf.mxu1 }
 0xaeb   :  { %v7054_v33 = vadd.f32 %v2255_v61, %v2146_v40 }
 0xaec   :  { %v5176_v37 = vpop.f32.mrf.mxu1 }
 0xaee   :  { %v2260_v4 = vpop.f32.mrf.mxu1 }
 0xaef   :  { %v7044_v50 = vadd.f32 %v2260_v4, %v2146_v40 }
 0xaf0   :  { %v5179_v9 = vpop.f32.mrf.mxu1 }
 0xaf2   :  { %v2265_v63 = vpop.f32.mrf.mxu1 }
 0xaf3   :  { %v7046_v35 = vadd.f32 %v2265_v63, %v2146_v40 }
 0xaf4   :  { %v5182_v11 = vpop.f32.mrf.mxu1 }
 0xaf6   :  { %v2270_v41 = vpop.f32.mrf.mxu1 }
 0xaf7   :  { %v7036_v5 = vadd.f32 %v2270_v41, %v2146_v40 }
 0xaf8   :  { %v5185_v16 = vpop.f32.mrf.mxu1 }
 0xb1e   :  { %v2275_v45 = vpop.f32.mrf.mxu1 }
 0xb1f   :  { %v7032_v23 = vadd.f32 %v2275_v45, %v2146_v40 }
 0xb20   :  { %v5188_v20 = vpop.f32.mrf.mxu1 }
 0xb21   :  { %2307 = vrot.lane.b32.xlu1 %v7032_v23, %s5783_s11 }
 0xb22   :  { %v2280_v53 = vpop.f32.mrf.mxu1 }
 0xb23   :  { %v7038_v31 = vadd.f32 %v2280_v53, %v2146_v40 }
 0xb24   :  { %v5191_v24 = vpop.f32.mrf.mxu1 }
 0xb25   :  { %2305 = vrot.lane.b32.xlu1 %v7036_v5, %s5783_s11  ;;  %2309 = vrot.lane.b32.xlu0 %v7038_v31, %s5783_s11  ;;  %v7241_v24 = vld [vmem:[%s8055_s1] sm:$0xff] }
 0xb29   :  { %2301 = vrot.lane.b32.xlu1 %v7044_v50, %s5783_s11  ;;  %2303 = vrot.lane.b32.xlu0 %v7046_v35, %s5783_s11 }
 0xb2d   :  { %2297 = vrot.lane.b32.xlu1 %v7052_v60, %s5783_s11  ;;  %2299 = vrot.lane.b32.xlu0 %v7054_v33, %s5783_s11 }
 0xb31   :  { %2293 = vrot.lane.b32.xlu1 %v7060_v56, %s5783_s11  ;;  %2295 = vrot.lane.b32.xlu0 %v7062_v6, %s5783_s11 }
 0xb35   :  { %2752 = vrot.lane.b32.xlu1 %v7032_v23, %s5784_s12  ;;  %2754 = vrot.lane.b32.xlu0 %v7038_v31, %s5784_s12 }
 0xb39   :  { %2748 = vrot.lane.b32.xlu1 %v7046_v35, %s5784_s12  ;;  %2750 = vrot.lane.b32.xlu0 %v7036_v5, %s5784_s12 }
 0xb3d   :  { %2744 = vrot.lane.b32.xlu1 %v7054_v33, %s5784_s12  ;;  %2746 = vrot.lane.b32.xlu0 %v7044_v50, %s5784_s12 }
 0xb41   :  { %2740 = vrot.lane.b32.xlu1 %v7062_v6, %s5784_s12  ;;  %2742 = vrot.lane.b32.xlu0 %v7052_v60, %s5784_s12 }
 0xb45   :  { %2720 = vrot.lane.b32.xlu1 %v7060_v56, %s5785_s2  ;;  %2738 = vrot.lane.b32.xlu0 %v7060_v56, %s5784_s12 }
 0xb49   :  { %2724 = vrot.lane.b32.xlu1 %v7052_v60, %s5785_s2  ;;  %2722 = vrot.lane.b32.xlu0 %v7062_v6, %s5785_s2 }
 0xb4d   :  { %2728 = vrot.lane.b32.xlu1 %v7044_v50, %s5785_s2  ;;  %2726 = vrot.lane.b32.xlu0 %v7054_v33, %s5785_s2 }
 0xb51   :  { %2732 = vrot.lane.b32.xlu1 %v7036_v5, %s5785_s2  ;;  %2730 = vrot.lane.b32.xlu0 %v7046_v35, %s5785_s2 }
 0xb55   :  { %2736 = vrot.lane.b32.xlu1 %v7038_v31, %s5785_s2  ;;  %2734 = vrot.lane.b32.xlu0 %v7032_v23, %s5785_s2 }
 0xb59   :  { %2570 = vrot.lane.b32.xlu1 %v7032_v23, %s5786_s13  ;;  %2568 = vrot.lane.b32.xlu0 %v7036_v5, %s5786_s13 }
 0xb5d   :  { %2562 = vrot.lane.b32.xlu1 %v7054_v33, %s5786_s13  ;;  %2566 = vrot.lane.b32.xlu0 %v7046_v35, %s5786_s13 }
 0xb61   :  { %2564 = vrot.lane.b32.xlu0 %v7044_v50, %s5786_s13 }
 0xb65   :  { %2560 = vrot.lane.b32.xlu0 %v7052_v60, %s5786_s13 }
 0xb69   :  { %2558 = vrot.lane.b32.xlu0 %v7062_v6, %s5786_s13 }
 0xb6d   :  { %2556 = vrot.lane.b32.xlu0 %v7060_v56, %s5786_s13 }
 0xb71   :  { %2572 = vrot.lane.b32.xlu0 %v7038_v31, %s5786_s13 }
 0xb75   :  { %3017 = vrot.lane.b32.xlu0 %v7038_v31, %s5787_s14 }
 0xb93   :  { %v2308_v7 = vpop.permute.xlu1 %2307 }
 0xb97   :  { %v2306_v46 = vpop.permute.xlu1 %2305  ;;  %v2310_v44 = vpop.permute.xlu0 %2309 }
 0xb98   :  { %5193 = vmatpush3.xpose.msk.msra.mxu0 %vm379_vm4, %v2310_v44 }
 0xb99   :  { %5194 = vmatprep.subr.mxu0 %v5781_v0 }
 0xb9b   :  { %v2304_v14 = vpop.permute.xlu0 %2303  ;;  %v2302_v3 = vpop.permute.xlu1 %2301 }
 0xb9c   :  { %5195 = vmatpush3.xpose.msk.msra.mxu0 %vm379_vm4, %v2308_v7 }
 0xb9d   :  { %5196 = vmatprep.subr.mxu0 %v5781_v0 }
 0xb9f   :  { %v2300_v12 = vpop.permute.xlu0 %2299  ;;  %v2298_v26 = vpop.permute.xlu1 %2297 }
 0xba0   :  { %5197 = vmatpush3.xpose.msk.msra.mxu0 %vm379_vm4, %v2306_v46 }
 0xba1   :  { %5198 = vmatprep.subr.mxu0 %v5781_v0 }
 0xba3   :  { %v2296_v15 = vpop.permute.xlu0 %2295  ;;  %v2294_v28 = vpop.permute.xlu1 %2293 }
 0xba4   :  { %5199 = vmatpush3.xpose.msk.msra.mxu0 %vm379_vm4, %v2304_v14 }
 0xba5   :  { %5200 = vmatprep.subr.mxu0 %v5781_v0 }
 0xba7   :  { %v2755_v52 = vpop.permute.xlu0 %2754  ;;  %v2753_v29 = vpop.permute.xlu1 %2752 }
 0xba8   :  { %5201 = vmatpush3.xpose.msk.msra.mxu0 %vm379_vm4, %v2302_v3  ;;  %v7251_v3 = vld [vmem:[%s8055_s1 + $0x8] sm:$0xff] }
 0xba9   :  { %5202 = vmatprep.subr.mxu0 %v5781_v0 }
 0xbab   :  { %v2751_v1 = vpop.permute.xlu0 %2750  ;;  %v2749_v42 = vpop.permute.xlu1 %2748 }
 0xbac   :  { %5203 = vmatpush3.xpose.msk.msra.mxu0 %vm379_vm4, %v2300_v12 }
 0xbad   :  { %5204 = vmatprep.subr.mxu0 %v5781_v0 }
 0xbaf   :  { %v2747_v55 = vpop.permute.xlu0 %2746  ;;  %v2745_v54 = vpop.permute.xlu1 %2744 }
 0xbb0   :  { %5205 = vmatpush3.xpose.msk.msra.mxu0 %vm379_vm4, %v2298_v26 }
 0xbb1   :  { %5206 = vmatprep.subr.mxu0 %v5781_v0 }
 0xbb3   :  { %v2743_v51 = vpop.permute.xlu0 %2742  ;;  %v2741_v2 = vpop.permute.xlu1 %2740 }
 0xbb4   :  { %5207 = vmatpush3.xpose.msk.msra.mxu0 %vm379_vm4, %v2296_v15 }
 0xbb5   :  { %5208 = vmatprep.subr.mxu0 %v5781_v0 }
 0xbb7   :  { %v2739_v30 = vpop.permute.xlu0 %2738  ;;  %v2721_v19 = vpop.permute.xlu1 %2720 }
 0xbb8   :  { %5209 = vmatpush3.xpose.msk.msra.mxu0 %vm379_vm4, %v2294_v28  ;;  %v7261_v28 = vld [vmem:[%s8055_s1 + $0x10] sm:$0xff] }
 0xbb9   :  { %5282 = vmatprep.subr.mxu0 %v5781_v0 }
 0xbbb   :  { %5211 = vmatmul.mubr.msk.f32.vlgmr.msra.gmra.mxu0 %vm379_vm4, %v7060_v56  ;;  %v2723_v38 = vpop.permute.xlu0 %2722  ;;  %v2725_v37 = vpop.permute.xlu1 %2724 }
 0xbbc   :  { %5283 = vmatpush3.xpose.msk.msra.mxu0 %vm379_vm4, %v2755_v52  ;;  %5213 = vmatprep.mubr.msk.f32.mxu0 %vm5782_vm1, %v5781_v0 }
 0xbbd   :  { %5284 = vmatprep.subr.mxu0 %v5781_v0 }
 0xbbf   :  { %5214 = vmatmul.mubr.msk.f32.gmra.mxu0 %vm379_vm4, %v7062_v6  ;;  %v2727_v21 = vpop.permute.xlu0 %2726  ;;  %v2729_v9 = vpop.permute.xlu1 %2728 }
 0xbc0   :  { %5285 = vmatpush3.xpose.msk.msra.mxu0 %vm379_vm4, %v2753_v29  ;;  %5216 = vmatprep.mubr.msk.f32.mxu0 %vm5782_vm1, %v5781_v0 }
 0xbc1   :  { %5286 = vmatprep.subr.mxu0 %v5781_v0 }
 0xbc3   :  { %5217 = vmatmul.mubr.msk.f32.gmra.mxu0 %vm379_vm4, %v7052_v60  ;;  %v7156_v34 = vpop.permute.xlu0 %2730  ;;  %v2733_v41 = vpop.permute.xlu1 %2732 }
 0xbc4   :  { %5287 = vmatpush3.xpose.msk.msra.mxu0 %vm379_vm4, %v2751_v1  ;;  %5219 = vmatprep.mubr.msk.f32.mxu0 %vm5782_vm1, %v5781_v0 }
 0xbc5   :  { %5288 = vmatprep.subr.mxu0 %v5781_v0 }
 0xbc7   :  { %5220 = vmatmul.mubr.msk.f32.gmra.mxu0 %vm379_vm4, %v7054_v33  ;;  %v7164_v39 = vpop.permute.xlu0 %2734  ;;  %v2737_v62 = vpop.permute.xlu1 %2736 }
 0xbc8   :  { %5289 = vmatpush3.xpose.msk.msra.mxu0 %vm379_vm4, %v2749_v42  ;;  %5222 = vmatprep.mubr.msk.f32.mxu0 %vm5782_vm1, %v5781_v0  ;;  %v5774_v42 = vld [vmem:[%s8055_s1 + $0x18] sm:$0xff] }
 0xbc9   :  { %5290 = vmatprep.subr.mxu0 %v5781_v0 }
 0xbcb   :  { %5223 = vmatmul.mubr.msk.f32.gmra.mxu0 %vm379_vm4, %v7044_v50  ;;  %v2569_v61 = vpop.permute.xlu0 %2568  ;;  %v2571_v20 = vpop.permute.xlu1 %2570 }
 0xbcc   :  { %5291 = vmatpush3.xpose.msk.msra.mxu0 %vm379_vm4, %v2747_v55  ;;  %5225 = vmatprep.mubr.msk.f32.mxu0 %vm5782_vm1, %v5781_v0 }
 0xbcd   :  { %5292 = vmatprep.subr.mxu0 %v5781_v0 }
 0xbcf   :  { %5226 = vmatmul.mubr.msk.f32.gmra.mxu0 %vm379_vm4, %v7046_v35  ;;  %v2567_v4 = vpop.permute.xlu0 %2566  ;;  %v2563_v53 = vpop.permute.xlu1 %2562 }
 0xbd0   :  { %5293 = vmatpush3.xpose.msk.msra.mxu0 %vm379_vm4, %v2745_v54  ;;  %5228 = vmatprep.mubr.msk.f32.mxu0 %vm5782_vm1, %v5781_v0 }
 0xbd1   :  { %5294 = vmatprep.subr.mxu0 %v5781_v0 }
 0xbd3   :  { %5229 = vmatmul.mubr.msk.f32.gmra.mxu0 %vm379_vm4, %v7036_v5  ;;  %v2565_v63 = vpop.permute.xlu0 %2564 }
 0xbd4   :  { %5295 = vmatpush3.xpose.msk.msra.mxu0 %vm379_vm4, %v2743_v51  ;;  %5231 = vmatprep.mubr.msk.f32.mxu0 %vm5782_vm1, %v5781_v0 }
 0xbd5   :  { %5296 = vmatprep.subr.mxu0 %v5781_v0 }
 0xbd7   :  { %5232 = vmatmul.mubr.msk.f32.gmra.mxu0 %vm379_vm4, %v7032_v23  ;;  %v2561_v11 = vpop.permute.xlu0 %2560 }
 0xbd8   :  { %5297 = vmatpush3.xpose.msk.msra.mxu0 %vm379_vm4, %v2741_v2  ;;  %5234 = vmatprep.mubr.msk.f32.mxu0 %vm5782_vm1, %v5781_v0  ;;  %v5775_v2 = vld [vmem:[%s8055_s1 + $0x20] sm:$0xff] }
 0xbd9   :  { %5298 = vmatprep.subr.mxu0 %v5781_v0 }
 0xbdb   :  { %5235 = vmatmul.mubr.msk.f32.gmra.mxu0 %vm379_vm4, %v7038_v31  ;;  %v2559_v16 = vpop.permute.xlu0 %2558 }
 0xbdc   :  { %5299 = vmatpush3.xpose.msk.msra.mxu0 %vm379_vm4, %v2739_v30  ;;  %5300 = vmatprep.mubr.msk.f32.mxu0 %vm5782_vm1, %v5781_v0 }
 0xbdd   :  { %5372 = vmatprep.subr.mxu0 %v5781_v0 }
 0xbdf   :  { %5301 = vmatmul.mubr.msk.f32.vlgmr.msra.gmra.mxu0 %vm379_vm4, %v2721_v19  ;;  %v2557_v40 = vpop.permute.xlu0 %2556 }
 0xbe0   :  { %5303 = vmatprep.mubr.msk.f32.mxu0 %vm5782_vm1, %v5781_v0 }
 0xbe3   :  { %5304 = vmatmul.mubr.msk.f32.gmra.mxu0 %vm379_vm4, %v2723_v38  ;;  %v2573_v45 = vpop.permute.xlu0 %2572 }
 0xbe4   :  { %5238 = vmatpush3.msra.mxu1 %v2573_v45  ;;  %5306 = vmatprep.mubr.msk.f32.mxu0 %vm5782_vm1, %v5781_v0 }
 0xbe5   :  { %5239 = vmatprep.subr.mxu1 %v5781_v0 }
 0xbe6   :  { %5240 = vmatpush3.msra.mxu1 %v2571_v20  ;;  %v5778_v20 = vld [vmem:[%s8055_s1 + $0x38] sm:$0xff] }
 0xbe7   :  { %5241 = vmatprep.subr.mxu1 %v5781_v0  ;;  %5307 = vmatmul.mubr.msk.f32.gmra.mxu0 %vm379_vm4, %v2725_v37  ;;  %v5776_v37 = vld [vmem:[%s8055_s1 + $0x28] sm:$0xff] }
 0xbe8   :  { %5242 = vmatpush3.msra.mxu1 %v2569_v61  ;;  %5309 = vmatprep.mubr.msk.f32.mxu0 %vm5782_vm1, %v5781_v0 }
 0xbe9   :  { %5243 = vmatprep.subr.mxu1 %v5781_v0 }
 0xbea   :  { %5244 = vmatpush3.msra.mxu1 %v2567_v4 }
 0xbeb   :  { %5245 = vmatprep.subr.mxu1 %v5781_v0  ;;  %5310 = vmatmul.mubr.msk.f32.gmra.mxu0 %vm379_vm4, %v2727_v21 }
 0xbec   :  { %5246 = vmatpush3.msra.mxu1 %v2565_v63  ;;  %5312 = vmatprep.mubr.msk.f32.mxu0 %vm5782_vm1, %v5781_v0 }
 0xbed   :  { %5247 = vmatprep.subr.mxu1 %v5781_v0 }
 0xbee   :  { %5248 = vmatpush3.msra.mxu1 %v2563_v53 }
 0xbef   :  { %5249 = vmatprep.subr.mxu1 %v5781_v0  ;;  %5313 = vmatmul.mubr.msk.f32.gmra.mxu0 %vm379_vm4, %v2729_v9 }
 0xbf0   :  { %5250 = vmatpush3.msra.mxu1 %v2561_v11  ;;  %5315 = vmatprep.mubr.msk.f32.mxu0 %vm5782_vm1, %v5781_v0 }
 0xbf1   :  { %5251 = vmatprep.subr.mxu1 %v5781_v0 }
 0xbf2   :  { %5252 = vmatpush3.msra.mxu1 %v2559_v16 }
 0xbf3   :  { %5253 = vmatprep.subr.mxu1 %v5781_v0  ;;  %5316 = vmatmul.mubr.msk.f32.gmra.mxu0 %vm379_vm4, %v7156_v34 }
 0xbf4   :  { %5254 = vmatpush3.msra.mxu1 %v2557_v40  ;;  %5318 = vmatprep.mubr.msk.f32.mxu0 %vm5782_vm1, %v5781_v0 }
 0xbf5   :  { %5327 = vmatprep.subr.mxu1 %v5781_v0 }
 0xbf7   :  { %5319 = vmatmul.mubr.msk.f32.gmra.mxu0 %vm379_vm4, %v2733_v41  ;;  %v5777_v41 = vld [vmem:[%s8055_s1 + $0x30] sm:$0xff] }
 0xbf8   :  { %5321 = vmatprep.mubr.msk.f32.mxu0 %vm5782_vm1, %v5781_v0 }
 0xbfb   :  { %5322 = vmatmul.mubr.msk.f32.gmra.mxu0 %vm379_vm4, %v7164_v39 }
 0xbfc   :  { %5324 = vmatprep.mubr.msk.f32.mxu0 %vm5782_vm1, %v5781_v0 }
 0xbff   :  { %5325 = vmatmul.mubr.msk.f32.gmra.mxu0 %vm379_vm4, %v2737_v62 }
 0xc00   :  { %5376 = vmatprep.mubr.msk.f32.mxu0 %vm5782_vm1, %v5781_v0 }
 0xc7b   :  { %v2413_v31 = vpop.f32.mrf.mxu0 }
 0xc7c   :  { %v7244_v7 = vadd.f32 %v7241_v24, %v2413_v31 }
 0xc7d   :  { %v5212_v46 = vpop.f32.mrf.mxu0 }
 0xc7e   :  { %v2457_v44 = vsel %vm526_vm5, %v7244_v7, -inf }
 0xc7f   :  { %2458 = vmax.xlane.f32.xlu0 %v2457_v44  ;;  %v2418_v14 = vpop.f32.mrf.mxu0 }
 0xc80   :  { %v7254_v12 = vadd.f32 %v7251_v3, %v2418_v14  ;;  %v5779_v14 = vld [vmem:[%s8055_s1 + $0x40] sm:$0xff] }
 0xc81   :  { %v5215_v26 = vpop.f32.mrf.mxu0 }
 0xc82   :  { %v2460_v15 = vsel %vm526_vm5, %v7254_v12, -inf }
 0xc83   :  { %2461 = vmax.xlane.f32.xlu1 %v2460_v15  ;;  %v2423_v52 = vpop.f32.mrf.mxu0 }
 0xc84   :  { %v7264_v1 = vadd.f32 %v7261_v28, %v2423_v52 }
 0xc85   :  { %v5218_v29 = vpop.f32.mrf.mxu0 }
 0xc86   :  { %v2463_v55 = vsel %vm526_vm5, %v7264_v1, -inf }
 0xc87   :  { %2464 = vmax.xlane.f32.xlu0 %v2463_v55  ;;  %v2428_v51 = vpop.f32.mrf.mxu0 }
 0xc88   :  { %v7271_v30 = vadd.f32 %v5774_v42, %v2428_v51 }
 0xc89   :  { %v5221_v54 = vpop.f32.mrf.mxu0 }
 0xc8a   :  { %v2466_v38 = vsel %vm526_vm5, %v7271_v30, -inf }
 0xc8b   :  { %2467 = vmax.xlane.f32.xlu0 %v2466_v38  ;;  %v2433_v21 = vpop.f32.mrf.mxu0 }
 0xc8c   :  { %v7278_v34 = vadd.f32 %v5775_v2, %v2433_v21 }
 0xc8d   :  { %v5224_v19 = vpop.f32.mrf.mxu0 }
 0xc8e   :  { %v2469_v39 = vsel %vm526_vm5, %v7278_v34, -inf }
 0xc8f   :  { %2470 = vmax.xlane.f32.xlu1 %v2469_v39  ;;  %v2438_v61 = vpop.f32.mrf.mxu0 }
 0xc90   :  { %v7285_v4 = vadd.f32 %v5776_v37, %v2438_v61 }
 0xc91   :  { %v5227_v9 = vpop.f32.mrf.mxu0 }
 0xc92   :  { %v2472_v63 = vsel %vm526_vm5, %v7285_v4, -inf }
 0xc93   :  { %2473 = vmax.xlane.f32.xlu0 %v2472_v63  ;;  %v2443_v11 = vpop.f32.mrf.mxu0 }
 0xc94   :  { %v7292_v16 = vadd.f32 %v5777_v41, %v2443_v11 }
 0xc95   :  { %v5230_v62 = vpop.f32.mrf.mxu0 }
 0xc96   :  { %v2475_v40 = vsel %vm526_vm5, %v7292_v16, -inf }
 0xc97   :  { %2476 = vmax.xlane.f32.xlu1 %v2475_v40  ;;  %v2448_v45 = vpop.f32.mrf.mxu0 }
 0xc98   :  { %v7299_v53 = vadd.f32 %v5778_v20, %v2448_v45 }
 0xc99   :  { %v5233_v31 = vpop.f32.mrf.mxu0 }
 0xc9a   :  { %v2478_v46 = vsel %vm526_vm5, %v7299_v53, -inf }
 0xc9b   :  { %2479 = vmax.xlane.f32.xlu0 %v2478_v46  ;;  %v2453_v44 = vpop.f32.mrf.mxu0 }
 0xc9c   :  { %v7306_v26 = vadd.f32 %v5779_v14, %v2453_v44 }
 0xc9d   :  { %v5236_v15 = vpop.f32.mrf.mxu0 }
 0xc9e   :  { %v2481_v52 = vsel %vm526_vm5, %v7306_v26, -inf }
 0xc9f   :  { %2482 = vmax.xlane.f32.xlu1 %v2481_v52  ;;  %v2858_v29 = vpop.f32.mrf.mxu0 }
 0xca1   :  { %v5302_v55 = vpop.f32.mrf.mxu0 }
 0xca3   :  { %v2863_v51 = vpop.f32.mrf.mxu0 }
 0xca5   :  { %v5305_v54 = vpop.f32.mrf.mxu0 }
 0xca7   :  { %v2868_v38 = vpop.f32.mrf.mxu0 }
 0xca8   :  { %v7329_v52 = vadd.f32 %v7261_v28, %v2868_v38 }
 0xca9   :  { %v5308_v21 = vpop.f32.mrf.mxu0 }
 0xcab   :  { %v2873_v19 = vpop.f32.mrf.mxu0 }
 0xcac   :  { %v7324_v15 = vadd.f32 %v5774_v42, %v2873_v19 }
 0xcad   :  { %v5311_v39 = vpop.f32.mrf.mxu0 }
 0xcaf   :  { %v2878_v61 = vpop.f32.mrf.mxu0 }
 0xcb0   :  { %3015 = vrot.lane.b32.xlu1 %v7032_v23, %s5787_s14  ;;  %v7319_v23 = vadd.f32 %v7251_v3, %v2863_v51  ;;  %v2911_v3 = vsel %vm526_vm5, %v7324_v15, -inf }
 0xcb1   :  { %3013 = vrot.lane.b32.xlu0 %v7036_v5, %s5787_s14  ;;  %v5314_v9 = vpop.f32.mrf.mxu0  ;;  %v7322_v5 = vadd.f32 %v7241_v24, %v2858_v29  ;;  %v7337_v24 = vadd.f32 %v5775_v2, %v2878_v61  ;;  %v2908_v29 = vsel %vm526_vm5, %v7329_v52, -inf }
 0xcb3   :  { %v2883_v63 = vpop.f32.mrf.mxu0  ;;  %v2902_v55 = vsel %vm526_vm5, %v7322_v5, -inf  ;;  %v2914_v51 = vsel %vm526_vm5, %v7337_v24, -inf }
 0xcb5   :  { %3011 = vrot.lane.b32.xlu0 %v7046_v35, %s5787_s14  ;;  %v5317_v11 = vpop.f32.mrf.mxu0  ;;  %v2905_v35 = vsel %vm526_vm5, %v7319_v23, -inf }
 0xcb7   :  { %v2888_v62 = vpop.f32.mrf.mxu0 }
 0xcb9   :  { %3009 = vrot.lane.b32.xlu0 %v7044_v50, %s5787_s14  ;;  %v5320_v40 = vpop.f32.mrf.mxu0  ;;  %v7331_v50 = vadd.f32 %v5776_v37, %v2883_v63  ;;  %v7345_v37 = vadd.f32 %v5777_v41, %v2888_v62  ;;  %v7357_v41 = vpop.permute.xlu0 %3017 }
 0xcbb   :  { %v2893_v45 = vpop.f32.mrf.mxu0  ;;  %v2917_v28 = vsel %vm526_vm5, %v7331_v50, -inf }
 0xcbc   :  { %v7339_v42 = vadd.f32 %v5778_v20, %v2893_v45  ;;  %v2920_v20 = vsel %vm526_vm5, %v7345_v37, -inf }
 0xcbd   :  { %v5323_v31 = vpop.f32.mrf.mxu0 }
 0xcbe   :  { %v2923_v54 = vsel %vm526_vm5, %v7339_v42, -inf }
 0xcbf   :  { %v2898_v46 = vpop.f32.mrf.mxu0 }
 0xcc0   :  { %v7351_v2 = vadd.f32 %v5779_v14, %v2898_v46 }
 0xcc1   :  { %v5326_v44 = vpop.f32.mrf.mxu0 }
 0xcc2   :  { %v2926_v38 = vsel %vm526_vm5, %v7351_v2, -inf }
 0xcd4   :  { %2906 = vmax.xlane.f32.xlu1 %v2905_v35 }
 0xcd8   :  { %2903 = vmax.xlane.f32.xlu0 %v2902_v55  ;;  %2912 = vmax.xlane.f32.xlu1 %v2911_v3 }
 0xcdc   :  { %2909 = vmax.xlane.f32.xlu0 %v2908_v29  ;;  %2918 = vmax.xlane.f32.xlu1 %v2917_v28 }
 0xce0   :  { %2915 = vmax.xlane.f32.xlu0 %v2914_v51  ;;  %2924 = vmax.xlane.f32.xlu1 %v2923_v54 }
 0xce4   :  { %2921 = vmax.xlane.f32.xlu0 %v2920_v20 }
 0xce8   :  { %2927 = vmax.xlane.f32.xlu0 %v2926_v38 }
 0xd08   :  { %v2459_v21 = vpop.xlane.xlu0 %2458 }
 0xd09   :  { %v2484_v19 = vsub.f32 %v7244_v7, %v2459_v21 }
 0xd0b   :  { %v2493_v39 = vmul.f32 1.442695, %v2484_v19 }
 0xd0c   :  { %v2462_v61 = vpop.xlane.xlu1 %2461 }
 0xd0d   :  { %5662 = vpow2.f32 %v2493_v39  ;;  %v2485_v9 = vsub.f32 %v7254_v12, %v2462_v61 }
 0xd0f   :  { %v2495_v14 = vmul.f32 1.442695, %v2485_v9 }
 0xd10   :  { %v2465_v63 = vpop.xlane.xlu0 %2464 }
 0xd11   :  { %5664 = vpow2.f32 %v2495_v14  ;;  %v2486_v11 = vsub.f32 %v7264_v1, %v2465_v63 }
 0xd13   :  { %v2497_v62 = vmul.f32 1.442695, %v2486_v11 }
 0xd14   :  { %v2468_v40 = vpop.xlane.xlu0 %2467 }
 0xd15   :  { %5666 = vpow2.f32 %v2497_v62  ;;  %v2487_v45 = vsub.f32 %v7271_v30, %v2468_v40 }
 0xd17   :  { %v2499_v31 = vmul.f32 1.442695, %v2487_v45 }
 0xd18   :  { %v2471_v46 = vpop.xlane.xlu1 %2470 }
 0xd19   :  { %5668 = vpow2.f32 %v2499_v31  ;;  %v2488_v7 = vsub.f32 %v7278_v34, %v2471_v46 }
 0xd1a   :  { %v7364_v44 = vpop.eup %5662 }
 0xd1b   :  { %v2501_v35 = vmul.f32 1.442695, %v2488_v7  ;;  %v2511_v12 = vsel %vm526_vm5, %v7364_v44, 0.0 }
 0xd1c   :  { %v2474_v55 = vpop.xlane.xlu0 %2473  ;;  %2512 = vadd.xlane.f32.xlu1 %v2511_v12 }
 0xd1d   :  { %5670 = vpow2.f32 %v2501_v35  ;;  %v2489_v1 = vsub.f32 %v7285_v4, %v2474_v55 }
 0xd1e   :  { %v7369_v3 = vpop.eup %5664 }
 0xd1f   :  { %v2503_v29 = vmul.f32 1.442695, %v2489_v1  ;;  %v2514_v30 = vsel %vm526_vm5, %v7369_v3, 0.0 }
 0xd20   :  { %v2477_v28 = vpop.xlane.xlu1 %2476  ;;  %2515 = vadd.xlane.f32.xlu0 %v2514_v30 }
 0xd21   :  { %5672 = vpow2.f32 %v2503_v29  ;;  %v2490_v34 = vsub.f32 %v7292_v16, %v2477_v28 }
 0xd22   :  { %v7374_v51 = vpop.eup %5666 }
 0xd23   :  { %v2505_v54 = vmul.f32 1.442695, %v2490_v34  ;;  %v2517_v20 = vsel %vm526_vm5, %v7374_v51, 0.0 }
 0xd24   :  { %v2480_v38 = vpop.xlane.xlu0 %2479  ;;  %2518 = vadd.xlane.f32.xlu1 %v2517_v20 }
 0xd25   :  { %5674 = vpow2.f32 %v2505_v54  ;;  %v2491_v4 = vsub.f32 %v7299_v53, %v2480_v38 }
 0xd26   :  { %v7379_v21 = vpop.eup %5668 }
 0xd27   :  { %v2507_v19 = vmul.f32 1.442695, %v2491_v4  ;;  %v2520_v39 = vsel %vm526_vm5, %v7379_v21, 0.0 }
 0xd28   :  { %v2483_v61 = vpop.xlane.xlu1 %2482  ;;  %2521 = vadd.xlane.f32.xlu1 %v2520_v39  ;;  %v7406_v7 = vpop.permute.xlu0 %3013 }
 0xd29   :  { %5676 = vpow2.f32 %v2507_v19  ;;  %v2492_v16 = vsub.f32 %v7306_v26, %v2483_v61 }
 0xd2a   :  { %v7384_v9 = vpop.eup %5670 }
 0xd2b   :  { %v2509_v14 = vmul.f32 1.442695, %v2492_v16  ;;  %v2523_v63 = vsel %vm526_vm5, %v7384_v9, 0.0 }
 0xd2c   :  { %2524 = vadd.xlane.f32.xlu1 %v2523_v63  ;;  %v7408_v35 = vpop.permute.xlu0 %3011  ;;  %v7410_v12 = vpop.permute.xlu1 %3015 }
 0xd2d   :  { %5678 = vpow2.f32 %v2509_v14 }
 0xd2e   :  { %v7388_v53 = vpop.eup %5672 }
 0xd2f   :  { %v2526_v11 = vsel %vm526_vm5, %v7388_v53, 0.0 }
 0xd30   :  { %2527 = vadd.xlane.f32.xlu0 %v2526_v11  ;;  %v7412_v55 = vpop.permute.xlu0 %3009 }
 0xd32   :  { %v7392_v62 = vpop.eup %5674 }
 0xd33   :  { %v2529_v40 = vsel %vm526_vm5, %v7392_v62, 0.0 }
 0xd34   :  { %2530 = vadd.xlane.f32.xlu1 %v2529_v40 }
 0xd36   :  { %v7396_v26 = vpop.eup %5676 }
 0xd37   :  { %v2532_v45 = vsel %vm526_vm5, %v7396_v26, 0.0 }
 0xd38   :  { %2533 = vadd.xlane.f32.xlu0 %v2532_v45 }
 0xd3a   :  { %v7400_v31 = vpop.eup %5678 }
 0xd3b   :  { %v2535_v46 = vsel %vm526_vm5, %v7400_v31, 0.0 }
 0xd3c   :  { %2536 = vadd.xlane.f32.xlu1 %v2535_v46 }
 0xd4e   :  { %3005 = vrot.lane.b32.xlu0 %v7052_v60, %s5787_s14 }
 0xd5d   :  { %v2907_v1 = vpop.xlane.xlu1 %2906 }
 0xd5e   :  { %v2930_v29 = vsub.f32 %v7319_v23, %v2907_v1 }
 0xd60   :  { %v2940_v54 = vmul.f32 1.442695, %v2930_v29 }
 0xd61   :  { %v2904_v30 = vpop.xlane.xlu0 %2903  ;;  %v2913_v28 = vpop.xlane.xlu1 %2912 }
 0xd62   :  { %v2929_v34 = vsub.f32 %v7322_v5, %v2904_v30  ;;  %v2932_v39 = vsub.f32 %v7324_v15, %v2913_v28 }
 0xd64   :  { %v2938_v20 = vmul.f32 1.442695, %v2929_v34  ;;  %v2944_v23 = vmul.f32 1.442695, %v2932_v39 }
 0xd65   :  { %v2910_v38 = vpop.xlane.xlu0 %2909  ;;  %v2919_v4 = vpop.xlane.xlu1 %2918 }
 0xd66   :  { %5680 = vpow2.f32 %v2938_v20  ;;  %v2931_v60 = vsub.f32 %v7329_v52, %v2910_v38  ;;  %v2934_v19 = vsub.f32 %v7331_v50, %v2919_v4 }
 0xd67   :  { %5682 = vpow2.f32 %v2940_v54 }
 0xd68   :  { %v2942_v61 = vmul.f32 1.442695, %v2931_v60  ;;  %v2948_v16 = vmul.f32 1.442695, %v2934_v19 }
 0xd69   :  { %v2916_v14 = vpop.xlane.xlu0 %2915  ;;  %v2925_v34 = vpop.xlane.xlu1 %2924 }
 0xd6a   :  { %5684 = vpow2.f32 %v2948_v16  ;;  %v2933_v5 = vsub.f32 %v7337_v24, %v2916_v14  ;;  %v2936_v54 = vsub.f32 %v7339_v42, %v2925_v34 }
 0xd6b   :  { %5686 = vpow2.f32 %v2942_v61 }
 0xd6c   :  { %5688 = vpow2.f32 %v2944_v23  ;;  %v2946_v63 = vmul.f32 1.442695, %v2933_v5  ;;  %v2952_v38 = vmul.f32 1.442695, %v2936_v54 }
 0xd6d   :  { %v2922_v20 = vpop.xlane.xlu0 %2921 }
 0xd6e   :  { %5690 = vpow2.f32 %v2946_v63  ;;  %v2935_v4 = vsub.f32 %v7345_v37, %v2922_v20 }
 0xd6f   :  { %5692 = vpow2.f32 %v2952_v38 }
 0xd70   :  { %v2950_v19 = vmul.f32 1.442695, %v2935_v4 }
 0xd71   :  { %v2928_v60 = vpop.xlane.xlu0 %2927 }
 0xd72   :  { %v2937_v39 = vsub.f32 %v7351_v2, %v2928_v60 }
 0xd73   :  { %v7420_v11 = vpop.eup %5680 }
 0xd74   :  { %v2956_v52 = vsel %vm526_vm5, %v7420_v11, 0.0  ;;  %v7424_v50 = vpop.eup %5682 }
 0xd75   :  { %2957 = vadd.xlane.f32.xlu1 %v2956_v52  ;;  %v2959_v40 = vsel %vm526_vm5, %v7424_v50, 0.0 }
 0xd77   :  { %v7426_v15 = vpop.eup %5684 }
 0xd78   :  { %v7430_v45 = vpop.eup %5686  ;;  %v2971_v24 = vsel %vm526_vm5, %v7426_v15, 0.0 }
 0xd79   :  { %2960 = vadd.xlane.f32.xlu1 %v2959_v40  ;;  %2972 = vadd.xlane.f32.xlu0 %v2971_v24  ;;  %v2962_v46 = vsel %vm526_vm5, %v7430_v45, 0.0  ;;  %v7436_v1 = vpop.eup %5688 }
 0xd7a   :  { %v2965_v29 = vsel %vm526_vm5, %v7436_v1, 0.0 }
 0xd7b   :  { %v7440_v30 = vpop.eup %5690 }
 0xd7c   :  { %v2968_v28 = vsel %vm526_vm5, %v7440_v30, 0.0  ;;  %v7453_v16 = vpop.eup %5692 }
 0xd7d   :  { %2963 = vadd.xlane.f32.xlu1 %v2962_v46  ;;  %v2977_v37 = vsel %vm526_vm5, %v7453_v16, 0.0 }
 0xd81   :  { %2966 = vadd.xlane.f32.xlu1 %v2965_v29 }
 0xd85   :  { %2969 = vadd.xlane.f32.xlu1 %v2968_v28 }
 0xd8f   :  { %3003 = vrot.lane.b32.xlu0 %v7062_v6, %s5787_s14  ;;  %v2954_v6 = vmul.f32 1.442695, %v2937_v39 }
 0xd93   :  { %3001 = vrot.lane.b32.xlu0 %v7060_v56, %s5787_s14 }
 0xd96   :  { %3007 = vrot.lane.b32.xlu1 %v7054_v33, %s5787_s14 }
 0xda5   :  { %v2513_v61 = vpop.xlane.xlu1 %2512 }
 0xda6   :  { %5694 = vrcp.f32 %v2513_v61 }
 0xda7   :  { %5696 = vpow2.f32 %v2950_v19 }
 0xda9   :  { %v2516_v56 = vpop.xlane.xlu0 %2515 }
 0xdaa   :  { %5698 = vrcp.f32 %v2516_v56 }
 0xdab   :  { %5700 = vpow2.f32 %v2954_v6 }
 0xdad   :  { %v2519_v33 = vpop.xlane.xlu1 %2518 }
 0xdae   :  { %5702 = vrcp.f32 %v2519_v33 }
 0xdb1   :  { %v2522_v42 = vpop.xlane.xlu1 %2521 }
 0xdb2   :  { %5704 = vrcp.f32 %v2522_v42  ;;  %2978 = vadd.xlane.f32.xlu0 %v2977_v37 }
 0xdb3   :  { %v5695_v14 = vpop.eup %5694 }
 0xdb4   :  { %v2547_v2 = vmul.f32 %v5695_v14, %v7364_v44  ;;  %v7458_v5 = vpop.eup %5696  ;;  %v4333_v14 = vld [vmem:[%s8056_s6 + $0x28] sm:$0xff] }
 0xdb5   :  { %v2525_v23 = vpop.xlane.xlu1 %2524  ;;  %v2974_v44 = vsel %vm526_vm5, %v7458_v5, 0.0 }
 0xdb6   :  { %5706 = vrcp.f32 %v2525_v23  ;;  %5256 = vmatmul.mubr.msk.f32.vlgmr.msra.gmra.mxu1 %vm526_vm5, %v2547_v2  ;;  %v4335_v23 = vld [vmem:[%s8056_s6 + $0x38] sm:$0xff] }
 0xdb7   :  { %v5699_v63 = vpop.eup %5698  ;;  %5328 = vmatpush3.msra.mxu1 %v7357_v41  ;;  %5258 = vmatprep.mubr.msk.f32.mxu1 %vm5782_vm1, %v5781_v0 }
 0xdb8   :  { %5329 = vmatprep.subr.mxu1 %v5781_v0  ;;  %v2548_v52 = vmul.f32 %v5699_v63, %v7369_v3  ;;  %v7469_v24 = vpop.eup %5700  ;;  %5373 = vmatpush3.msra.mxu0 %v4335_v23 }
 0xdb9   :  { %5330 = vmatpush3.msra.mxu1 %v7410_v12  ;;  %v2528_v40 = vpop.xlane.xlu0 %2527  ;;  %v2980_v46 = vsel %vm526_vm5, %v7469_v24, 0.0  ;;  %5374 = vmatprep.subr.mxu0 %v5781_v0 }
 0xdba   :  { %5331 = vmatprep.subr.mxu1 %v5781_v0  ;;  %5708 = vrcp.f32 %v2528_v40  ;;  %2975 = vadd.xlane.f32.xlu1 %v2974_v44 }
 0xdbb   :  { %v5703_v41 = vpop.eup %5702  ;;  %5259 = vmatmul.mubr.msk.f32.gmra.mxu1 %vm526_vm5, %v2548_v52 }
 0xdbc   :  { %5332 = vmatpush3.msra.mxu1 %v7406_v7  ;;  %5261 = vmatprep.mubr.msk.f32.mxu1 %vm5782_vm1, %v5781_v0  ;;  %v2549_v3 = vmul.f32 %v5703_v41, %v7374_v51 }
 0xdbd   :  { %5333 = vmatprep.subr.mxu1 %v5781_v0  ;;  %v2531_v12 = vpop.xlane.xlu1 %2530 }
 0xdbe   :  { %5334 = vmatpush3.msra.mxu1 %v7408_v35  ;;  %5710 = vrcp.f32 %v2531_v12  ;;  %2981 = vadd.xlane.f32.xlu1 %v2980_v46 }
 0xdbf   :  { %v5705_v29 = vpop.eup %5704  ;;  %5335 = vmatprep.subr.mxu1 %v5781_v0  ;;  %5262 = vmatmul.mubr.msk.f32.gmra.mxu1 %vm526_vm5, %v2549_v3 }
 0xdc0   :  { %5336 = vmatpush3.msra.mxu1 %v7412_v55  ;;  %5264 = vmatprep.mubr.msk.f32.mxu1 %vm5782_vm1, %v5781_v0  ;;  %v2550_v51 = vmul.f32 %v5705_v29, %v7379_v21 }
 0xdc1   :  { %v2534_v7 = vpop.xlane.xlu0 %2533  ;;  %5337 = vmatprep.subr.mxu1 %v5781_v0 }
 0xdc2   :  { %5712 = vrcp.f32 %v2534_v7 }
 0xdc3   :  { %v5707_v28 = vpop.eup %5706  ;;  %5265 = vmatmul.mubr.msk.f32.gmra.mxu1 %vm526_vm5, %v2550_v51 }
 0xdc4   :  { %5267 = vmatprep.mubr.msk.f32.mxu1 %vm5782_vm1, %v5781_v0  ;;  %v2551_v35 = vmul.f32 %v5707_v28, %v7384_v9 }
 0xdc5   :  { %v2537_v34 = vpop.xlane.xlu1 %2536  ;;  %v3006_v39 = vpop.permute.xlu0 %3005 }
 0xdc6   :  { %5714 = vrcp.f32 %v2537_v34 }
 0xdc7   :  { %v5709_v55 = vpop.eup %5708  ;;  %5268 = vmatmul.mubr.msk.f32.gmra.mxu1 %vm526_vm5, %v2551_v35 }
 0xdc8   :  { %5270 = vmatprep.mubr.msk.f32.mxu1 %vm5782_vm1, %v5781_v0  ;;  %v2552_v21 = vmul.f32 %v5709_v55, %v7388_v53 }
 0xdcb   :  { %v5711_v54 = vpop.eup %5710  ;;  %5271 = vmatmul.mubr.msk.f32.gmra.mxu1 %vm526_vm5, %v2552_v21 }
 0xdcc   :  { %5273 = vmatprep.mubr.msk.f32.mxu1 %vm5782_vm1, %v5781_v0  ;;  %v2553_v20 = vmul.f32 %v5711_v54, %v7392_v62 }
 0xdcf   :  { %v5713_v38 = vpop.eup %5712  ;;  %5274 = vmatmul.mubr.msk.f32.gmra.mxu1 %vm526_vm5, %v2553_v20 }
 0xdd0   :  { %5276 = vmatprep.mubr.msk.f32.mxu1 %vm5782_vm1, %v5781_v0  ;;  %v2554_v9 = vmul.f32 %v5713_v38, %v7396_v26 }
 0xdd3   :  { %v5715_v4 = vpop.eup %5714  ;;  %5277 = vmatmul.mubr.msk.f32.gmra.mxu1 %vm526_vm5, %v2554_v9 }
 0xdd4   :  { %5279 = vmatprep.mubr.msk.f32.mxu1 %vm5782_vm1, %v5781_v0  ;;  %v2555_v53 = vmul.f32 %v5715_v4, %v7400_v31 }
 0xdd7   :  { %5280 = vmatmul.mubr.msk.f32.gmra.mxu1 %vm526_vm5, %v2555_v53 }
 0xdd8   :  { %5345 = vmatprep.mubr.msk.f32.mxu1 %vm5782_vm1, %v5781_v0 }
 0xdfe   :  { %v2958_v62 = vpop.xlane.xlu1 %2957 }
 0xdff   :  { %5716 = vrcp.f32 %v2958_v62 }
 0xe02   :  { %v2961_v60 = vpop.xlane.xlu1 %2960  ;;  %v2973_v26 = vpop.xlane.xlu0 %2972 }
 0xe03   :  { %5718 = vrcp.f32 %v2961_v60 }
 0xe06   :  { %v2964_v19 = vpop.xlane.xlu1 %2963  ;;  %v3004_v56 = vpop.permute.xlu0 %3003 }
 0xe07   :  { %5720 = vrcp.f32 %v2964_v19 }
 0xe0a   :  { %v2967_v61 = vpop.xlane.xlu1 %2966  ;;  %v3002_v37 = vpop.permute.xlu0 %3001 }
 0xe0b   :  { %5722 = vrcp.f32 %v2967_v61 }
 0xe0c   :  { %v5717_v31 = vpop.eup %5716 }
 0xe0d   :  { %v2992_v42 = vmul.f32 %v5717_v31, %v7420_v11  ;;  %v4332_v11 = vld [vmem:[%s8056_s6 + $0x20] sm:$0xff] }
 0xe0e   :  { %v2970_v6 = vpop.xlane.xlu1 %2969 }
 0xe0f   :  { %5724 = vrcp.f32 %v2970_v6 }
 0xe10   :  { %v5719_v2 = vpop.eup %5718  ;;  %5726 = vrcp.f32 %v2973_v26 }
 0xe11   :  { %v2993_v63 = vmul.f32 %v5719_v2, %v7424_v50 }
 0xe12   :  { %v3008_v33 = vpop.permute.xlu1 %3007 }
 0xe13   :  { %5338 = vmatpush3.msra.mxu1 %v3008_v33 }
 0xe14   :  { %5339 = vmatprep.subr.mxu1 %v5781_v0  ;;  %v5721_v52 = vpop.eup %5720 }
 0xe15   :  { %5340 = vmatpush3.msra.mxu1 %v3006_v39  ;;  %v2994_v40 = vmul.f32 %v5721_v52, %v7430_v45 }
 0xe16   :  { %5341 = vmatprep.subr.mxu1 %v5781_v0 }
 0xe17   :  { %5342 = vmatpush3.msra.mxu1 %v3004_v56 }
 0xe18   :  { %5343 = vmatprep.subr.mxu1 %v5781_v0  ;;  %v5723_v44 = vpop.eup %5722 }
 0xe19   :  { %5344 = vmatpush3.msra.mxu1 %v3002_v37  ;;  %v2995_v50 = vmul.f32 %v5723_v44, %v7436_v1 }
 0xe1a   :  { %5346 = vmatmul.mubr.msk.f32.vlgmr.msra.gmra.mxu1 %vm526_vm5, %v2992_v42  ;;  %5403 = vmatprep.subr.mxu1 %v5781_v0 }
 0xe1b   :  { %5348 = vmatprep.mubr.msk.f32.mxu1 %vm5782_vm1, %v5781_v0  ;;  %5404 = vmatpush3.msra.mxu1 %v4333_v14 }
 0xe1c   :  { %5405 = vmatprep.subr.mxu1 %v5781_v0  ;;  %v5725_v41 = vpop.eup %5724 }
 0xe1d   :  { %5406 = vmatpush3.msra.mxu1 %v4332_v11  ;;  %v2996_v3 = vmul.f32 %v5725_v41, %v7440_v30  ;;  %v5727_v12 = vpop.eup %5726 }
 0xe1e   :  { %5349 = vmatmul.mubr.msk.f32.gmra.mxu1 %vm526_vm5, %v2993_v63  ;;  %5469 = vmatprep.subr.mxu1 %v5781_v0  ;;  %v2997_v45 = vmul.f32 %v5727_v12, %v7426_v15 }
 0xe1f   :  { %5351 = vmatprep.mubr.msk.f32.mxu1 %vm5782_vm1, %v5781_v0 }
 0xe22   :  { %5352 = vmatmul.mubr.msk.f32.gmra.mxu1 %vm526_vm5, %v2994_v40 }
 0xe23   :  { %5354 = vmatprep.mubr.msk.f32.mxu1 %vm5782_vm1, %v5781_v0 }
 0xe26   :  { %5355 = vmatmul.mubr.msk.f32.gmra.mxu1 %vm526_vm5, %v2995_v50 }
 0xe27   :  { %5357 = vmatprep.mubr.msk.f32.mxu1 %vm5782_vm1, %v5781_v0 }
 0xe2a   :  { %5358 = vmatmul.mubr.msk.f32.gmra.mxu1 %vm526_vm5, %v2996_v3 }
 0xe2b   :  { %5360 = vmatprep.mubr.msk.f32.mxu1 %vm5782_vm1, %v5781_v0 }
 0xe2e   :  { %5361 = vmatmul.mubr.msk.f32.gmra.mxu1 %vm526_vm5, %v2997_v45 }
 0xe2f   :  { %5363 = vmatprep.mubr.msk.f32.mxu1 %vm5782_vm1, %v5781_v0 }
 0xe3b   :  { %v2979_v1 = vpop.xlane.xlu0 %2978 }
 0xe43   :  { %v2976_v46 = vpop.xlane.xlu1 %2975 }
 0xe44   :  { %5728 = vrcp.f32 %v2976_v46 }
 0xe45   :  { %5730 = vrcp.f32 %v2979_v1 }
 0xe47   :  { %v2982_v29 = vpop.xlane.xlu1 %2981 }
 0xe48   :  { %5732 = vrcp.f32 %v2982_v29 }
 0xe51   :  { %v5729_v30 = vpop.eup %5728 }
 0xe52   :  { %v2998_v51 = vmul.f32 %v5729_v30, %v7458_v5  ;;  %v5731_v7 = vpop.eup %5730  ;;  %v4334_v5 = vld [vmem:[%s8056_s6 + $0x30] sm:$0xff] }
 0xe53   :  { %v2999_v15 = vmul.f32 %v5731_v7, %v7453_v16  ;;  %5375 = vmatpush3.msra.mxu0 %v4334_v5 }
 0xe54   :  { %5364 = vmatmul.mubr.msk.f32.gmra.mxu1 %vm526_vm5, %v2998_v51  ;;  %5434 = vmatprep.subr.mxu0 %v5781_v0 }
 0xe55   :  { %5366 = vmatprep.mubr.msk.f32.mxu1 %vm5782_vm1, %v5781_v0  ;;  %v5733_v28 = vpop.eup %5732 }
 0xe56   :  { %v3000_v35 = vmul.f32 %v5733_v28, %v7469_v24 }
 0xe58   :  { %5367 = vmatmul.mubr.msk.f32.gmra.mxu1 %vm526_vm5, %v2999_v15 }
 0xe59   :  { %5369 = vmatprep.mubr.msk.f32.mxu1 %vm5782_vm1, %v5781_v0 }
 0xe5c   :  { %5370 = vmatmul.mubr.msk.f32.gmra.mxu1 %vm526_vm5, %v3000_v35 }
 0xe5d   :  { %5407 = vmatprep.mubr.msk.f32.mxu1 %vm5782_vm1, %v5781_v0 }
 0xe76   :  { %v2676_v16 = vpop.f32.mrf.mxu1 }
 0xe77   :  { %5408 = vmatmul.mubr.msk.f32.vlgmr.msra.gmra.mxu1 %vm379_vm4, %v2676_v16 }
 0xe78   :  { %v5257_v34 = vpop.f32.mrf.mxu1  ;;  %5410 = vmatprep.mubr.msk.f32.mxu1 %vm5782_vm1, %v5781_v0 }
 0xe7b   :  { %v2681_v24 = vpop.f32.mrf.mxu1 }
 0xe7c   :  { %5411 = vmatmul.mubr.msk.f32.gmra.mxu1 %vm379_vm4, %v2681_v24 }
 0xe7d   :  { %v5260_v55 = vpop.f32.mrf.mxu1  ;;  %5413 = vmatprep.mubr.msk.f32.mxu1 %vm5782_vm1, %v5781_v0 }
 0xe7f   :  { %v2686_v21 = vpop.f32.mrf.mxu1 }
 0xe80   :  { %5414 = vmatmul.mubr.msk.f32.gmra.mxu1 %vm379_vm4, %v2686_v21 }
 0xe81   :  { %v5263_v54 = vpop.f32.mrf.mxu1  ;;  %5416 = vmatprep.mubr.msk.f32.mxu1 %vm5782_vm1, %v5781_v0 }
 0xe83   :  { %v2691_v20 = vpop.f32.mrf.mxu1 }
 0xe84   :  { %5417 = vmatmul.mubr.msk.f32.gmra.mxu1 %vm379_vm4, %v2691_v20 }
 0xe85   :  { %v5266_v38 = vpop.f32.mrf.mxu1  ;;  %5419 = vmatprep.mubr.msk.f32.mxu1 %vm5782_vm1, %v5781_v0 }
 0xe87   :  { %v2696_v9 = vpop.f32.mrf.mxu1 }
 0xe88   :  { %5420 = vmatmul.mubr.msk.f32.gmra.mxu1 %vm379_vm4, %v2696_v9  ;;  %v7624_v9 = vld [vmem:[%s8054_s9 + $0x8] sm:$0xff] }
 0xe89   :  { %v5269_v4 = vpop.f32.mrf.mxu1  ;;  %5422 = vmatprep.mubr.msk.f32.mxu1 %vm5782_vm1, %v5781_v0 }
 0xe8a   :  { %v3442_v4 = vrot.slane %v7624_v9, %v1511_v43 }
 0xe8b   :  { %v2701_v53 = vpop.f32.mrf.mxu1 }
 0xe8c   :  { %5423 = vmatmul.mubr.msk.f32.gmra.mxu1 %vm379_vm4, %v2701_v53 }
 0xe8d   :  { %v5272_v62 = vpop.f32.mrf.mxu1  ;;  %5425 = vmatprep.mubr.msk.f32.mxu1 %vm5782_vm1, %v5781_v0 }
 0xe8f   :  { %v2706_v60 = vpop.f32.mrf.mxu1 }
 0xe90   :  { %5426 = vmatmul.mubr.msk.f32.gmra.mxu1 %vm379_vm4, %v2706_v60 }
 0xe91   :  { %v5275_v19 = vpop.f32.mrf.mxu1  ;;  %5428 = vmatprep.mubr.msk.f32.mxu1 %vm5782_vm1, %v5781_v0 }
 0xe93   :  { %v2711_v39 = vpop.f32.mrf.mxu1 }
 0xe94   :  { %5429 = vmatmul.mubr.msk.f32.gmra.mxu1 %vm379_vm4, %v2711_v39 }
 0xe95   :  { %v5278_v61 = vpop.f32.mrf.mxu1  ;;  %5431 = vmatprep.mubr.msk.f32.mxu1 %vm5782_vm1, %v5781_v0 }
 0xe97   :  { %v2716_v26 = vpop.f32.mrf.mxu1 }
 0xe98   :  { %5432 = vmatmul.mubr.msk.f32.gmra.mxu1 %vm379_vm4, %v2716_v26 }
 0xe99   :  { %v5281_v6 = vpop.f32.mrf.mxu1  ;;  %5485 = vmatprep.mubr.msk.f32.mxu1 %vm5782_vm1, %v5781_v0 }
 0xeda   :  { %v3121_v56 = vpop.f32.mrf.mxu1 }
 0xedb   :  { %5377 = vmatmul.mubr.msk.f32.vlgmr.msra.gmra.mxu0 %vm379_vm4, %v3121_v56 }
 0xedc   :  { %v5347_v33 = vpop.f32.mrf.mxu1  ;;  %5379 = vmatprep.mubr.msk.f32.mxu0 %vm5782_vm1, %v5781_v0 }
 0xede   :  { %v3126_v31 = vpop.f32.mrf.mxu1 }
 0xedf   :  { %5380 = vmatmul.mubr.msk.f32.gmra.mxu0 %vm379_vm4, %v3126_v31 }
 0xee0   :  { %v5350_v42 = vpop.f32.mrf.mxu1  ;;  %5382 = vmatprep.mubr.msk.f32.mxu0 %vm5782_vm1, %v5781_v0 }
 0xee2   :  { %v3131_v37 = vpop.f32.mrf.mxu1 }
 0xee3   :  { %5383 = vmatmul.mubr.msk.f32.gmra.mxu0 %vm379_vm4, %v3131_v37 }
 0xee4   :  { %v5353_v14 = vpop.f32.mrf.mxu1  ;;  %5385 = vmatprep.mubr.msk.f32.mxu0 %vm5782_vm1, %v5781_v0 }
 0xee6   :  { %v3136_v2 = vpop.f32.mrf.mxu1 }
 0xee7   :  { %5386 = vmatmul.mubr.msk.f32.gmra.mxu0 %vm379_vm4, %v3136_v2 }
 0xee8   :  { %v5356_v23 = vpop.f32.mrf.mxu1  ;;  %5388 = vmatprep.mubr.msk.f32.mxu0 %vm5782_vm1, %v5781_v0 }
 0xeea   :  { %v3141_v11 = vpop.f32.mrf.mxu1 }
 0xeeb   :  { %5389 = vmatmul.mubr.msk.f32.gmra.mxu0 %vm379_vm4, %v3141_v11 }
 0xeec   :  { %v5359_v63 = vpop.f32.mrf.mxu1  ;;  %5391 = vmatprep.mubr.msk.f32.mxu0 %vm5782_vm1, %v5781_v0 }
 0xeee   :  { %v3146_v52 = vpop.f32.mrf.mxu1 }
 0xeef   :  { %5392 = vmatmul.mubr.msk.f32.gmra.mxu0 %vm379_vm4, %v3146_v52 }
 0xef0   :  { %v5362_v40 = vpop.f32.mrf.mxu1  ;;  %5394 = vmatprep.mubr.msk.f32.mxu0 %vm5782_vm1, %v5781_v0 }
 0xf14   :  { %v3151_v44 = vpop.f32.mrf.mxu1 }
 0xf15   :  { %5395 = vmatmul.mubr.msk.f32.gmra.mxu0 %vm379_vm4, %v3151_v44 }
 0xf16   :  { %v5365_v50 = vpop.f32.mrf.mxu1  ;;  %5397 = vmatprep.mubr.msk.f32.mxu0 %vm5782_vm1, %v5781_v0 }
 0xf18   :  { %v3156_v41 = vpop.f32.mrf.mxu1 }
 0xf19   :  { %5398 = vmatmul.mubr.msk.f32.gmra.mxu0 %vm379_vm4, %v3156_v41 }
 0xf1a   :  { %v5368_v3 = vpop.f32.mrf.mxu1  ;;  %5400 = vmatprep.mubr.msk.f32.mxu0 %vm5782_vm1, %v5781_v0 }
 0xf1c   :  { %v3161_v12 = vpop.f32.mrf.mxu1 }
 0xf1d   :  { %5401 = vmatmul.mubr.msk.f32.gmra.mxu0 %vm379_vm4, %v3161_v12 }
 0xf1e   :  { %v5371_v45 = vpop.f32.mrf.mxu1  ;;  %5442 = vmatprep.mubr.msk.f32.mxu0 %vm5782_vm1, %v5781_v0 }
 0xf37   :  { %v3395_v1 = vpop.f32.mrf.mxu1 }
 0xf39   :  { %v5409_v46 = vpop.f32.mrf.mxu1 }
 0xf3c   :  { %v3400_v29 = vpop.f32.mrf.mxu1 }
 0xf3e   :  { %v5412_v30 = vpop.f32.mrf.mxu1 }
 0xf40   :  { %v3405_v51 = vpop.f32.mrf.mxu1 }
 0xf42   :  { %v5415_v7 = vpop.f32.mrf.mxu1 }
 0xf44   :  { %v3410_v15 = vpop.f32.mrf.mxu1 }
 0xf46   :  { %v5418_v28 = vpop.f32.mrf.mxu1 }
 0xf48   :  { %v3415_v35 = vpop.f32.mrf.mxu1 }
 0xf4a   :  { %v5421_v5 = vpop.f32.mrf.mxu1 }
 0xf4c   :  { %v3420_v16 = vpop.f32.mrf.mxu1 }
 0xf4e   :  { %v5424_v34 = vpop.f32.mrf.mxu1 }
 0xf50   :  { %v3425_v24 = vpop.f32.mrf.mxu1 }
 0xf52   :  { %v5427_v55 = vpop.f32.mrf.mxu1 }
 0xf54   :  { %v3430_v21 = vpop.f32.mrf.mxu1 }
 0xf56   :  { %v5430_v54 = vpop.f32.mrf.mxu1 }
 0xf58   :  { %v3435_v20 = vpop.f32.mrf.mxu1 }
 0xf5a   :  { %v5433_v38 = vpop.f32.mrf.mxu1 }
 0xf9b   :  { %v3258_v53 = vpop.f32.mrf.mxu0 }
 0xf9c   :  { %v3396_v62 = vadd.f32 %v3395_v1, %v3258_v53 }
 0xf9d   :  { %v5378_v60 = vpop.f32.mrf.mxu0 }
 0xf9e   :  { %v3443_v19 = vadd.f32 %v3442_v4, %v3396_v62 }
 0xf9f   :  { %v3263_v39 = vpop.f32.mrf.mxu0 }
 0xfa0   :  { %v3401_v61 = vadd.f32 %v3400_v29, %v3263_v39  ;;  %v3452_v26 = vadd.f32 %v3443_v19, %v6949_v13 }
 0xfa1   :  { %v5381_v6 = vpop.f32.mrf.mxu0 }
 0xfa2   :  { %v3444_v56 = vadd.f32 %v3442_v4, %v3401_v61  ;;  %v3461_v33 = vsel %vm214_vm3, %v3452_v26, 0.0 }
 0xfa3   :  { %3462 = vadd.xlane.f32.xlu1 %v3461_v33  ;;  %v3268_v31 = vpop.f32.mrf.mxu0 }
 0xfa4   :  { %v3406_v42 = vadd.f32 %v3405_v51, %v3268_v31  ;;  %v3453_v37 = vadd.f32 %v3444_v56, %v6958_v17 }
 0xfa5   :  { %v5384_v14 = vpop.f32.mrf.mxu0 }
 0xfa6   :  { %v3445_v2 = vadd.f32 %v3442_v4, %v3406_v42  ;;  %v3464_v43 = vsel %vm214_vm3, %v3453_v37, 0.0 }
 0xfa7   :  { %3465 = vadd.xlane.f32.xlu1 %v3464_v43  ;;  %v3273_v23 = vpop.f32.mrf.mxu0 }
 0xfa8   :  { %v3411_v11 = vadd.f32 %v3410_v15, %v3273_v23  ;;  %v3454_v63 = vadd.f32 %v3445_v2, %v6967_v58 }
 0xfa9   :  { %v5387_v52 = vpop.f32.mrf.mxu0 }
 0xfaa   :  { %v3446_v13 = vadd.f32 %v3442_v4, %v3411_v11  ;;  %v3467_v40 = vsel %vm214_vm3, %v3454_v63, 0.0 }
 0xfab   :  { %3468 = vadd.xlane.f32.xlu1 %v3467_v40  ;;  %v3278_v44 = vpop.f32.mrf.mxu0 }
 0xfac   :  { %v3416_v50 = vadd.f32 %v3415_v35, %v3278_v44  ;;  %v3455_v41 = vadd.f32 %v3446_v13, %v6976_v57 }
 0xfad   :  { %v5390_v3 = vpop.f32.mrf.mxu0 }
 0xfae   :  { %v3447_v17 = vadd.f32 %v3442_v4, %v3416_v50  ;;  %v3470_v12 = vsel %vm214_vm3, %v3455_v41, 0.0 }
 0xfaf   :  { %3471 = vadd.xlane.f32.xlu0 %v3470_v12  ;;  %v3283_v45 = vpop.f32.mrf.mxu0 }
 0xfb0   :  { %v3421_v1 = vadd.f32 %v3420_v16, %v3283_v45  ;;  %v3456_v46 = vadd.f32 %v3447_v17, %v6985_v8 }
 0xfb1   :  { %v5393_v29 = vpop.f32.mrf.mxu0 }
 0xfb2   :  { %v3448_v58 = vadd.f32 %v3442_v4, %v3421_v1  ;;  %v3473_v30 = vsel %vm214_vm3, %v3456_v46, 0.0  ;;  %v4424_v1 = vld [vmem:[%s8057_s7 + $0x38] sm:$0xff]  ;;  %v4422_v29 = vld [vmem:[%s8057_s7 + $0x28] sm:$0xff] }
 0xfb3   :  { %3474 = vadd.xlane.f32.xlu1 %v3473_v30  ;;  %5435 = vmatpush3.msra.mxu0 %v4424_v1 }
 0xfb4   :  { %v3457_v51 = vadd.f32 %v3448_v58, %v6994_v10  ;;  %5436 = vmatprep.subr.mxu0 %v5781_v0  ;;  %v4421_v58 = vld [vmem:[%s8057_s7 + $0x20] sm:$0xff] }
 0xfb6   :  { %v3476_v7 = vsel %vm214_vm3, %v3457_v51, 0.0 }
 0xfb7   :  { %3477 = vadd.xlane.f32.xlu0 %v3476_v7 }
 0xfd5   :  { %v3288_v57 = vpop.f32.mrf.mxu0 }
 0xfd6   :  { %v3426_v15 = vadd.f32 %v3425_v24, %v3288_v57 }
 0xfd7   :  { %v5396_v28 = vpop.f32.mrf.mxu0 }
 0xfd8   :  { %v3449_v35 = vadd.f32 %v3442_v4, %v3426_v15 }
 0xfd9   :  { %v3293_v5 = vpop.f32.mrf.mxu0 }
 0xfda   :  { %v3431_v34 = vadd.f32 %v3430_v21, %v3293_v5  ;;  %v7642_v16 = vadd.f32 %v3449_v35, %v7003_v18 }
 0xfdb   :  { %v5399_v8 = vpop.f32.mrf.mxu0 }
 0xfdc   :  { %v3450_v55 = vadd.f32 %v3442_v4, %v3431_v34  ;;  %v3479_v54 = vsel %vm214_vm3, %v7642_v16, 0.0 }
 0xfdd   :  { %3480 = vadd.xlane.f32.xlu1 %v3479_v54  ;;  %v3298_v38 = vpop.f32.mrf.mxu0 }
 0xfde   :  { %v3436_v10 = vadd.f32 %v3435_v20, %v3298_v38  ;;  %v3459_v53 = vadd.f32 %v3450_v55, %v7012_v27 }
 0xfdf   :  { %v5402_v62 = vpop.f32.mrf.mxu0 }
 0xfe0   :  { %v3451_v60 = vadd.f32 %v3442_v4, %v3436_v10  ;;  %v3482_v24 = vsel %vm214_vm3, %v3459_v53, 0.0  ;;  %v4440_v62 = vld [vmem:[%s8058_s8 + $0x70] sm:$0xff] }
 0xfe1   :  { %3483 = vadd.xlane.f32.xlu0 %v3482_v24  ;;  %v4438_v24 = vld [vmem:[%s8058_s8 + $0x60] sm:$0xff] }
 0xfe2   :  { %v7649_v21 = vadd.f32 %v3451_v60, %v7021_v32  ;;  %v4439_v60 = vld [vmem:[%s8058_s8 + $0x68] sm:$0xff] }
 0xfe4   :  { %v3485_v18 = vsel %vm214_vm3, %v7649_v21, 0.0 }
 0xfe5   :  { %3486 = vadd.xlane.f32.xlu1 %v3485_v18 }
0x102c   :  { %v3463_v19 = vpop.xlane.xlu1 %3462 }
0x102d   :  { %v3488_v39 = vmul.f32 0.03125, %v3463_v19 }
0x102f   :  { %v7653_v61 = vsub.f32 %v3452_v26, %v3488_v39 }
0x1030   :  { %v3466_v6 = vpop.xlane.xlu1 %3465 }
0x1031   :  { %v3489_v20 = vmul.f32 0.03125, %v3466_v6  ;;  %v3506_v27 = vmul.f32 %v7653_v61, %v7653_v61 }
0x1033   :  { %v7657_v4 = vsub.f32 %v3453_v37, %v3489_v20  ;;  %v3515_v56 = vsel %vm214_vm3, %v3506_v27, 0.0 }
0x1034   :  { %v3469_v33 = vpop.xlane.xlu1 %3468  ;;  %3516 = vadd.xlane.f32.xlu0 %v3515_v56 }
0x1035   :  { %v3490_v32 = vmul.f32 0.03125, %v3469_v33  ;;  %v3507_v31 = vmul.f32 %v7657_v4, %v7657_v4 }
0x1037   :  { %v7662_v42 = vsub.f32 %v3454_v63, %v3490_v32  ;;  %v3518_v26 = vsel %vm214_vm3, %v3507_v31, 0.0 }
0x1038   :  { %v3472_v14 = vpop.xlane.xlu0 %3471  ;;  %3519 = vadd.xlane.f32.xlu1 %v3518_v26 }
0x1039   :  { %v3491_v2 = vmul.f32 0.03125, %v3472_v14  ;;  %v3508_v43 = vmul.f32 %v7662_v42, %v7662_v42 }
0x103b   :  { %v7667_v37 = vsub.f32 %v3455_v41, %v3491_v2  ;;  %v3521_v23 = vsel %vm214_vm3, %v3508_v43, 0.0  ;;  %v7739_v43 = vrot.slane %v7624_v9, %v1651_v59 }
0x103c   :  { %v3475_v11 = vpop.xlane.xlu1 %3474  ;;  %3522 = vadd.xlane.f32.xlu0 %v3521_v23 }
0x103d   :  { %v3492_v52 = vmul.f32 0.03125, %v3475_v11  ;;  %v3509_v13 = vmul.f32 %v7667_v37, %v7667_v37 }
0x103f   :  { %v7672_v63 = vsub.f32 %v3456_v46, %v3492_v52  ;;  %v3524_v40 = vsel %vm214_vm3, %v3509_v13, 0.0  ;;  %v4423_v46 = vld [vmem:[%s8057_s7 + $0x30] sm:$0xff]  ;;  %v7744_v52 = vrot.slane %v7624_v9, %v1664_v48 }
0x1040   :  { %v3478_v44 = vpop.xlane.xlu0 %3477  ;;  %3525 = vadd.xlane.f32.xlu1 %v3524_v40  ;;  %5437 = vmatpush3.msra.mxu0 %v4423_v46 }
0x1041   :  { %v3493_v50 = vmul.f32 0.03125, %v3478_v44  ;;  %v3510_v3 = vmul.f32 %v7672_v63, %v7672_v63  ;;  %5438 = vmatprep.subr.mxu0 %v5781_v0 }
0x1042   :  { %5439 = vmatpush3.msra.mxu0 %v4422_v29 }
0x1043   :  { %v7677_v41 = vsub.f32 %v3457_v51, %v3493_v50  ;;  %v3527_v17 = vsel %vm214_vm3, %v3510_v3, 0.0  ;;  %5440 = vmatprep.subr.mxu0 %v5781_v0 }
0x1044   :  { %3528 = vadd.xlane.f32.xlu0 %v3527_v17  ;;  %5441 = vmatpush3.msra.mxu0 %v4421_v58 }
0x1045   :  { %v3511_v12 = vmul.f32 %v7677_v41, %v7677_v41  ;;  %5512 = vmatprep.subr.mxu0 %v5781_v0 }
0x1047   :  { %v3530_v45 = vsel %vm214_vm3, %v3511_v12, 0.0 }
0x1048   :  { %3531 = vadd.xlane.f32.xlu1 %v3530_v45 }
0x1066   :  { %v3481_v30 = vpop.xlane.xlu1 %3480 }
0x1067   :  { %v3494_v51 = vmul.f32 0.03125, %v3481_v30 }
0x1069   :  { %v7700_v7 = vsub.f32 %v7642_v16, %v3494_v51 }
0x106a   :  { %v3484_v57 = vpop.xlane.xlu0 %3483 }
0x106b   :  { %v3495_v15 = vmul.f32 0.03125, %v3484_v57  ;;  %v3512_v28 = vmul.f32 %v7700_v7, %v7700_v7 }
0x106d   :  { %v7704_v35 = vsub.f32 %v3459_v53, %v3495_v15  ;;  %v3533_v5 = vsel %vm214_vm3, %v3512_v28, 0.0  ;;  %v4441_v53 = vld [vmem:[%s8058_s8 + $0x78] sm:$0xff] }
0x106e   :  { %3534 = vadd.xlane.f32.xlu0 %v3533_v5  ;;  %v3487_v34 = vpop.xlane.xlu1 %3486  ;;  %5470 = vmatpush3.msra.mxu1 %v4441_v53 }
0x106f   :  { %v3496_v8 = vmul.f32 0.03125, %v3487_v34  ;;  %v3513_v55 = vmul.f32 %v7704_v35, %v7704_v35  ;;  %5471 = vmatprep.subr.mxu1 %v5781_v0 }
0x1070   :  { %5472 = vmatpush3.msra.mxu1 %v4440_v62 }
0x1071   :  { %v7710_v54 = vsub.f32 %v7649_v21, %v3496_v8  ;;  %v3536_v16 = vsel %vm214_vm3, %v3513_v55, 0.0  ;;  %5473 = vmatprep.subr.mxu1 %v5781_v0  ;;  %v4437_v21 = vld [vmem:[%s8058_s8 + $0x58] sm:$0xff] }
0x1072   :  { %3537 = vadd.xlane.f32.xlu1 %v3536_v16  ;;  %5474 = vmatpush3.msra.mxu1 %v4439_v60 }
0x1073   :  { %v3514_v38 = vmul.f32 %v7710_v54, %v7710_v54  ;;  %5475 = vmatprep.subr.mxu1 %v5781_v0 }
0x1074   :  { %5476 = vmatpush3.msra.mxu1 %v4438_v24 }
0x1075   :  { %v3539_v10 = vsel %vm214_vm3, %v3514_v38, 0.0  ;;  %5477 = vmatprep.subr.mxu1 %v5781_v0 }
0x1076   :  { %3540 = vadd.xlane.f32.xlu0 %v3539_v10  ;;  %5478 = vmatpush3.msra.mxu1 %v4437_v21 }
0x1077   :  { %5479 = vmatprep.subr.mxu1 %v5781_v0 }
0x10bd   :  { %v3517_v18 = vpop.xlane.xlu0 %3516 }
0x10be   :  { %v3542_v19 = vmul.f32 0.03125, %v3517_v18 }
0x10c0   :  { %v3551_v39 = vadd.f32 1e-05, %v3542_v19 }
0x10c1   :  { %v3520_v6 = vpop.xlane.xlu1 %3519 }
0x10c2   :  { %5734 = vrsqrt.f32 %v3551_v39  ;;  %v3543_v20 = vmul.f32 0.03125, %v3520_v6 }
0x10c4   :  { %v3552_v27 = vadd.f32 1e-05, %v3543_v20 }
0x10c5   :  { %v3523_v56 = vpop.xlane.xlu0 %3522 }
0x10c6   :  { %5736 = vrsqrt.f32 %v3552_v27  ;;  %v3544_v33 = vmul.f32 0.03125, %v3523_v56 }
0x10c8   :  { %v3553_v32 = vadd.f32 1e-05, %v3544_v33 }
0x10c9   :  { %v3526_v31 = vpop.xlane.xlu1 %3525 }
0x10ca   :  { %5738 = vrsqrt.f32 %v3553_v32  ;;  %v3545_v26 = vmul.f32 0.03125, %v3526_v31  ;;  %v4436_v31 = vld [vmem:[%s8058_s8 + $0x50] sm:$0xff] }
0x10cb   :  { %5480 = vmatpush3.msra.mxu1 %v4436_v31 }
0x10cc   :  { %v3554_v14 = vadd.f32 1e-05, %v3545_v26  ;;  %5481 = vmatprep.subr.mxu1 %v5781_v0  ;;  %v4434_v26 = vld [vmem:[%s8058_s8 + $0x40] sm:$0xff] }
0x10cd   :  { %v3529_v2 = vpop.xlane.xlu0 %3528 }
0x10ce   :  { %5740 = vrsqrt.f32 %v3554_v14  ;;  %v3546_v23 = vmul.f32 0.03125, %v3529_v2  ;;  %v3612_v14 = vrot.slane %v7624_v9, %v1681_v36 }
0x10cf   :  { %v5735_v11 = vpop.eup %5734 }
0x10d0   :  { %v3569_v13 = vmul.f32 %v5735_v11, %v7653_v61  ;;  %v3555_v40 = vadd.f32 1e-05, %v3546_v23 }
0x10d1   :  { %v3532_v44 = vpop.xlane.xlu1 %3531 }
0x10d2   :  { %v3582_v50 = vmul.f32 %v7739_v43, %v3569_v13  ;;  %5742 = vrsqrt.f32 %v3555_v40  ;;  %v3547_v3 = vmul.f32 0.03125, %v3532_v44 }
0x10d3   :  { %v5737_v17 = vpop.eup %5736 }
0x10d4   :  { %v7749_v59 = vadd.f32 %v7744_v52, %v3582_v50  ;;  %v3570_v12 = vmul.f32 %v5737_v17, %v7657_v4  ;;  %v3556_v45 = vadd.f32 1e-05, %v3547_v3 }
0x10d6   :  { %5744 = vrsqrt.f32 %v3556_v45  ;;  %5443 = vmatmul.mubr.msk.f32.vlgmr.msra.gmra.mxu0 %vm214_vm3, %v7749_v59  ;;  %v3583_v48 = vmul.f32 %v7739_v43, %v3570_v12 }
0x10d7   :  { %v5739_v61 = vpop.eup %5738  ;;  %5445 = vmatprep.mubr.msk.f32.mxu0 %vm5782_vm1, %v5781_v0 }
0x10d8   :  { %v3571_v1 = vmul.f32 %v5739_v61, %v7662_v42  ;;  %v7759_v46 = vadd.f32 %v7744_v52, %v3583_v48 }
0x10da   :  { %5446 = vmatmul.mubr.msk.f32.gmra.mxu0 %vm214_vm3, %v7759_v46  ;;  %v3584_v4 = vmul.f32 %v7739_v43, %v3571_v1 }
0x10db   :  { %v5741_v29 = vpop.eup %5740  ;;  %5448 = vmatprep.mubr.msk.f32.mxu0 %vm5782_vm1, %v5781_v0 }
0x10dc   :  { %v3572_v58 = vmul.f32 %v5741_v29, %v7667_v37  ;;  %v7768_v30 = vadd.f32 %v7744_v52, %v3584_v4 }
0x10de   :  { %5449 = vmatmul.mubr.msk.f32.gmra.mxu0 %vm214_vm3, %v7768_v30  ;;  %v3585_v42 = vmul.f32 %v7739_v43, %v3572_v58 }
0x10df   :  { %v5743_v51 = vpop.eup %5742  ;;  %5451 = vmatprep.mubr.msk.f32.mxu0 %vm5782_vm1, %v5781_v0 }
0x10e0   :  { %v3573_v57 = vmul.f32 %v5743_v51, %v7672_v63  ;;  %v7777_v15 = vadd.f32 %v7744_v52, %v3585_v42 }
0x10e2   :  { %5452 = vmatmul.mubr.msk.f32.gmra.mxu0 %vm214_vm3, %v7777_v15  ;;  %v3586_v37 = vmul.f32 %v7739_v43, %v3573_v57 }
0x10e3   :  { %v5745_v28 = vpop.eup %5744  ;;  %5454 = vmatprep.mubr.msk.f32.mxu0 %vm5782_vm1, %v5781_v0 }
0x10e4   :  { %v3574_v5 = vmul.f32 %v5745_v28, %v7677_v41  ;;  %v7786_v34 = vadd.f32 %v7744_v52, %v3586_v37 }
0x10e6   :  { %5455 = vmatmul.mubr.msk.f32.gmra.mxu0 %vm214_vm3, %v7786_v34  ;;  %v3587_v63 = vmul.f32 %v7739_v43, %v3574_v5 }
0x10e7   :  { %5457 = vmatprep.mubr.msk.f32.mxu0 %vm5782_vm1, %v5781_v0 }
0x10e8   :  { %v7794_v8 = vadd.f32 %v7744_v52, %v3587_v63 }
0x10ea   :  { %5458 = vmatmul.mubr.msk.f32.gmra.mxu0 %vm214_vm3, %v7794_v8 }
0x10eb   :  { %5460 = vmatprep.mubr.msk.f32.mxu0 %vm5782_vm1, %v5781_v0 }
0x10f7   :  { %v3535_v41 = vpop.xlane.xlu0 %3534 }
0x10f8   :  { %v3548_v55 = vmul.f32 0.03125, %v3535_v41 }
0x10fa   :  { %v3557_v16 = vadd.f32 1e-05, %v3548_v55 }
0x10fb   :  { %v3538_v38 = vpop.xlane.xlu1 %3537 }
0x10fc   :  { %5746 = vrsqrt.f32 %v3557_v16  ;;  %v3549_v10 = vmul.f32 0.03125, %v3538_v38 }
0x10fe   :  { %v3558_v53 = vadd.f32 1e-05, %v3549_v10 }
0x10ff   :  { %v3541_v62 = vpop.xlane.xlu0 %3540 }
0x1100   :  { %5748 = vrsqrt.f32 %v3558_v53  ;;  %v3550_v60 = vmul.f32 0.03125, %v3541_v62 }
0x1102   :  { %v3559_v24 = vadd.f32 1e-05, %v3550_v60 }
0x1104   :  { %5750 = vrsqrt.f32 %v3559_v24 }
0x1109   :  { %v5747_v21 = vpop.eup %5746 }
0x110a   :  { %v3575_v18 = vmul.f32 %v5747_v21, %v7700_v7  ;;  %v3771_v21 = vrot.slane %v7624_v9, %v1839_v25 }
0x110c   :  { %v3588_v19 = vmul.f32 %v7739_v43, %v3575_v18 }
0x110d   :  { %v5749_v39 = vpop.eup %5748 }
0x110e   :  { %v3576_v6 = vmul.f32 %v5749_v39, %v7704_v35  ;;  %v7804_v20 = vadd.f32 %v7744_v52, %v3588_v19 }
0x1110   :  { %5461 = vmatmul.mubr.msk.f32.gmra.mxu0 %vm214_vm3, %v7804_v20  ;;  %v3589_v27 = vmul.f32 %v7739_v43, %v3576_v6 }
0x1111   :  { %v5751_v56 = vpop.eup %5750  ;;  %5463 = vmatprep.mubr.msk.f32.mxu0 %vm5782_vm1, %v5781_v0 }
0x1112   :  { %v3577_v33 = vmul.f32 %v5751_v56, %v7710_v54  ;;  %v7813_v7 = vadd.f32 %v7744_v52, %v3589_v27  ;;  %v4435_v54 = vld [vmem:[%s8058_s8 + $0x48] sm:$0xff] }
0x1113   :  { %5482 = vmatpush3.msra.mxu1 %v4435_v54 }
0x1114   :  { %5464 = vmatmul.mubr.msk.f32.gmra.mxu0 %vm214_vm3, %v7813_v7  ;;  %v3590_v35 = vmul.f32 %v7739_v43, %v3577_v33  ;;  %5483 = vmatprep.subr.mxu1 %v5781_v0 }
0x1115   :  { %5466 = vmatprep.mubr.msk.f32.mxu0 %vm5782_vm1, %v5781_v0  ;;  %5484 = vmatpush3.msra.mxu1 %v4434_v26 }
0x1116   :  { %v7821_v32 = vadd.f32 %v7744_v52, %v3590_v35 }
0x1118   :  { %5467 = vmatmul.mubr.msk.f32.gmra.mxu0 %vm214_vm3, %v7821_v32 }
0x1119   :  { %5520 = vmatprep.mubr.msk.f32.mxu0 %vm5782_vm1, %v5781_v0 }
0x1196   :  { %v3706_v2 = vpop.f32.mrf.mxu0 }
0x1197   :  { %v3707_v43 = vadd.f32 %v3706_v2, %v3612_v14 }
0x1198   :  { %v5444_v23 = vpop.f32.mrf.mxu0 }
0x1199   :  { %v3750_v11 = vmax.f32 %v3707_v43, 0.0 }
0x119a   :  { %v3711_v52 = vpop.f32.mrf.mxu0 }
0x119b   :  { %v3712_v13 = vadd.f32 %v3711_v52, %v3612_v14  ;;  %5486 = vmatmul.mubr.msk.f32.vlgmr.msra.gmra.mxu1 %vm1841_vm6, %v3750_v11 }
0x119c   :  { %v5447_v40 = vpop.f32.mrf.mxu0  ;;  %5488 = vmatprep.mubr.msk.f32.mxu1 %vm5782_vm1, %v5781_v0 }
0x119d   :  { %v3751_v44 = vmax.f32 %v3712_v13, 0.0 }
0x119e   :  { %v3716_v50 = vpop.f32.mrf.mxu0 }
0x119f   :  { %v3717_v3 = vadd.f32 %v3716_v50, %v3612_v14  ;;  %5489 = vmatmul.mubr.msk.f32.gmra.mxu1 %vm1841_vm6, %v3751_v44 }
0x11a0   :  { %v5450_v17 = vpop.f32.mrf.mxu0  ;;  %5491 = vmatprep.mubr.msk.f32.mxu1 %vm5782_vm1, %v5781_v0 }
0x11a1   :  { %v3752_v36 = vmax.f32 %v3717_v3, 0.0 }
0x11a2   :  { %v3721_v12 = vpop.f32.mrf.mxu0 }
0x11a3   :  { %v3722_v45 = vadd.f32 %v3721_v12, %v3612_v14  ;;  %5492 = vmatmul.mubr.msk.f32.gmra.mxu1 %vm1841_vm6, %v3752_v36 }
0x11a4   :  { %v5453_v48 = vpop.f32.mrf.mxu0  ;;  %5494 = vmatprep.mubr.msk.f32.mxu1 %vm5782_vm1, %v5781_v0 }
0x11a5   :  { %v3753_v61 = vmax.f32 %v3722_v45, 0.0 }
0x11a6   :  { %v3726_v1 = vpop.f32.mrf.mxu0 }
0x11a7   :  { %v3727_v4 = vadd.f32 %v3726_v1, %v3612_v14  ;;  %5495 = vmatmul.mubr.msk.f32.gmra.mxu1 %vm1841_vm6, %v3753_v61 }
0x11a8   :  { %v5456_v29 = vpop.f32.mrf.mxu0  ;;  %5497 = vmatprep.mubr.msk.f32.mxu1 %vm5782_vm1, %v5781_v0 }
0x11a9   :  { %v3754_v58 = vmax.f32 %v3727_v4, 0.0 }
0x11aa   :  { %v3731_v42 = vpop.f32.mrf.mxu0 }
0x11ab   :  { %v3732_v51 = vadd.f32 %v3731_v42, %v3612_v14  ;;  %5498 = vmatmul.mubr.msk.f32.gmra.mxu1 %vm1841_vm6, %v3754_v58 }
0x11ac   :  { %v5459_v57 = vpop.f32.mrf.mxu0  ;;  %5500 = vmatprep.mubr.msk.f32.mxu1 %vm5782_vm1, %v5781_v0 }
0x11ad   :  { %v3755_v37 = vmax.f32 %v3732_v51, 0.0 }
0x11af   :  { %5501 = vmatmul.mubr.msk.f32.gmra.mxu1 %vm1841_vm6, %v3755_v37 }
0x11b0   :  { %5503 = vmatprep.mubr.msk.f32.mxu1 %vm5782_vm1, %v5781_v0 }
0x11d0   :  { %v3736_v28 = vpop.f32.mrf.mxu0 }
0x11d1   :  { %v3737_v5 = vadd.f32 %v3736_v28, %v3612_v14 }
0x11d2   :  { %v5462_v63 = vpop.f32.mrf.mxu0 }
0x11d3   :  { %v3756_v41 = vmax.f32 %v3737_v5, 0.0 }
0x11d4   :  { %v3741_v55 = vpop.f32.mrf.mxu0 }
0x11d5   :  { %v3742_v16 = vadd.f32 %v3741_v55, %v3612_v14  ;;  %5504 = vmatmul.mubr.msk.f32.gmra.mxu1 %vm1841_vm6, %v3756_v41 }
0x11d6   :  { %v5465_v38 = vpop.f32.mrf.mxu0  ;;  %5506 = vmatprep.mubr.msk.f32.mxu1 %vm5782_vm1, %v5781_v0 }
0x11d7   :  { %v3757_v10 = vmax.f32 %v3742_v16, 0.0 }
0x11d8   :  { %v3746_v53 = vpop.f32.mrf.mxu0 }
0x11d9   :  { %v3747_v62 = vadd.f32 %v3746_v53, %v3612_v14  ;;  %5507 = vmatmul.mubr.msk.f32.gmra.mxu1 %vm1841_vm6, %v3757_v10 }
0x11da   :  { %v5468_v60 = vpop.f32.mrf.mxu0  ;;  %5509 = vmatprep.mubr.msk.f32.mxu1 %vm5782_vm1, %v5781_v0 }
0x11db   :  { %v3758_v24 = vmax.f32 %v3747_v62, 0.0 }
0x11dd   :  { %5510 = vmatmul.mubr.msk.f32.gmra.mxu1 %vm1841_vm6, %v3758_v24 }
0x125b   :  { %v3865_v18 = vpop.f32.mrf.mxu1 }
0x125c   :  { %v3866_v19 = vadd.f32 %v3865_v18, %v3771_v21 }
0x125d   :  { %v5487_v39 = vpop.f32.mrf.mxu1 }
0x125e   :  { %v3909_v6 = vadd.f32 %v3866_v19, %v7749_v59 }
0x125f   :  { %v3870_v27 = vpop.f32.mrf.mxu1 }
0x1260   :  { %v3871_v56 = vadd.f32 %v3870_v27, %v3771_v21  ;;  %v3918_v33 = vsel %vm214_vm3, %v3909_v6, 0.0 }
0x1261   :  { %3919 = vadd.xlane.f32.xlu1 %v3918_v33  ;;  %v5490_v35 = vpop.f32.mrf.mxu1 }
0x1262   :  { %v3910_v31 = vadd.f32 %v3871_v56, %v7759_v46 }
0x1263   :  { %v3875_v54 = vpop.f32.mrf.mxu1 }
0x1264   :  { %v3876_v26 = vadd.f32 %v3875_v54, %v3771_v21  ;;  %v3921_v14 = vsel %vm214_vm3, %v3910_v31, 0.0 }
0x1265   :  { %3922 = vadd.xlane.f32.xlu0 %v3921_v14  ;;  %v5493_v2 = vpop.f32.mrf.mxu1 }
0x1266   :  { %v3911_v25 = vadd.f32 %v3876_v26, %v7768_v30 }
0x1267   :  { %v3880_v43 = vpop.f32.mrf.mxu1 }
0x1268   :  { %v3881_v23 = vadd.f32 %v3880_v43, %v3771_v21  ;;  %v3924_v59 = vsel %vm214_vm3, %v3911_v25, 0.0 }
0x1269   :  { %3925 = vadd.xlane.f32.xlu1 %v3924_v59  ;;  %v5496_v11 = vpop.f32.mrf.mxu1  ;;  %v4064_v59 = vld [vmem:[%s8059_s3 + $0x18] sm:$0xff] }
0x126a   :  { %v3912_v52 = vadd.f32 %v3881_v23, %v7777_v15  ;;  %5513 = vmatpush3.msra.mxu0 %v4064_v59  ;;  %v4063_v11 = vld [vmem:[%s8059_s3 + $0x10] sm:$0xff] }
0x126b   :  { %v3885_v13 = vpop.f32.mrf.mxu1  ;;  %5514 = vmatprep.subr.mxu0 %v5781_v0 }
0x126c   :  { %v3886_v40 = vadd.f32 %v3885_v13, %v3771_v21  ;;  %v3927_v46 = vsel %vm214_vm3, %v3912_v52, 0.0  ;;  %5515 = vmatpush3.msra.mxu0 %v4063_v11  ;;  %v4061_v13 = vld [vmem:[%s8059_s3] sm:$0xff] }
0x126d   :  { %3928 = vadd.xlane.f32.xlu0 %v3927_v46  ;;  %v5499_v44 = vpop.f32.mrf.mxu1  ;;  %5516 = vmatprep.subr.mxu0 %v5781_v0 }
0x126e   :  { %v3913_v50 = vadd.f32 %v3886_v40, %v7786_v34 }
0x126f   :  { %v3890_v3 = vpop.f32.mrf.mxu1 }
0x1270   :  { %v3891_v17 = vadd.f32 %v3890_v3, %v3771_v21  ;;  %v3930_v30 = vsel %vm214_vm3, %v3913_v50, 0.0 }
0x1271   :  { %3931 = vadd.xlane.f32.xlu1 %v3930_v30  ;;  %v5502_v36 = vpop.f32.mrf.mxu1 }
0x1272   :  { %v3914_v12 = vadd.f32 %v3891_v17, %v7794_v8 }
0x1274   :  { %v3933_v45 = vsel %vm214_vm3, %v3914_v12, 0.0 }
0x1275   :  { %3934 = vadd.xlane.f32.xlu0 %v3933_v45 }
0x1295   :  { %v3895_v15 = vpop.f32.mrf.mxu1 }
0x1296   :  { %v3896_v48 = vadd.f32 %v3895_v15, %v3771_v21 }
0x1297   :  { %v5505_v61 = vpop.f32.mrf.mxu1 }
0x1298   :  { %v7882_v1 = vadd.f32 %v3896_v48, %v7804_v20 }
0x1299   :  { %v3900_v4 = vpop.f32.mrf.mxu1 }
0x129a   :  { %v3901_v29 = vadd.f32 %v3900_v4, %v3771_v21  ;;  %v3936_v34 = vsel %vm214_vm3, %v7882_v1, 0.0 }
0x129b   :  { %3937 = vadd.xlane.f32.xlu1 %v3936_v34  ;;  %v5508_v58 = vpop.f32.mrf.mxu1 }
0x129c   :  { %v7887_v42 = vadd.f32 %v3901_v29, %v7813_v7 }
0x129d   :  { %v3905_v8 = vpop.f32.mrf.mxu1 }
0x129e   :  { %v3906_v51 = vadd.f32 %v3905_v8, %v3771_v21  ;;  %v3939_v57 = vsel %vm214_vm3, %v7887_v42, 0.0 }
0x129f   :  { %3940 = vadd.xlane.f32.xlu0 %v3939_v57  ;;  %v5511_v37 = vpop.f32.mrf.mxu1 }
0x12a0   :  { %v7892_v20 = vadd.f32 %v3906_v51, %v7821_v32 }
0x12a2   :  { %v3942_v28 = vsel %vm214_vm3, %v7892_v20, 0.0 }
0x12a3   :  { %3943 = vadd.xlane.f32.xlu1 %v3942_v28 }
0x12ea   :  { %v3920_v5 = vpop.xlane.xlu1 %3919 }
0x12eb   :  { %v3945_v63 = vmul.f32 0.03125, %v3920_v5 }
0x12ed   :  { %v7896_v41 = vsub.f32 %v3909_v6, %v3945_v63 }
0x12ee   :  { %v3923_v7 = vpop.xlane.xlu0 %3922 }
0x12ef   :  { %v3946_v55 = vmul.f32 0.03125, %v3923_v7  ;;  %v3963_v16 = vmul.f32 %v7896_v41, %v7896_v41 }
0x12f1   :  { %v7900_v38 = vsub.f32 %v3910_v31, %v3946_v55  ;;  %v3972_v10 = vsel %vm214_vm3, %v3963_v16, 0.0  ;;  %v7962_v55 = vrot.slane %v7624_v9, %v2107_v22 }
0x12f2   :  { %v3926_v53 = vpop.xlane.xlu1 %3925  ;;  %3973 = vadd.xlane.f32.xlu0 %v3972_v10 }
0x12f3   :  { %v3947_v32 = vmul.f32 0.03125, %v3926_v53  ;;  %v3964_v62 = vmul.f32 %v7900_v38, %v7900_v38  ;;  %v7967_v53 = vrot.slane %v7624_v9, %v2120_v49 }
0x12f5   :  { %v7905_v60 = vsub.f32 %v3911_v25, %v3947_v32  ;;  %v3975_v24 = vsel %vm214_vm3, %v3964_v62, 0.0 }
0x12f6   :  { %v3929_v21 = vpop.xlane.xlu0 %3928  ;;  %3976 = vadd.xlane.f32.xlu1 %v3975_v24 }
0x12f7   :  { %v3948_v18 = vmul.f32 0.03125, %v3929_v21  ;;  %v3965_v19 = vmul.f32 %v7905_v60, %v7905_v60 }
0x12f9   :  { %v7910_v39 = vsub.f32 %v3912_v52, %v3948_v18  ;;  %v3978_v6 = vsel %vm214_vm3, %v3965_v19, 0.0  ;;  %v4062_v52 = vld [vmem:[%s8059_s3 + $0x8] sm:$0xff] }
0x12fa   :  { %v3932_v27 = vpop.xlane.xlu1 %3931  ;;  %3979 = vadd.xlane.f32.xlu0 %v3978_v6  ;;  %5517 = vmatpush3.msra.mxu0 %v4062_v52 }
0x12fb   :  { %v3949_v56 = vmul.f32 0.03125, %v3932_v27  ;;  %v3966_v33 = vmul.f32 %v7910_v39, %v7910_v39  ;;  %5518 = vmatprep.subr.mxu0 %v5781_v0 }
0x12fc   :  { %5519 = vmatpush3.msra.mxu0 %v4061_v13 }
0x12fd   :  { %v7915_v35 = vsub.f32 %v3913_v50, %v3949_v56  ;;  %v3981_v31 = vsel %vm214_vm3, %v3966_v33, 0.0 }
0x12fe   :  { %v3935_v54 = vpop.xlane.xlu0 %3934  ;;  %3982 = vadd.xlane.f32.xlu1 %v3981_v31 }
0x12ff   :  { %v3950_v26 = vmul.f32 0.03125, %v3935_v54  ;;  %v3967_v14 = vmul.f32 %v7915_v35, %v7915_v35 }
0x1301   :  { %v7920_v2 = vsub.f32 %v3914_v12, %v3950_v26  ;;  %v3984_v25 = vsel %vm214_vm3, %v3967_v14, 0.0 }
0x1302   :  { %3985 = vadd.xlane.f32.xlu0 %v3984_v25 }
0x1303   :  { %v3968_v43 = vmul.f32 %v7920_v2, %v7920_v2 }
0x1305   :  { %v3987_v23 = vsel %vm214_vm3, %v3968_v43, 0.0 }
0x1306   :  { %3988 = vadd.xlane.f32.xlu1 %v3987_v23 }
0x1324   :  { %v3938_v40 = vpop.xlane.xlu1 %3937 }
0x1325   :  { %v3951_v46 = vmul.f32 0.03125, %v3938_v40 }
0x1327   :  { %v7942_v44 = vsub.f32 %v7882_v1, %v3951_v46 }
0x1328   :  { %v3941_v50 = vpop.xlane.xlu0 %3940 }
0x1329   :  { %v3952_v3 = vmul.f32 0.03125, %v3941_v50  ;;  %v3969_v17 = vmul.f32 %v7942_v44, %v7942_v44 }
0x132b   :  { %v7947_v30 = vsub.f32 %v7887_v42, %v3952_v3  ;;  %v3990_v36 = vsel %vm214_vm3, %v3969_v17, 0.0 }
0x132c   :  { %3991 = vadd.xlane.f32.xlu0 %v3990_v36  ;;  %v3944_v12 = vpop.xlane.xlu1 %3943 }
0x132d   :  { %v3953_v45 = vmul.f32 0.03125, %v3944_v12  ;;  %v3970_v15 = vmul.f32 %v7947_v30, %v7947_v30 }
0x132f   :  { %v7953_v48 = vsub.f32 %v7892_v20, %v3953_v45  ;;  %v3993_v61 = vsel %vm214_vm3, %v3970_v15, 0.0 }
0x1330   :  { %3994 = vadd.xlane.f32.xlu1 %v3993_v61 }
0x1331   :  { %v3971_v1 = vmul.f32 %v7953_v48, %v7953_v48 }
0x1333   :  { %v3996_v4 = vsel %vm214_vm3, %v3971_v1, 0.0 }
0x1334   :  { %3997 = vadd.xlane.f32.xlu0 %v3996_v4 }
0x137b   :  { %v3974_v29 = vpop.xlane.xlu0 %3973 }
0x137c   :  { %v3999_v34 = vmul.f32 0.03125, %v3974_v29 }
0x137e   :  { %v4008_v58 = vadd.f32 1e-05, %v3999_v34 }
0x137f   :  { %v3977_v42 = vpop.xlane.xlu1 %3976 }
0x1380   :  { %5752 = vrsqrt.f32 %v4008_v58  ;;  %v4000_v8 = vmul.f32 0.03125, %v3977_v42  ;;  %v4451_v42 = vld [vmem:[%s8060_s4] ss:$0 sm:$0xff] }
0x1382   :  { %v4009_v51 = vadd.f32 1e-05, %v4000_v8 }
0x1383   :  { %v3980_v57 = vpop.xlane.xlu0 %3979 }
0x1384   :  { %5754 = vrsqrt.f32 %v4009_v51  ;;  %v4001_v37 = vmul.f32 0.03125, %v3980_v57 }
0x1386   :  { %v4010_v20 = vadd.f32 1e-05, %v4001_v37 }
0x1387   :  { %v3983_v28 = vpop.xlane.xlu1 %3982 }
0x1388   :  { %5756 = vrsqrt.f32 %v4010_v20  ;;  %v4002_v5 = vmul.f32 0.03125, %v3983_v28 }
0x138a   :  { %v4011_v63 = vadd.f32 1e-05, %v4002_v5 }
0x138b   :  { %v3986_v7 = vpop.xlane.xlu0 %3985 }
0x138c   :  { %5758 = vrsqrt.f32 %v4011_v63  ;;  %v4003_v16 = vmul.f32 0.03125, %v3986_v7 }
0x138d   :  { %v5753_v10 = vpop.eup %5752 }
0x138e   :  { %v4026_v32 = vmul.f32 %v5753_v10, %v7896_v41  ;;  %v4012_v62 = vadd.f32 1e-05, %v4003_v16 }
0x138f   :  { %v3989_v24 = vpop.xlane.xlu1 %3988 }
0x1390   :  { %v4039_v21 = vmul.f32 %v7962_v55, %v4026_v32  ;;  %5760 = vrsqrt.f32 %v4012_v62  ;;  %v4004_v18 = vmul.f32 0.03125, %v3989_v24 }
0x1391   :  { %v5755_v19 = vpop.eup %5754 }
0x1392   :  { %v4052_v22 = vadd.f32 %v7967_v53, %v4039_v21  ;;  %v4027_v6 = vmul.f32 %v5755_v19, %v7900_v38  ;;  %v4013_v27 = vadd.f32 1e-05, %v4004_v18 }
0x1394   :  { %5762 = vrsqrt.f32 %v4013_v27  ;;  %5521 = vmatmul.mubr.msk.f32.vlgmr.msra.gmra.mxu0 %vm214_vm3, %v4052_v22  ;;  %v4040_v47 = vmul.f32 %v7962_v55, %v4027_v6 }
0x1395   :  { %v5757_v49 = vpop.eup %5756  ;;  %5523 = vmatprep.mubr.msk.f32.mxu0 %vm5782_vm1, %v5781_v0 }
0x1396   :  { %v4028_v9 = vmul.f32 %v5757_v49, %v7905_v60  ;;  %v4053_v41 = vadd.f32 %v7967_v53, %v4040_v47 }
0x1398   :  { %5524 = vmatmul.mubr.msk.f32.gmra.mxu0 %vm214_vm3, %v4053_v41  ;;  %v4041_v56 = vmul.f32 %v7962_v55, %v4028_v9 }
0x1399   :  { %v5759_v33 = vpop.eup %5758  ;;  %5526 = vmatprep.mubr.msk.f32.mxu0 %vm5782_vm1, %v5781_v0 }
0x139a   :  { %v4029_v38 = vmul.f32 %v5759_v33, %v7910_v39  ;;  %v4054_v31 = vadd.f32 %v7967_v53, %v4041_v56 }
0x139c   :  { %5527 = vmatmul.mubr.msk.f32.gmra.mxu0 %vm214_vm3, %v4054_v31  ;;  %v4042_v54 = vmul.f32 %v7962_v55, %v4029_v38 }
0x139d   :  { %v5761_v26 = vpop.eup %5760  ;;  %5529 = vmatprep.mubr.msk.f32.mxu0 %vm5782_vm1, %v5781_v0 }
0x139e   :  { %v4030_v60 = vmul.f32 %v5761_v26, %v7915_v35  ;;  %v4055_v14 = vadd.f32 %v7967_v53, %v4042_v54 }
0x13a0   :  { %5530 = vmatmul.mubr.msk.f32.gmra.mxu0 %vm214_vm3, %v4055_v14  ;;  %v4043_v25 = vmul.f32 %v7962_v55, %v4030_v60 }
0x13a1   :  { %v5763_v43 = vpop.eup %5762  ;;  %5532 = vmatprep.mubr.msk.f32.mxu0 %vm5782_vm1, %v5781_v0 }
0x13a2   :  { %v4031_v39 = vmul.f32 %v5763_v43, %v7920_v2  ;;  %v4056_v23 = vadd.f32 %v7967_v53, %v4043_v25 }
0x13a4   :  { %5533 = vmatmul.mubr.msk.f32.gmra.mxu0 %vm214_vm3, %v4056_v23  ;;  %v4044_v59 = vmul.f32 %v7962_v55, %v4031_v39 }
0x13a5   :  { %5535 = vmatprep.mubr.msk.f32.mxu0 %vm5782_vm1, %v5781_v0 }
0x13a6   :  { %v4057_v35 = vadd.f32 %v7967_v53, %v4044_v59 }
0x13a8   :  { %5536 = vmatmul.mubr.msk.f32.gmra.mxu0 %vm214_vm3, %v4057_v35 }
0x13a9   :  { %5538 = vmatprep.mubr.msk.f32.mxu0 %vm5782_vm1, %v5781_v0 }
0x13b5   :  { %v3992_v11 = vpop.xlane.xlu0 %3991 }
0x13b6   :  { %v4005_v52 = vmul.f32 0.03125, %v3992_v11 }
0x13b8   :  { %v4014_v13 = vadd.f32 1e-05, %v4005_v52 }
0x13b9   :  { %v3995_v2 = vpop.xlane.xlu1 %3994 }
0x13ba   :  { %5764 = vrsqrt.f32 %v4014_v13  ;;  %v4006_v40 = vmul.f32 0.03125, %v3995_v2 }
0x13bc   :  { %v4015_v46 = vadd.f32 1e-05, %v4006_v40 }
0x13bd   :  { %v3998_v50 = vpop.xlane.xlu0 %3997 }
0x13be   :  { %5766 = vrsqrt.f32 %v4015_v46  ;;  %v4007_v3 = vmul.f32 0.03125, %v3998_v50 }
0x13c0   :  { %v4016_v17 = vadd.f32 1e-05, %v4007_v3 }
0x13c2   :  { %5768 = vrsqrt.f32 %v4016_v17 }
0x13c7   :  { %v5765_v36 = vpop.eup %5764 }
0x13c8   :  { %v4032_v12 = vmul.f32 %v5765_v36, %v7942_v44 }
0x13ca   :  { %v4045_v45 = vmul.f32 %v7962_v55, %v4032_v12 }
0x13cb   :  { %v5767_v15 = vpop.eup %5766 }
0x13cc   :  { %v4033_v61 = vmul.f32 %v5767_v15, %v7947_v30  ;;  %v4058_v1 = vadd.f32 %v7967_v53, %v4045_v45 }
0x13ce   :  { %5539 = vmatmul.mubr.msk.f32.gmra.mxu0 %vm214_vm3, %v4058_v1  ;;  %v4046_v4 = vmul.f32 %v7962_v55, %v4033_v61 }
0x13cf   :  { %v5769_v29 = vpop.eup %5768  ;;  %5541 = vmatprep.mubr.msk.f32.mxu0 %vm5782_vm1, %v5781_v0 }
0x13d0   :  { %v4034_v34 = vmul.f32 %v5769_v29, %v7953_v48  ;;  %v4059_v58 = vadd.f32 %v7967_v53, %v4046_v4 }
0x13d2   :  { %5542 = vmatmul.mubr.msk.f32.gmra.mxu0 %vm214_vm3, %v4059_v58  ;;  %v4047_v44 = vmul.f32 %v7962_v55, %v4034_v34 }
0x13d3   :  { %5544 = vmatprep.mubr.msk.f32.mxu0 %vm5782_vm1, %v5781_v0 }
0x13d4   :  { %v4060_v30 = vadd.f32 %v7967_v53, %v4047_v44 }
0x13d6   :  { %5545 = vmatmul.mubr.msk.f32.gmra.mxu0 %vm214_vm3, %v4060_v30 }
0x1454   :  { %v4165_v8 = vpop.f32.mrf.mxu0 }
0x1455   :  { %v4166_v51 = vadd.f32 %v4451_v42, %v4165_v8 }
0x1456   :  { %v5522_v48 = vpop.f32.mrf.mxu0 }
0x1457   :  { %4209 = vst [vmem:[%s8061_s10] sm:$0xff] %v4166_v51 }
0x1458   :  { %v4170_v57 = vpop.f32.mrf.mxu0 }
0x1459   :  { %v4171_v37 = vadd.f32 %v4451_v42, %v4170_v57 }
0x145a   :  { %v5525_v20 = vpop.f32.mrf.mxu0 }
0x145b   :  { %4210 = vst [vmem:[%s8061_s10 + $0x8] sm:$0xff] %v4171_v37 }
0x145c   :  { %v4175_v0 = vpop.f32.mrf.mxu0 }
0x145d   :  { %v4176_v28 = vadd.f32 %v4451_v42, %v4175_v0 }
0x145e   :  { %v5528_v5 = vpop.f32.mrf.mxu0 }
0x145f   :  { %4211 = vst [vmem:[%s8061_s10 + $0x10] sm:$0xff] %v4176_v28 }
0x1460   :  { %v4180_v63 = vpop.f32.mrf.mxu0 }
0x1461   :  { %v4181_v7 = vadd.f32 %v4451_v42, %v4180_v63 }
0x1462   :  { %v5531_v55 = vpop.f32.mrf.mxu0 }
0x1463   :  { %4212 = vst [vmem:[%s8061_s10 + $0x18] sm:$0xff] %v4181_v7 }
0x1464   :  { %v4185_v16 = vpop.f32.mrf.mxu0 }
0x1465   :  { %v4186_v10 = vadd.f32 %v4451_v42, %v4185_v16 }
0x1466   :  { %v5534_v53 = vpop.f32.mrf.mxu0 }
0x1467   :  { %4213 = vst [vmem:[%s8061_s10 + $0x20] sm:$0xff] %v4186_v10 }
0x1468   :  { %v4190_v32 = vpop.f32.mrf.mxu0 }
0x1469   :  { %v4191_v62 = vadd.f32 %v4451_v42, %v4190_v32 }
0x146a   :  { %v5537_v24 = vpop.f32.mrf.mxu0 }
0x146b   :  { %4214 = vst [vmem:[%s8061_s10 + $0x28] sm:$0xff] %v4191_v62 }
0x148e   :  { %v4195_v21 = vpop.f32.mrf.mxu0 }
0x148f   :  { %v4196_v18 = vadd.f32 %v4451_v42, %v4195_v21 }
0x1490   :  { %v5540_v19 = vpop.f32.mrf.mxu0 }
0x1491   :  { %4215 = vst [vmem:[%s8061_s10 + $0x30] sm:$0xff] %v4196_v18 }
0x1492   :  { %v4200_v22 = vpop.f32.mrf.mxu0 }
0x1493   :  { %v4201_v6 = vadd.f32 %v4451_v42, %v4200_v22 }
0x1494   :  { %v5543_v27 = vpop.f32.mrf.mxu0 }
0x1495   :  { %4216 = vst [vmem:[%s8061_s10 + $0x38] sm:$0xff] %v4201_v6 }
0x1496   :  { %v4205_v47 = vpop.f32.mrf.mxu0 }
0x1497   :  { %v4206_v49 = vadd.f32 %v4451_v42, %v4205_v47 }
0x1498   :  { %v5546_v9 = vpop.f32.mrf.mxu0 }
0x1499   :  { %4217 = vst [vmem:[%s8061_s10 + $0x40] sm:$0xff] %v4206_v49 }

</bundles_post_ra>
